<compile_context>
chip_gen: v7x
topology: tpu7x:2x2x1
jax: 0.10.0
libtpu: 0.0.40
codegen_flags: <defaults>
</compile_context>

<pallas_src>
import functools
import math

import jax
import jax.numpy as jnp
from jax.experimental import pallas as pl
from jax.experimental.pallas import tpu as pltpu


LRELU_SLOPE = 0.01          # torch.nn.LeakyReLU() default
LANE = 128                  # TPU lane width


def _round_up(x, m):
    return (x + m - 1) // m * m


# -----------------------------------------------------------------------------
# Kernels
# -----------------------------------------------------------------------------
def _conv3x3_s2_lrelu_kernel(x_ref, w_ref, b_ref, o_ref, *, th, Wo):
    """One (batch, row-tile) block of Conv2d(k=3, s=2, p=1) + LeakyReLU.

    x_ref : (1, 1, 6*(th+1)*Wo, Cin)  bf16  six stride-2 phase planes (flattened)
    w_ref : (9, Cin, Cp)              bf16  per-(kh,kw) tap weights
    b_ref : (1, Cp)                   f32
    o_ref : (1, th*Wo, Cp)            bf16
    """
    M = th * Wo
    plane = (th + 1) * Wo
    acc = None
    for kh in range(3):
        p, dh = kh & 1, kh >> 1
        for kw in range(3):
            base = (p * 3 + kw) * plane + dh * Wo
            a = x_ref[0, 0, pl.ds(base, M), :]                    # (M, Cin) bf16
            w = w_ref[kh * 3 + kw]                                # (Cin, Cp) bf16
            t = jnp.dot(a, w, preferred_element_type=jnp.float32)
            acc = t if acc is None else acc + t
    acc = acc + b_ref[...]                                        # f32 bias
    acc = jnp.where(acc >= 0, acc, LRELU_SLOPE * acc)             # LeakyReLU in f32
    o_ref[0] = acc.astype(o_ref.dtype)


def _conv3x3_s2_lrelu_linear_kernel(x_ref, w_ref, b_ref, lw_ref, lb_ref, o_ref,
                                    *, th, Wo):
    """Final conv (output spatial 1x1) fused with EqualLinear (weight pre-scaled)."""
    M = th * Wo                                                   # == 1
    plane = (th + 1) * Wo
    acc = None
    for kh in range(3):
        p, dh = kh & 1, kh >> 1
        for kw in range(3):
            base = (p * 3 + kw) * plane + dh * Wo
            a = x_ref[0, 0, pl.ds(base, M), :]
            w = w_ref[kh * 3 + kw]
            t = jnp.dot(a, w, preferred_element_type=jnp.float32)
            acc = t if acc is None else acc + t
    acc = acc + b_ref[...]
    acc = jnp.where(acc >= 0, acc, LRELU_SLOPE * acc)
    h = acc.astype(jnp.bfloat16)                                  # (M, Cp)
    y = jnp.dot(h, lw_ref[...], preferred_element_type=jnp.float32) + lb_ref[...]
    o_ref[0] = y.astype(o_ref.dtype)


# -----------------------------------------------------------------------------
# Glue: stride-2 phase-plane rearrangement (pure data movement, ~3x input bytes)
# -----------------------------------------------------------------------------
def _pick_row_tile(Ho, Wo, target_rows=256):
    """Output-row tile so each grid step handles ~target_rows matmul rows."""
    th = max(1, min(Ho, target_rows // max(Wo, 1)))
    while Ho % th != 0:
        th -= 1
    if Ho // th > 1 and (th * Wo) % 8 != 0:   # keep output blocks 8-sublane aligned
        th = Ho
    return th


def _build_tap_planes(x_nhwc, th):
    """Six stride-2 decimated planes of the zero-padded input.

    Plane (p, kw), p in {0,1}, kw in {0,1,2}:
        plane[n, i, wo, c] = x_pad[n, 2*i + p, 2*wo + kw, c],  i in [0, Ho]
    so conv tap (kh, kw) is a contiguous row-slice of plane (kh&1, kw) at row
    offset (kh>>1)*Wo.  Row tiles carry a 1-row halo so BlockSpec blocks never
    overlap.  Returns (N, n_tiles, 6*(th+1)*Wo, C).
    """
    N, H, W, C = x_nhwc.shape
    Ho, Wo = H // 2, W // 2
    xp = jnp.pad(x_nhwc, ((0, 0), (1, 1), (1, 1), (0, 0)))
    planes = []
    for p in range(2):
        for kw in range(3):
            planes.append(xp[:, p:p + 2 * Ho + 2:2, kw:kw + 2 * Wo:2, :])
    t6 = jnp.stack(planes, axis=1)                         # (N, 6, Ho+1, Wo, C)
    n_t = Ho // th
    tiles = [t6[:, :, t * th:t * th + th + 1] for t in range(n_t)]
    t_t = jnp.stack(tiles, axis=1)                         # (N, n_t, 6, th+1, Wo, C)
    return t_t.reshape(N, n_t, 6 * (th + 1) * Wo, C)


# -----------------------------------------------------------------------------
# One conv layer (optionally fused with the trailing EqualLinear)
# -----------------------------------------------------------------------------
def conv3x3_s2_lrelu(x_nhwc, w9, bias, *, fused_linear=None):
    N, H, W, Cin = x_nhwc.shape
    assert H % 2 == 0 and W % 2 == 0, "stride-2 conv glue assumes even H/W"
    assert w9.shape[1] == Cin
    Ho, Wo = H // 2, W // 2
    Cp = w9.shape[-1]
    th = _pick_row_tile(Ho, Wo)
    n_t = Ho // th
    M = th * Wo
    taps = _build_tap_planes(x_nhwc, th)                   # (N, n_t, 6*(th+1)*Wo, Cin)

    in_specs = [
        pl.BlockSpec((1, 1, 6 * (th + 1) * Wo, Cin), lambda n, t: (n, t, 0, 0)),
        pl.BlockSpec((9, Cin, Cp), lambda n, t: (0, 0, 0)),
        pl.BlockSpec((1, Cp), lambda n, t: (0, 0)),
    ]
    args = [taps, w9, bias]
    flops = 2 * N * Ho * Wo * 9 * Cin * Cp
    bytes_accessed = (taps.size * taps.dtype.itemsize
                      + w9.size * w9.dtype.itemsize
                      + bias.size * bias.dtype.itemsize)

    if fused_linear is None:
        kernel = functools.partial(_conv3x3_s2_lrelu_kernel, th=th, Wo=Wo)
        out_dtype = jnp.bfloat16
    else:
        lw, lb = fused_linear
        in_specs += [
            pl.BlockSpec((Cp, Cp), lambda n, t: (0, 0)),
            pl.BlockSpec((1, Cp), lambda n, t: (0, 0)),
        ]
        args += [lw, lb]
        kernel = functools.partial(_conv3x3_s2_lrelu_linear_kernel, th=th, Wo=Wo)
        out_dtype = jnp.float32
        flops += 2 * N * Cp * Cp
        bytes_accessed += lw.size * lw.dtype.itemsize + lb.size * lb.dtype.itemsize

    out_bytes = 2 if out_dtype == jnp.bfloat16 else 4
    bytes_accessed += N * Ho * Wo * Cp * out_bytes

    return pl.pallas_call(
        kernel,
        out_shape=jax.ShapeDtypeStruct((N, Ho * Wo, Cp), out_dtype),
        grid=(N, n_t),
        in_specs=in_specs,
        out_specs=pl.BlockSpec((1, M, Cp), lambda n, t: (n, t, 0)),
        compiler_params=pltpu.CompilerParams(
            dimension_semantics=("parallel", "parallel")),
        cost_estimate=pl.CostEstimate(
            flops=flops, transcendentals=0, bytes_accessed=bytes_accessed),
    )(*args)


# -----------------------------------------------------------------------------
# Parameters (PyTorch layout) + one-time kernel-layout preparation
# -----------------------------------------------------------------------------
def init_gradual_style_block(key, in_c, out_c, spatial):
    """Parameters in PyTorch layout (Conv2d OIHW, EqualLinear (out, in))."""
    num_pools = int(math.log2(spatial))
    convs = []
    c_in = in_c
    for _ in range(num_pools):
        key, kw, kb = jax.random.split(key, 3)
        w = 0.1 * jax.random.normal(kw, (out_c, c_in, 3, 3), jnp.float32)
        b = 0.01 * jax.random.normal(kb, (out_c,), jnp.float32)
        convs.append((w, b))
        c_in = out_c
    key, kl = jax.random.split(key)
    lw = jax.random.normal(kl, (out_c, out_c), jnp.float32)   # EqualLinear weight
    lb = jnp.zeros((out_c,), jnp.float32)                     # EqualLinear bias (init 0)
    return {"convs": convs, "linear": (lw, lb)}


def prepare_params(params, in_c, out_c):
    """One-time re-layout: conv OIHW -> (9, Cin_pad, Cp) bf16, bias -> (1, Cp) f32,
    EqualLinear weight pre-scaled by 1/sqrt(out_c), transposed, padded to (Cp, Cp)."""
    Cp = _round_up(out_c, LANE)
    Cin0 = _round_up(in_c, LANE)
    conv_params = []
    for li, (w, b) in enumerate(params["convs"]):
        c_in = w.shape[1]
        cin_pad = Cin0 if li == 0 else Cp      # later layers consume padded activations
        w9 = jnp.transpose(w, (2, 3, 1, 0)).reshape(9, c_in, out_c)
        w9 = jnp.pad(w9, ((0, 0), (0, cin_pad - c_in), (0, Cp - out_c)))
        b9 = jnp.pad(b, (0, Cp - out_c)).reshape(1, Cp)
        conv_params.append((w9.astype(jnp.bfloat16), b9.astype(jnp.float32)))
    lw, lb = params["linear"]
    scale = 1.0 / math.sqrt(out_c)             # EqualLinear: lr_mul = 1
    lwt = jnp.pad((lw * scale).T, ((0, Cp - out_c), (0, Cp - out_c)))
    lbt = jnp.pad(lb, (0, Cp - out_c)).reshape(1, Cp)
    return conv_params, (lwt.astype(jnp.bfloat16), lbt.astype(jnp.float32))


# -----------------------------------------------------------------------------
# Forward pass
# -----------------------------------------------------------------------------
@functools.partial(jax.jit, static_argnames=("out_c",))
def gradual_style_block_forward(x_nchw, conv_params, linear_params, *, out_c):
    N, in_c = x_nchw.shape[0], x_nchw.shape[1]
    cin0_pad = _round_up(in_c, LANE)
    # NCHW (PyTorch) -> NHWC; bf16 on the MXU; channel-pad to a lane multiple.
    x = jnp.transpose(x_nchw, (0, 2, 3, 1)).astype(jnp.bfloat16)
    x = jnp.pad(x, ((0, 0), (0, 0), (0, 0), (0, cin0_pad - in_c)))

    n_layers = len(conv_params)
    y = None
    for li, (w9, b9) in enumerate(conv_params):
        if li == n_layers - 1:
            # Last conv reaches 1x1 spatial -> fuse EqualLinear into the same call.
            y = conv3x3_s2_lrelu(x, w9, b9, fused_linear=linear_params)
        else:
            H, W = x.shape[1] // 2, x.shape[2] // 2
            y = conv3x3_s2_lrelu(x, w9, b9)
            x = y.reshape(N, H, W, y.shape[-1])

    Cp = y.shape[-1]
    # == x.view(-1, out_c) then EqualLinear (already applied in-kernel); strip channel pad.
    return y.reshape(N, Cp)[:, :out_c]


# -----------------------------------------------------------------------------
# Pure-JAX reference (for correctness check only; not on the kernel path)
# -----------------------------------------------------------------------------
def _reference_forward(x_nchw, params, out_c):
    x = x_nchw.astype(jnp.float32)
    for (w, b) in params["convs"]:
        x = jax.lax.conv_general_dilated(
            x, w, window_strides=(2, 2), padding=((1, 1), (1, 1)),
            dimension_numbers=("NCHW", "OIHW", "NCHW"))
        x = x + b.reshape(1, -1, 1, 1)
        x = jnp.where(x >= 0, x, LRELU_SLOPE * x)
    x = x.reshape(-1, out_c)
    lw, lb = params["linear"]
    return x @ (lw * (1.0 / math.sqrt(out_c))).T + lb


# -----------------------------------------------------------------------------
if __name__ == "__main__":
    # Small shapes consistent with the module: batch=2, in_c=4, out_c=32, spatial=16
    batch, in_c, out_c, spatial = 2, 4, 32, 16

    key = jax.random.PRNGKey(0)
    key, kx = jax.random.split(key)
    x = jax.random.normal(kx, (batch, in_c, spatial, spatial), jnp.float32)

    params = init_gradual_style_block(key, in_c, out_c, spatial)
    conv_params, linear_params = prepare_params(params, in_c, out_c)

    out = gradual_style_block_forward(x, conv_params, linear_params, out_c=out_c)
    out = jax.block_until_ready(out)

    assert out.shape == (batch, out_c), out.shape
    assert out.dtype == jnp.float32

    # Numerical sanity check vs f32 reference (kernel runs bf16 with f32 accum).
    ref = jax.block_until_ready(_reference_forward(x, params, out_c))
    max_err = float(jnp.max(jnp.abs(out - ref)))
    assert jnp.allclose(out, ref, rtol=0.1, atol=0.1), f"max abs err {max_err}"

    print("KERNEL_OK")
</pallas_src>

<mosaic_0001>
module attributes {stable_mosaic.version = 11 : i64} {
  func.func @_conv3x3_s2_lrelu_kernel(%arg0: i32, %arg1: i32, %arg2: memref<1x1x432x128xbf16, #tpu.memory_space<vmem>>, %arg3: memref<9x128x128xbf16, #tpu.memory_space<vmem>>, %arg4: memref<1x128xf32, #tpu.memory_space<vmem>>, %arg5: memref<1x64x128xbf16, #tpu.memory_space<vmem>>) attributes {dimension_semantics = [#tpu.dimension_semantics<parallel>, #tpu.dimension_semantics<parallel>], iteration_bounds = array<i64: 2, 1>, scalar_prefetch = 0 : i64, scratch_operands = 0 : i64, tpu.core_type = #tpu.core_type<tc>, window_params = [{transform_indices = @transform_0, window_bounds = array<i64: 1, 1, 432, 128>}, {pipeline_mode = #tpu.pipeline_mode<synchronous>, transform_indices = @transform_1, window_bounds = array<i64: 9, 128, 128>}, {pipeline_mode = #tpu.pipeline_mode<synchronous>, transform_indices = @transform_2, window_bounds = array<i64: 1, 128>}, {transform_indices = @transform_3, window_bounds = array<i64: 1, 64, 128>}]} {
    %c0 = arith.constant 0 : index
    %c0_0 = arith.constant 0 : index
    %c0_1 = arith.constant 0 : index
    %c0_2 = arith.constant 0 : index
    %0 = vector.load %arg2[%c0, %c0_0, %c0_1, %c0_2] : memref<1x1x432x128xbf16, #tpu.memory_space<vmem>>, vector<1x1x64x128xbf16>
    %1 = vector.shape_cast %0 : vector<1x1x64x128xbf16> to vector<64x128xbf16>
    %c0_3 = arith.constant 0 : index
    %c0_4 = arith.constant 0 : index
    %c0_5 = arith.constant 0 : index
    %2 = vector.load %arg3[%c0_3, %c0_4, %c0_5] : memref<9x128x128xbf16, #tpu.memory_space<vmem>>, vector<1x128x128xbf16>
    %3 = vector.shape_cast %2 : vector<1x128x128xbf16> to vector<128x128xbf16>
    %cst = arith.constant dense<0.000000e+00> : vector<64x128xf32>
    %4 = tpu.matmul %1, %3, %cst {dimension_numbers = #tpu.dot_dimension_numbers<[1], [0], [0], [1], [0, 0, 1, 1], [], []>} : vector<64x128xbf16>, vector<128x128xbf16>, vector<64x128xf32> -> vector<64x128xf32>
    %c0_6 = arith.constant 0 : index
    %c0_7 = arith.constant 0 : index
    %c72 = arith.constant 72 : index
    %c0_8 = arith.constant 0 : index
    %5 = vector.load %arg2[%c0_6, %c0_7, %c72, %c0_8] : memref<1x1x432x128xbf16, #tpu.memory_space<vmem>>, vector<1x1x64x128xbf16>
    %6 = vector.shape_cast %5 : vector<1x1x64x128xbf16> to vector<64x128xbf16>
    %c1 = arith.constant 1 : index
    %c0_9 = arith.constant 0 : index
    %c0_10 = arith.constant 0 : index
    %7 = vector.load %arg3[%c1, %c0_9, %c0_10] : memref<9x128x128xbf16, #tpu.memory_space<vmem>>, vector<1x128x128xbf16>
    %8 = vector.shape_cast %7 : vector<1x128x128xbf16> to vector<128x128xbf16>
    %cst_11 = arith.constant dense<0.000000e+00> : vector<64x128xf32>
    %9 = tpu.matmul %6, %8, %cst_11 {dimension_numbers = #tpu.dot_dimension_numbers<[1], [0], [0], [1], [0, 0, 1, 1], [], []>} : vector<64x128xbf16>, vector<128x128xbf16>, vector<64x128xf32> -> vector<64x128xf32>
    %10 = arith.addf %4, %9 : vector<64x128xf32>
    %c0_12 = arith.constant 0 : index
    %c0_13 = arith.constant 0 : index
    %c144 = arith.constant 144 : index
    %c0_14 = arith.constant 0 : index
    %11 = vector.load %arg2[%c0_12, %c0_13, %c144, %c0_14] : memref<1x1x432x128xbf16, #tpu.memory_space<vmem>>, vector<1x1x64x128xbf16>
    %12 = vector.shape_cast %11 : vector<1x1x64x128xbf16> to vector<64x128xbf16>
    %c2 = arith.constant 2 : index
    %c0_15 = arith.constant 0 : index
    %c0_16 = arith.constant 0 : index
    %13 = vector.load %arg3[%c2, %c0_15, %c0_16] : memref<9x128x128xbf16, #tpu.memory_space<vmem>>, vector<1x128x128xbf16>
    %14 = vector.shape_cast %13 : vector<1x128x128xbf16> to vector<128x128xbf16>
    %cst_17 = arith.constant dense<0.000000e+00> : vector<64x128xf32>
    %15 = tpu.matmul %12, %14, %cst_17 {dimension_numbers = #tpu.dot_dimension_numbers<[1], [0], [0], [1], [0, 0, 1, 1], [], []>} : vector<64x128xbf16>, vector<128x128xbf16>, vector<64x128xf32> -> vector<64x128xf32>
    %16 = arith.addf %10, %15 : vector<64x128xf32>
    %c0_18 = arith.constant 0 : index
    %c0_19 = arith.constant 0 : index
    %c216 = arith.constant 216 : index
    %c0_20 = arith.constant 0 : index
    %17 = vector.load %arg2[%c0_18, %c0_19, %c216, %c0_20] : memref<1x1x432x128xbf16, #tpu.memory_space<vmem>>, vector<1x1x64x128xbf16>
    %18 = vector.shape_cast %17 : vector<1x1x64x128xbf16> to vector<64x128xbf16>
    %c3 = arith.constant 3 : index
    %c0_21 = arith.constant 0 : index
    %c0_22 = arith.constant 0 : index
    %19 = vector.load %arg3[%c3, %c0_21, %c0_22] : memref<9x128x128xbf16, #tpu.memory_space<vmem>>, vector<1x128x128xbf16>
    %20 = vector.shape_cast %19 : vector<1x128x128xbf16> to vector<128x128xbf16>
    %cst_23 = arith.constant dense<0.000000e+00> : vector<64x128xf32>
    %21 = tpu.matmul %18, %20, %cst_23 {dimension_numbers = #tpu.dot_dimension_numbers<[1], [0], [0], [1], [0, 0, 1, 1], [], []>} : vector<64x128xbf16>, vector<128x128xbf16>, vector<64x128xf32> -> vector<64x128xf32>
    %22 = arith.addf %16, %21 : vector<64x128xf32>
    %c0_24 = arith.constant 0 : index
    %c0_25 = arith.constant 0 : index
    %c288 = arith.constant 288 : index
    %c0_26 = arith.constant 0 : index
    %23 = vector.load %arg2[%c0_24, %c0_25, %c288, %c0_26] : memref<1x1x432x128xbf16, #tpu.memory_space<vmem>>, vector<1x1x64x128xbf16>
    %24 = vector.shape_cast %23 : vector<1x1x64x128xbf16> to vector<64x128xbf16>
    %c4 = arith.constant 4 : index
    %c0_27 = arith.constant 0 : index
    %c0_28 = arith.constant 0 : index
    %25 = vector.load %arg3[%c4, %c0_27, %c0_28] : memref<9x128x128xbf16, #tpu.memory_space<vmem>>, vector<1x128x128xbf16>
    %26 = vector.shape_cast %25 : vector<1x128x128xbf16> to vector<128x128xbf16>
    %cst_29 = arith.constant dense<0.000000e+00> : vector<64x128xf32>
    %27 = tpu.matmul %24, %26, %cst_29 {dimension_numbers = #tpu.dot_dimension_numbers<[1], [0], [0], [1], [0, 0, 1, 1], [], []>} : vector<64x128xbf16>, vector<128x128xbf16>, vector<64x128xf32> -> vector<64x128xf32>
    %28 = arith.addf %22, %27 : vector<64x128xf32>
    %c0_30 = arith.constant 0 : index
    %c0_31 = arith.constant 0 : index
    %c360 = arith.constant 360 : index
    %c0_32 = arith.constant 0 : index
    %29 = vector.load %arg2[%c0_30, %c0_31, %c360, %c0_32] : memref<1x1x432x128xbf16, #tpu.memory_space<vmem>>, vector<1x1x64x128xbf16>
    %30 = vector.shape_cast %29 : vector<1x1x64x128xbf16> to vector<64x128xbf16>
    %c5 = arith.constant 5 : index
    %c0_33 = arith.constant 0 : index
    %c0_34 = arith.constant 0 : index
    %31 = vector.load %arg3[%c5, %c0_33, %c0_34] : memref<9x128x128xbf16, #tpu.memory_space<vmem>>, vector<1x128x128xbf16>
    %32 = vector.shape_cast %31 : vector<1x128x128xbf16> to vector<128x128xbf16>
    %cst_35 = arith.constant dense<0.000000e+00> : vector<64x128xf32>
    %33 = tpu.matmul %30, %32, %cst_35 {dimension_numbers = #tpu.dot_dimension_numbers<[1], [0], [0], [1], [0, 0, 1, 1], [], []>} : vector<64x128xbf16>, vector<128x128xbf16>, vector<64x128xf32> -> vector<64x128xf32>
    %34 = arith.addf %28, %33 : vector<64x128xf32>
    %c0_36 = arith.constant 0 : index
    %c0_37 = arith.constant 0 : index
    %c8 = arith.constant 8 : index
    %c0_38 = arith.constant 0 : index
    %35 = vector.load %arg2[%c0_36, %c0_37, %c8, %c0_38] : memref<1x1x432x128xbf16, #tpu.memory_space<vmem>>, vector<1x1x64x128xbf16>
    %36 = vector.shape_cast %35 : vector<1x1x64x128xbf16> to vector<64x128xbf16>
    %c6 = arith.constant 6 : index
    %c0_39 = arith.constant 0 : index
    %c0_40 = arith.constant 0 : index
    %37 = vector.load %arg3[%c6, %c0_39, %c0_40] : memref<9x128x128xbf16, #tpu.memory_space<vmem>>, vector<1x128x128xbf16>
    %38 = vector.shape_cast %37 : vector<1x128x128xbf16> to vector<128x128xbf16>
    %cst_41 = arith.constant dense<0.000000e+00> : vector<64x128xf32>
    %39 = tpu.matmul %36, %38, %cst_41 {dimension_numbers = #tpu.dot_dimension_numbers<[1], [0], [0], [1], [0, 0, 1, 1], [], []>} : vector<64x128xbf16>, vector<128x128xbf16>, vector<64x128xf32> -> vector<64x128xf32>
    %40 = arith.addf %34, %39 : vector<64x128xf32>
    %c0_42 = arith.constant 0 : index
    %c0_43 = arith.constant 0 : index
    %c80 = arith.constant 80 : index
    %c0_44 = arith.constant 0 : index
    %41 = vector.load %arg2[%c0_42, %c0_43, %c80, %c0_44] : memref<1x1x432x128xbf16, #tpu.memory_space<vmem>>, vector<1x1x64x128xbf16>
    %42 = vector.shape_cast %41 : vector<1x1x64x128xbf16> to vector<64x128xbf16>
    %c7 = arith.constant 7 : index
    %c0_45 = arith.constant 0 : index
    %c0_46 = arith.constant 0 : index
    %43 = vector.load %arg3[%c7, %c0_45, %c0_46] : memref<9x128x128xbf16, #tpu.memory_space<vmem>>, vector<1x128x128xbf16>
    %44 = vector.shape_cast %43 : vector<1x128x128xbf16> to vector<128x128xbf16>
    %cst_47 = arith.constant dense<0.000000e+00> : vector<64x128xf32>
    %45 = tpu.matmul %42, %44, %cst_47 {dimension_numbers = #tpu.dot_dimension_numbers<[1], [0], [0], [1], [0, 0, 1, 1], [], []>} : vector<64x128xbf16>, vector<128x128xbf16>, vector<64x128xf32> -> vector<64x128xf32>
    %46 = arith.addf %40, %45 : vector<64x128xf32>
    %c0_48 = arith.constant 0 : index
    %c0_49 = arith.constant 0 : index
    %c152 = arith.constant 152 : index
    %c0_50 = arith.constant 0 : index
    %47 = vector.load %arg2[%c0_48, %c0_49, %c152, %c0_50] : memref<1x1x432x128xbf16, #tpu.memory_space<vmem>>, vector<1x1x64x128xbf16>
    %48 = vector.shape_cast %47 : vector<1x1x64x128xbf16> to vector<64x128xbf16>
    %c8_51 = arith.constant 8 : index
    %c0_52 = arith.constant 0 : index
    %c0_53 = arith.constant 0 : index
    %49 = vector.load %arg3[%c8_51, %c0_52, %c0_53] : memref<9x128x128xbf16, #tpu.memory_space<vmem>>, vector<1x128x128xbf16>
    %50 = vector.shape_cast %49 : vector<1x128x128xbf16> to vector<128x128xbf16>
    %cst_54 = arith.constant dense<0.000000e+00> : vector<64x128xf32>
    %51 = tpu.matmul %48, %50, %cst_54 {dimension_numbers = #tpu.dot_dimension_numbers<[1], [0], [0], [1], [0, 0, 1, 1], [], []>} : vector<64x128xbf16>, vector<128x128xbf16>, vector<64x128xf32> -> vector<64x128xf32>
    %52 = arith.addf %46, %51 : vector<64x128xf32>
    %c0_55 = arith.constant 0 : index
    %c0_56 = arith.constant 0 : index
    %53 = vector.load %arg4[%c0_55, %c0_56] : memref<1x128xf32, #tpu.memory_space<vmem>>, vector<1x128xf32>
    %54 = vector.broadcast %53 : vector<1x128xf32> to vector<64x128xf32>
    %55 = arith.addf %52, %54 : vector<64x128xf32>
    %cst_57 = arith.constant 0.000000e+00 : f32
    %56 = vector.broadcast %cst_57 : f32 to vector<64x128xf32>
    %57 = arith.cmpf oge, %55, %56 : vector<64x128xf32>
    %cst_58 = arith.constant 0.00999999977 : f32
    %58 = vector.broadcast %cst_58 : f32 to vector<64x128xf32>
    %59 = arith.mulf %58, %55 : vector<64x128xf32>
    %60 = arith.select %57, %55, %59 : vector<64x128xi1>, vector<64x128xf32>
    %61 = arith.truncf %60 : vector<64x128xf32> to vector<64x128xbf16>
    %c0_59 = arith.constant 0 : index
    %c0_60 = arith.constant 0 : index
    %c0_61 = arith.constant 0 : index
    %62 = vector.load %arg5[%c0_59, %c0_60, %c0_61] : memref<1x64x128xbf16, #tpu.memory_space<vmem>>, vector<1x64x128xbf16>
    %63 = vector.shape_cast %62 : vector<1x64x128xbf16> to vector<64x128xbf16>
    %64 = vector.shape_cast %61 : vector<64x128xbf16> to vector<1x64x128xbf16>
    tpu.vector_store %arg5[%c0_59, %c0_60, %c0_61], %64 {strides = array<i32>} : memref<1x64x128xbf16, #tpu.memory_space<vmem>>, vector<1x64x128xbf16>,
    return
  }
  func.func @transform_0(%arg0: i32, %arg1: i32) -> (i32, i32, i32, i32) {
    %c0_i32 = arith.constant 0 : i32
    %c0_i32_0 = arith.constant 0 : i32
    %c0_i32_1 = arith.constant 0 : i32
    return %arg0, %arg1, %c0_i32, %c0_i32_0 : i32, i32, i32, i32
  }
  func.func @transform_1(%arg0: i32, %arg1: i32) -> (i32, i32, i32) {
    %c0_i32 = arith.constant 0 : i32
    %c0_i32_0 = arith.constant 0 : i32
    %c0_i32_1 = arith.constant 0 : i32
    %c0_i32_2 = arith.constant 0 : i32
    return %c0_i32, %c0_i32_0, %c0_i32_1 : i32, i32, i32
  }
  func.func @transform_2(%arg0: i32, %arg1: i32) -> (i32, i32) {
    %c0_i32 = arith.constant 0 : i32
    %c0_i32_0 = arith.constant 0 : i32
    %c0_i32_1 = arith.constant 0 : i32
    return %c0_i32, %c0_i32_0 : i32, i32
  }
  func.func @transform_3(%arg0: i32, %arg1: i32) -> (i32, i32, i32) {
    %c0_i32 = arith.constant 0 : i32
    %c0_i32_0 = arith.constant 0 : i32
    return %arg0, %arg1, %c0_i32 : i32, i32, i32
  }
}

module attributes {stable_mosaic.version = 11 : i64} {
  func.func @_conv3x3_s2_lrelu_kernel(%arg0: i32, %arg1: i32, %arg2: memref<1x1x120x128xbf16, #tpu.memory_space<vmem>>, %arg3: memref<9x128x128xbf16, #tpu.memory_space<vmem>>, %arg4: memref<1x128xf32, #tpu.memory_space<vmem>>, %arg5: memref<1x16x128xbf16, #tpu.memory_space<vmem>>) attributes {dimension_semantics = [#tpu.dimension_semantics<parallel>, #tpu.dimension_semantics<parallel>], iteration_bounds = array<i64: 2, 1>, scalar_prefetch = 0 : i64, scratch_operands = 0 : i64, tpu.core_type = #tpu.core_type<tc>, window_params = [{transform_indices = @transform_0, window_bounds = array<i64: 1, 1, 120, 128>}, {pipeline_mode = #tpu.pipeline_mode<synchronous>, transform_indices = @transform_1, window_bounds = array<i64: 9, 128, 128>}, {pipeline_mode = #tpu.pipeline_mode<synchronous>, transform_indices = @transform_2, window_bounds = array<i64: 1, 128>}, {transform_indices = @transform_3, window_bounds = array<i64: 1, 16, 128>}]} {
    %c0 = arith.constant 0 : index
    %c0_0 = arith.constant 0 : index
    %c0_1 = arith.constant 0 : index
    %c0_2 = arith.constant 0 : index
    %0 = vector.load %arg2[%c0, %c0_0, %c0_1, %c0_2] : memref<1x1x120x128xbf16, #tpu.memory_space<vmem>>, vector<1x1x16x128xbf16>
    %1 = vector.shape_cast %0 : vector<1x1x16x128xbf16> to vector<16x128xbf16>
    %c0_3 = arith.constant 0 : index
    %c0_4 = arith.constant 0 : index
    %c0_5 = arith.constant 0 : index
    %2 = vector.load %arg3[%c0_3, %c0_4, %c0_5] : memref<9x128x128xbf16, #tpu.memory_space<vmem>>, vector<1x128x128xbf16>
    %3 = vector.shape_cast %2 : vector<1x128x128xbf16> to vector<128x128xbf16>
    %cst = arith.constant dense<0.000000e+00> : vector<16x128xf32>
    %4 = tpu.matmul %1, %3, %cst {dimension_numbers = #tpu.dot_dimension_numbers<[1], [0], [0], [1], [0, 0, 1, 1], [], []>} : vector<16x128xbf16>, vector<128x128xbf16>, vector<16x128xf32> -> vector<16x128xf32>
    %c0_6 = arith.constant 0 : index
    %c0_7 = arith.constant 0 : index
    %c20 = arith.constant 20 : index
    %c0_8 = arith.constant 0 : index
    %5 = vector.load %arg2[%c0_6, %c0_7, %c20, %c0_8] : memref<1x1x120x128xbf16, #tpu.memory_space<vmem>>, vector<1x1x16x128xbf16>
    %6 = vector.shape_cast %5 : vector<1x1x16x128xbf16> to vector<16x128xbf16>
    %c1 = arith.constant 1 : index
    %c0_9 = arith.constant 0 : index
    %c0_10 = arith.constant 0 : index
    %7 = vector.load %arg3[%c1, %c0_9, %c0_10] : memref<9x128x128xbf16, #tpu.memory_space<vmem>>, vector<1x128x128xbf16>
    %8 = vector.shape_cast %7 : vector<1x128x128xbf16> to vector<128x128xbf16>
    %cst_11 = arith.constant dense<0.000000e+00> : vector<16x128xf32>
    %9 = tpu.matmul %6, %8, %cst_11 {dimension_numbers = #tpu.dot_dimension_numbers<[1], [0], [0], [1], [0, 0, 1, 1], [], []>} : vector<16x128xbf16>, vector<128x128xbf16>, vector<16x128xf32> -> vector<16x128xf32>
    %10 = arith.addf %4, %9 : vector<16x128xf32>
    %c0_12 = arith.constant 0 : index
    %c0_13 = arith.constant 0 : index
    %c40 = arith.constant 40 : index
    %c0_14 = arith.constant 0 : index
    %11 = vector.load %arg2[%c0_12, %c0_13, %c40, %c0_14] : memref<1x1x120x128xbf16, #tpu.memory_space<vmem>>, vector<1x1x16x128xbf16>
    %12 = vector.shape_cast %11 : vector<1x1x16x128xbf16> to vector<16x128xbf16>
    %c2 = arith.constant 2 : index
    %c0_15 = arith.constant 0 : index
    %c0_16 = arith.constant 0 : index
    %13 = vector.load %arg3[%c2, %c0_15, %c0_16] : memref<9x128x128xbf16, #tpu.memory_space<vmem>>, vector<1x128x128xbf16>
    %14 = vector.shape_cast %13 : vector<1x128x128xbf16> to vector<128x128xbf16>
    %cst_17 = arith.constant dense<0.000000e+00> : vector<16x128xf32>
    %15 = tpu.matmul %12, %14, %cst_17 {dimension_numbers = #tpu.dot_dimension_numbers<[1], [0], [0], [1], [0, 0, 1, 1], [], []>} : vector<16x128xbf16>, vector<128x128xbf16>, vector<16x128xf32> -> vector<16x128xf32>
    %16 = arith.addf %10, %15 : vector<16x128xf32>
    %c0_18 = arith.constant 0 : index
    %c0_19 = arith.constant 0 : index
    %c60 = arith.constant 60 : index
    %c0_20 = arith.constant 0 : index
    %17 = vector.load %arg2[%c0_18, %c0_19, %c60, %c0_20] : memref<1x1x120x128xbf16, #tpu.memory_space<vmem>>, vector<1x1x16x128xbf16>
    %18 = vector.shape_cast %17 : vector<1x1x16x128xbf16> to vector<16x128xbf16>
    %c3 = arith.constant 3 : index
    %c0_21 = arith.constant 0 : index
    %c0_22 = arith.constant 0 : index
    %19 = vector.load %arg3[%c3, %c0_21, %c0_22] : memref<9x128x128xbf16, #tpu.memory_space<vmem>>, vector<1x128x128xbf16>
    %20 = vector.shape_cast %19 : vector<1x128x128xbf16> to vector<128x128xbf16>
    %cst_23 = arith.constant dense<0.000000e+00> : vector<16x128xf32>
    %21 = tpu.matmul %18, %20, %cst_23 {dimension_numbers = #tpu.dot_dimension_numbers<[1], [0], [0], [1], [0, 0, 1, 1], [], []>} : vector<16x128xbf16>, vector<128x128xbf16>, vector<16x128xf32> -> vector<16x128xf32>
    %22 = arith.addf %16, %21 : vector<16x128xf32>
    %c0_24 = arith.constant 0 : index
    %c0_25 = arith.constant 0 : index
    %c80 = arith.constant 80 : index
    %c0_26 = arith.constant 0 : index
    %23 = vector.load %arg2[%c0_24, %c0_25, %c80, %c0_26] : memref<1x1x120x128xbf16, #tpu.memory_space<vmem>>, vector<1x1x16x128xbf16>
    %24 = vector.shape_cast %23 : vector<1x1x16x128xbf16> to vector<16x128xbf16>
    %c4 = arith.constant 4 : index
    %c0_27 = arith.constant 0 : index
    %c0_28 = arith.constant 0 : index
    %25 = vector.load %arg3[%c4, %c0_27, %c0_28] : memref<9x128x128xbf16, #tpu.memory_space<vmem>>, vector<1x128x128xbf16>
    %26 = vector.shape_cast %25 : vector<1x128x128xbf16> to vector<128x128xbf16>
    %cst_29 = arith.constant dense<0.000000e+00> : vector<16x128xf32>
    %27 = tpu.matmul %24, %26, %cst_29 {dimension_numbers = #tpu.dot_dimension_numbers<[1], [0], [0], [1], [0, 0, 1, 1], [], []>} : vector<16x128xbf16>, vector<128x128xbf16>, vector<16x128xf32> -> vector<16x128xf32>
    %28 = arith.addf %22, %27 : vector<16x128xf32>
    %c0_30 = arith.constant 0 : index
    %c0_31 = arith.constant 0 : index
    %c100 = arith.constant 100 : index
    %c0_32 = arith.constant 0 : index
    %29 = vector.load %arg2[%c0_30, %c0_31, %c100, %c0_32] : memref<1x1x120x128xbf16, #tpu.memory_space<vmem>>, vector<1x1x16x128xbf16>
    %30 = vector.shape_cast %29 : vector<1x1x16x128xbf16> to vector<16x128xbf16>
    %c5 = arith.constant 5 : index
    %c0_33 = arith.constant 0 : index
    %c0_34 = arith.constant 0 : index
    %31 = vector.load %arg3[%c5, %c0_33, %c0_34] : memref<9x128x128xbf16, #tpu.memory_space<vmem>>, vector<1x128x128xbf16>
    %32 = vector.shape_cast %31 : vector<1x128x128xbf16> to vector<128x128xbf16>
    %cst_35 = arith.constant dense<0.000000e+00> : vector<16x128xf32>
    %33 = tpu.matmul %30, %32, %cst_35 {dimension_numbers = #tpu.dot_dimension_numbers<[1], [0], [0], [1], [0, 0, 1, 1], [], []>} : vector<16x128xbf16>, vector<128x128xbf16>, vector<16x128xf32> -> vector<16x128xf32>
    %34 = arith.addf %28, %33 : vector<16x128xf32>
    %c0_36 = arith.constant 0 : index
    %c0_37 = arith.constant 0 : index
    %c4_38 = arith.constant 4 : index
    %c0_39 = arith.constant 0 : index
    %35 = vector.load %arg2[%c0_36, %c0_37, %c4_38, %c0_39] : memref<1x1x120x128xbf16, #tpu.memory_space<vmem>>, vector<1x1x16x128xbf16>
    %36 = vector.shape_cast %35 : vector<1x1x16x128xbf16> to vector<16x128xbf16>
    %c6 = arith.constant 6 : index
    %c0_40 = arith.constant 0 : index
    %c0_41 = arith.constant 0 : index
    %37 = vector.load %arg3[%c6, %c0_40, %c0_41] : memref<9x128x128xbf16, #tpu.memory_space<vmem>>, vector<1x128x128xbf16>
    %38 = vector.shape_cast %37 : vector<1x128x128xbf16> to vector<128x128xbf16>
    %cst_42 = arith.constant dense<0.000000e+00> : vector<16x128xf32>
    %39 = tpu.matmul %36, %38, %cst_42 {dimension_numbers = #tpu.dot_dimension_numbers<[1], [0], [0], [1], [0, 0, 1, 1], [], []>} : vector<16x128xbf16>, vector<128x128xbf16>, vector<16x128xf32> -> vector<16x128xf32>
    %40 = arith.addf %34, %39 : vector<16x128xf32>
    %c0_43 = arith.constant 0 : index
    %c0_44 = arith.constant 0 : index
    %c24 = arith.constant 24 : index
    %c0_45 = arith.constant 0 : index
    %41 = vector.load %arg2[%c0_43, %c0_44, %c24, %c0_45] : memref<1x1x120x128xbf16, #tpu.memory_space<vmem>>, vector<1x1x16x128xbf16>
    %42 = vector.shape_cast %41 : vector<1x1x16x128xbf16> to vector<16x128xbf16>
    %c7 = arith.constant 7 : index
    %c0_46 = arith.constant 0 : index
    %c0_47 = arith.constant 0 : index
    %43 = vector.load %arg3[%c7, %c0_46, %c0_47] : memref<9x128x128xbf16, #tpu.memory_space<vmem>>, vector<1x128x128xbf16>
    %44 = vector.shape_cast %43 : vector<1x128x128xbf16> to vector<128x128xbf16>
    %cst_48 = arith.constant dense<0.000000e+00> : vector<16x128xf32>
    %45 = tpu.matmul %42, %44, %cst_48 {dimension_numbers = #tpu.dot_dimension_numbers<[1], [0], [0], [1], [0, 0, 1, 1], [], []>} : vector<16x128xbf16>, vector<128x128xbf16>, vector<16x128xf32> -> vector<16x128xf32>
    %46 = arith.addf %40, %45 : vector<16x128xf32>
    %c0_49 = arith.constant 0 : index
    %c0_50 = arith.constant 0 : index
    %c44 = arith.constant 44 : index
    %c0_51 = arith.constant 0 : index
    %47 = vector.load %arg2[%c0_49, %c0_50, %c44, %c0_51] : memref<1x1x120x128xbf16, #tpu.memory_space<vmem>>, vector<1x1x16x128xbf16>
    %48 = vector.shape_cast %47 : vector<1x1x16x128xbf16> to vector<16x128xbf16>
    %c8 = arith.constant 8 : index
    %c0_52 = arith.constant 0 : index
    %c0_53 = arith.constant 0 : index
    %49 = vector.load %arg3[%c8, %c0_52, %c0_53] : memref<9x128x128xbf16, #tpu.memory_space<vmem>>, vector<1x128x128xbf16>
    %50 = vector.shape_cast %49 : vector<1x128x128xbf16> to vector<128x128xbf16>
    %cst_54 = arith.constant dense<0.000000e+00> : vector<16x128xf32>
    %51 = tpu.matmul %48, %50, %cst_54 {dimension_numbers = #tpu.dot_dimension_numbers<[1], [0], [0], [1], [0, 0, 1, 1], [], []>} : vector<16x128xbf16>, vector<128x128xbf16>, vector<16x128xf32> -> vector<16x128xf32>
    %52 = arith.addf %46, %51 : vector<16x128xf32>
    %c0_55 = arith.constant 0 : index
    %c0_56 = arith.constant 0 : index
    %53 = vector.load %arg4[%c0_55, %c0_56] : memref<1x128xf32, #tpu.memory_space<vmem>>, vector<1x128xf32>
    %54 = vector.broadcast %53 : vector<1x128xf32> to vector<16x128xf32>
    %55 = arith.addf %52, %54 : vector<16x128xf32>
    %cst_57 = arith.constant 0.000000e+00 : f32
    %56 = vector.broadcast %cst_57 : f32 to vector<16x128xf32>
    %57 = arith.cmpf oge, %55, %56 : vector<16x128xf32>
    %cst_58 = arith.constant 0.00999999977 : f32
    %58 = vector.broadcast %cst_58 : f32 to vector<16x128xf32>
    %59 = arith.mulf %58, %55 : vector<16x128xf32>
    %60 = arith.select %57, %55, %59 : vector<16x128xi1>, vector<16x128xf32>
    %61 = arith.truncf %60 : vector<16x128xf32> to vector<16x128xbf16>
    %c0_59 = arith.constant 0 : index
    %c0_60 = arith.constant 0 : index
    %c0_61 = arith.constant 0 : index
    %62 = vector.load %arg5[%c0_59, %c0_60, %c0_61] : memref<1x16x128xbf16, #tpu.memory_space<vmem>>, vector<1x16x128xbf16>
    %63 = vector.shape_cast %62 : vector<1x16x128xbf16> to vector<16x128xbf16>
    %64 = vector.shape_cast %61 : vector<16x128xbf16> to vector<1x16x128xbf16>
    tpu.vector_store %arg5[%c0_59, %c0_60, %c0_61], %64 {strides = array<i32>} : memref<1x16x128xbf16, #tpu.memory_space<vmem>>, vector<1x16x128xbf16>,
    return
  }
  func.func @transform_0(%arg0: i32, %arg1: i32) -> (i32, i32, i32, i32) {
    %c0_i32 = arith.constant 0 : i32
    %c0_i32_0 = arith.constant 0 : i32
    %c0_i32_1 = arith.constant 0 : i32
    return %arg0, %arg1, %c0_i32, %c0_i32_0 : i32, i32, i32, i32
  }
  func.func @transform_1(%arg0: i32, %arg1: i32) -> (i32, i32, i32) {
    %c0_i32 = arith.constant 0 : i32
    %c0_i32_0 = arith.constant 0 : i32
    %c0_i32_1 = arith.constant 0 : i32
    %c0_i32_2 = arith.constant 0 : i32
    return %c0_i32, %c0_i32_0, %c0_i32_1 : i32, i32, i32
  }
  func.func @transform_2(%arg0: i32, %arg1: i32) -> (i32, i32) {
    %c0_i32 = arith.constant 0 : i32
    %c0_i32_0 = arith.constant 0 : i32
    %c0_i32_1 = arith.constant 0 : i32
    return %c0_i32, %c0_i32_0 : i32, i32
  }
  func.func @transform_3(%arg0: i32, %arg1: i32) -> (i32, i32, i32) {
    %c0_i32 = arith.constant 0 : i32
    %c0_i32_0 = arith.constant 0 : i32
    return %arg0, %arg1, %c0_i32 : i32, i32, i32
  }
}

module attributes {stable_mosaic.version = 11 : i64} {
  func.func @_conv3x3_s2_lrelu_kernel(%arg0: i32, %arg1: i32, %arg2: memref<1x1x36x128xbf16, #tpu.memory_space<vmem>>, %arg3: memref<9x128x128xbf16, #tpu.memory_space<vmem>>, %arg4: memref<1x128xf32, #tpu.memory_space<vmem>>, %arg5: memref<1x4x128xbf16, #tpu.memory_space<vmem>>) attributes {dimension_semantics = [#tpu.dimension_semantics<parallel>, #tpu.dimension_semantics<parallel>], iteration_bounds = array<i64: 2, 1>, scalar_prefetch = 0 : i64, scratch_operands = 0 : i64, tpu.core_type = #tpu.core_type<tc>, window_params = [{transform_indices = @transform_0, window_bounds = array<i64: 1, 1, 36, 128>}, {pipeline_mode = #tpu.pipeline_mode<synchronous>, transform_indices = @transform_1, window_bounds = array<i64: 9, 128, 128>}, {pipeline_mode = #tpu.pipeline_mode<synchronous>, transform_indices = @transform_2, window_bounds = array<i64: 1, 128>}, {transform_indices = @transform_3, window_bounds = array<i64: 1, 4, 128>}]} {
    %c0 = arith.constant 0 : index
    %c0_0 = arith.constant 0 : index
    %c0_1 = arith.constant 0 : index
    %c0_2 = arith.constant 0 : index
    %0 = vector.load %arg2[%c0, %c0_0, %c0_1, %c0_2] : memref<1x1x36x128xbf16, #tpu.memory_space<vmem>>, vector<1x1x4x128xbf16>
    %1 = vector.shape_cast %0 : vector<1x1x4x128xbf16> to vector<4x128xbf16>
    %c0_3 = arith.constant 0 : index
    %c0_4 = arith.constant 0 : index
    %c0_5 = arith.constant 0 : index
    %2 = vector.load %arg3[%c0_3, %c0_4, %c0_5] : memref<9x128x128xbf16, #tpu.memory_space<vmem>>, vector<1x128x128xbf16>
    %3 = vector.shape_cast %2 : vector<1x128x128xbf16> to vector<128x128xbf16>
    %cst = arith.constant dense<0.000000e+00> : vector<4x128xf32>
    %4 = tpu.matmul %1, %3, %cst {dimension_numbers = #tpu.dot_dimension_numbers<[1], [0], [0], [1], [0, 0, 1, 1], [], []>} : vector<4x128xbf16>, vector<128x128xbf16>, vector<4x128xf32> -> vector<4x128xf32>
    %c0_6 = arith.constant 0 : index
    %c0_7 = arith.constant 0 : index
    %c6 = arith.constant 6 : index
    %c0_8 = arith.constant 0 : index
    %5 = vector.load %arg2[%c0_6, %c0_7, %c6, %c0_8] : memref<1x1x36x128xbf16, #tpu.memory_space<vmem>>, vector<1x1x4x128xbf16>
    %6 = vector.shape_cast %5 : vector<1x1x4x128xbf16> to vector<4x128xbf16>
    %c1 = arith.constant 1 : index
    %c0_9 = arith.constant 0 : index
    %c0_10 = arith.constant 0 : index
    %7 = vector.load %arg3[%c1, %c0_9, %c0_10] : memref<9x128x128xbf16, #tpu.memory_space<vmem>>, vector<1x128x128xbf16>
    %8 = vector.shape_cast %7 : vector<1x128x128xbf16> to vector<128x128xbf16>
    %cst_11 = arith.constant dense<0.000000e+00> : vector<4x128xf32>
    %9 = tpu.matmul %6, %8, %cst_11 {dimension_numbers = #tpu.dot_dimension_numbers<[1], [0], [0], [1], [0, 0, 1, 1], [], []>} : vector<4x128xbf16>, vector<128x128xbf16>, vector<4x128xf32> -> vector<4x128xf32>
    %10 = arith.addf %4, %9 : vector<4x128xf32>
    %c0_12 = arith.constant 0 : index
    %c0_13 = arith.constant 0 : index
    %c12 = arith.constant 12 : index
    %c0_14 = arith.constant 0 : index
    %11 = vector.load %arg2[%c0_12, %c0_13, %c12, %c0_14] : memref<1x1x36x128xbf16, #tpu.memory_space<vmem>>, vector<1x1x4x128xbf16>
    %12 = vector.shape_cast %11 : vector<1x1x4x128xbf16> to vector<4x128xbf16>
    %c2 = arith.constant 2 : index
    %c0_15 = arith.constant 0 : index
    %c0_16 = arith.constant 0 : index
    %13 = vector.load %arg3[%c2, %c0_15, %c0_16] : memref<9x128x128xbf16, #tpu.memory_space<vmem>>, vector<1x128x128xbf16>
    %14 = vector.shape_cast %13 : vector<1x128x128xbf16> to vector<128x128xbf16>
    %cst_17 = arith.constant dense<0.000000e+00> : vector<4x128xf32>
    %15 = tpu.matmul %12, %14, %cst_17 {dimension_numbers = #tpu.dot_dimension_numbers<[1], [0], [0], [1], [0, 0, 1, 1], [], []>} : vector<4x128xbf16>, vector<128x128xbf16>, vector<4x128xf32> -> vector<4x128xf32>
    %16 = arith.addf %10, %15 : vector<4x128xf32>
    %c0_18 = arith.constant 0 : index
    %c0_19 = arith.constant 0 : index
    %c18 = arith.constant 18 : index
    %c0_20 = arith.constant 0 : index
    %17 = vector.load %arg2[%c0_18, %c0_19, %c18, %c0_20] : memref<1x1x36x128xbf16, #tpu.memory_space<vmem>>, vector<1x1x4x128xbf16>
    %18 = vector.shape_cast %17 : vector<1x1x4x128xbf16> to vector<4x128xbf16>
    %c3 = arith.constant 3 : index
    %c0_21 = arith.constant 0 : index
    %c0_22 = arith.constant 0 : index
    %19 = vector.load %arg3[%c3, %c0_21, %c0_22] : memref<9x128x128xbf16, #tpu.memory_space<vmem>>, vector<1x128x128xbf16>
    %20 = vector.shape_cast %19 : vector<1x128x128xbf16> to vector<128x128xbf16>
    %cst_23 = arith.constant dense<0.000000e+00> : vector<4x128xf32>
    %21 = tpu.matmul %18, %20, %cst_23 {dimension_numbers = #tpu.dot_dimension_numbers<[1], [0], [0], [1], [0, 0, 1, 1], [], []>} : vector<4x128xbf16>, vector<128x128xbf16>, vector<4x128xf32> -> vector<4x128xf32>
    %22 = arith.addf %16, %21 : vector<4x128xf32>
    %c0_24 = arith.constant 0 : index
    %c0_25 = arith.constant 0 : index
    %c24 = arith.constant 24 : index
    %c0_26 = arith.constant 0 : index
    %23 = vector.load %arg2[%c0_24, %c0_25, %c24, %c0_26] : memref<1x1x36x128xbf16, #tpu.memory_space<vmem>>, vector<1x1x4x128xbf16>
    %24 = vector.shape_cast %23 : vector<1x1x4x128xbf16> to vector<4x128xbf16>
    %c4 = arith.constant 4 : index
    %c0_27 = arith.constant 0 : index
    %c0_28 = arith.constant 0 : index
    %25 = vector.load %arg3[%c4, %c0_27, %c0_28] : memref<9x128x128xbf16, #tpu.memory_space<vmem>>, vector<1x128x128xbf16>
    %26 = vector.shape_cast %25 : vector<1x128x128xbf16> to vector<128x128xbf16>
    %cst_29 = arith.constant dense<0.000000e+00> : vector<4x128xf32>
    %27 = tpu.matmul %24, %26, %cst_29 {dimension_numbers = #tpu.dot_dimension_numbers<[1], [0], [0], [1], [0, 0, 1, 1], [], []>} : vector<4x128xbf16>, vector<128x128xbf16>, vector<4x128xf32> -> vector<4x128xf32>
    %28 = arith.addf %22, %27 : vector<4x128xf32>
    %c0_30 = arith.constant 0 : index
    %c0_31 = arith.constant 0 : index
    %c30 = arith.constant 30 : index
    %c0_32 = arith.constant 0 : index
    %29 = vector.load %arg2[%c0_30, %c0_31, %c30, %c0_32] : memref<1x1x36x128xbf16, #tpu.memory_space<vmem>>, vector<1x1x4x128xbf16>
    %30 = vector.shape_cast %29 : vector<1x1x4x128xbf16> to vector<4x128xbf16>
    %c5 = arith.constant 5 : index
    %c0_33 = arith.constant 0 : index
    %c0_34 = arith.constant 0 : index
    %31 = vector.load %arg3[%c5, %c0_33, %c0_34] : memref<9x128x128xbf16, #tpu.memory_space<vmem>>, vector<1x128x128xbf16>
    %32 = vector.shape_cast %31 : vector<1x128x128xbf16> to vector<128x128xbf16>
    %cst_35 = arith.constant dense<0.000000e+00> : vector<4x128xf32>
    %33 = tpu.matmul %30, %32, %cst_35 {dimension_numbers = #tpu.dot_dimension_numbers<[1], [0], [0], [1], [0, 0, 1, 1], [], []>} : vector<4x128xbf16>, vector<128x128xbf16>, vector<4x128xf32> -> vector<4x128xf32>
    %34 = arith.addf %28, %33 : vector<4x128xf32>
    %c0_36 = arith.constant 0 : index
    %c0_37 = arith.constant 0 : index
    %c2_38 = arith.constant 2 : index
    %c0_39 = arith.constant 0 : index
    %35 = vector.load %arg2[%c0_36, %c0_37, %c2_38, %c0_39] : memref<1x1x36x128xbf16, #tpu.memory_space<vmem>>, vector<1x1x4x128xbf16>
    %36 = vector.shape_cast %35 : vector<1x1x4x128xbf16> to vector<4x128xbf16>
    %c6_40 = arith.constant 6 : index
    %c0_41 = arith.constant 0 : index
    %c0_42 = arith.constant 0 : index
    %37 = vector.load %arg3[%c6_40, %c0_41, %c0_42] : memref<9x128x128xbf16, #tpu.memory_space<vmem>>, vector<1x128x128xbf16>
    %38 = vector.shape_cast %37 : vector<1x128x128xbf16> to vector<128x128xbf16>
    %cst_43 = arith.constant dense<0.000000e+00> : vector<4x128xf32>
    %39 = tpu.matmul %36, %38, %cst_43 {dimension_numbers = #tpu.dot_dimension_numbers<[1], [0], [0], [1], [0, 0, 1, 1], [], []>} : vector<4x128xbf16>, vector<128x128xbf16>, vector<4x128xf32> -> vector<4x128xf32>
    %40 = arith.addf %34, %39 : vector<4x128xf32>
    %c0_44 = arith.constant 0 : index
    %c0_45 = arith.constant 0 : index
    %c8 = arith.constant 8 : index
    %c0_46 = arith.constant 0 : index
    %41 = vector.load %arg2[%c0_44, %c0_45, %c8, %c0_46] : memref<1x1x36x128xbf16, #tpu.memory_space<vmem>>, vector<1x1x4x128xbf16>
    %42 = vector.shape_cast %41 : vector<1x1x4x128xbf16> to vector<4x128xbf16>
    %c7 = arith.constant 7 : index
    %c0_47 = arith.constant 0 : index
    %c0_48 = arith.constant 0 : index
    %43 = vector.load %arg3[%c7, %c0_47, %c0_48] : memref<9x128x128xbf16, #tpu.memory_space<vmem>>, vector<1x128x128xbf16>
    %44 = vector.shape_cast %43 : vector<1x128x128xbf16> to vector<128x128xbf16>
    %cst_49 = arith.constant dense<0.000000e+00> : vector<4x128xf32>
    %45 = tpu.matmul %42, %44, %cst_49 {dimension_numbers = #tpu.dot_dimension_numbers<[1], [0], [0], [1], [0, 0, 1, 1], [], []>} : vector<4x128xbf16>, vector<128x128xbf16>, vector<4x128xf32> -> vector<4x128xf32>
    %46 = arith.addf %40, %45 : vector<4x128xf32>
    %c0_50 = arith.constant 0 : index
    %c0_51 = arith.constant 0 : index
    %c14 = arith.constant 14 : index
    %c0_52 = arith.constant 0 : index
    %47 = vector.load %arg2[%c0_50, %c0_51, %c14, %c0_52] : memref<1x1x36x128xbf16, #tpu.memory_space<vmem>>, vector<1x1x4x128xbf16>
    %48 = vector.shape_cast %47 : vector<1x1x4x128xbf16> to vector<4x128xbf16>
    %c8_53 = arith.constant 8 : index
    %c0_54 = arith.constant 0 : index
    %c0_55 = arith.constant 0 : index
    %49 = vector.load %arg3[%c8_53, %c0_54, %c0_55] : memref<9x128x128xbf16, #tpu.memory_space<vmem>>, vector<1x128x128xbf16>
    %50 = vector.shape_cast %49 : vector<1x128x128xbf16> to vector<128x128xbf16>
    %cst_56 = arith.constant dense<0.000000e+00> : vector<4x128xf32>
    %51 = tpu.matmul %48, %50, %cst_56 {dimension_numbers = #tpu.dot_dimension_numbers<[1], [0], [0], [1], [0, 0, 1, 1], [], []>} : vector<4x128xbf16>, vector<128x128xbf16>, vector<4x128xf32> -> vector<4x128xf32>
    %52 = arith.addf %46, %51 : vector<4x128xf32>
    %c0_57 = arith.constant 0 : index
    %c0_58 = arith.constant 0 : index
    %53 = vector.load %arg4[%c0_57, %c0_58] : memref<1x128xf32, #tpu.memory_space<vmem>>, vector<1x128xf32>
    %54 = vector.broadcast %53 : vector<1x128xf32> to vector<4x128xf32>
    %55 = arith.addf %52, %54 : vector<4x128xf32>
    %cst_59 = arith.constant 0.000000e+00 : f32
    %56 = vector.broadcast %cst_59 : f32 to vector<4x128xf32>
    %57 = arith.cmpf oge, %55, %56 : vector<4x128xf32>
    %cst_60 = arith.constant 0.00999999977 : f32
    %58 = vector.broadcast %cst_60 : f32 to vector<4x128xf32>
    %59 = arith.mulf %58, %55 : vector<4x128xf32>
    %60 = arith.select %57, %55, %59 : vector<4x128xi1>, vector<4x128xf32>
    %61 = arith.truncf %60 : vector<4x128xf32> to vector<4x128xbf16>
    %c0_61 = arith.constant 0 : index
    %c0_62 = arith.constant 0 : index
    %c0_63 = arith.constant 0 : index
    %62 = vector.load %arg5[%c0_61, %c0_62, %c0_63] : memref<1x4x128xbf16, #tpu.memory_space<vmem>>, vector<1x4x128xbf16>
    %63 = vector.shape_cast %62 : vector<1x4x128xbf16> to vector<4x128xbf16>
    %64 = vector.shape_cast %61 : vector<4x128xbf16> to vector<1x4x128xbf16>
    tpu.vector_store %arg5[%c0_61, %c0_62, %c0_63], %64 {strides = array<i32>} : memref<1x4x128xbf16, #tpu.memory_space<vmem>>, vector<1x4x128xbf16>,
    return
  }
  func.func @transform_0(%arg0: i32, %arg1: i32) -> (i32, i32, i32, i32) {
    %c0_i32 = arith.constant 0 : i32
    %c0_i32_0 = arith.constant 0 : i32
    %c0_i32_1 = arith.constant 0 : i32
    return %arg0, %arg1, %c0_i32, %c0_i32_0 : i32, i32, i32, i32
  }
  func.func @transform_1(%arg0: i32, %arg1: i32) -> (i32, i32, i32) {
    %c0_i32 = arith.constant 0 : i32
    %c0_i32_0 = arith.constant 0 : i32
    %c0_i32_1 = arith.constant 0 : i32
    %c0_i32_2 = arith.constant 0 : i32
    return %c0_i32, %c0_i32_0, %c0_i32_1 : i32, i32, i32
  }
  func.func @transform_2(%arg0: i32, %arg1: i32) -> (i32, i32) {
    %c0_i32 = arith.constant 0 : i32
    %c0_i32_0 = arith.constant 0 : i32
    %c0_i32_1 = arith.constant 0 : i32
    return %c0_i32, %c0_i32_0 : i32, i32
  }
  func.func @transform_3(%arg0: i32, %arg1: i32) -> (i32, i32, i32) {
    %c0_i32 = arith.constant 0 : i32
    %c0_i32_0 = arith.constant 0 : i32
    return %arg0, %arg1, %c0_i32 : i32, i32, i32
  }
}

module attributes {stable_mosaic.version = 11 : i64} {
  func.func @_conv3x3_s2_lrelu_linear_kernel(%arg0: i32, %arg1: i32, %arg2: memref<1x1x12x128xbf16, #tpu.memory_space<vmem>>, %arg3: memref<9x128x128xbf16, #tpu.memory_space<vmem>>, %arg4: memref<1x128xf32, #tpu.memory_space<vmem>>, %arg5: memref<128x128xbf16, #tpu.memory_space<vmem>>, %arg6: memref<1x128xf32, #tpu.memory_space<vmem>>, %arg7: memref<1x1x128xf32, #tpu.memory_space<vmem>>) attributes {dimension_semantics = [#tpu.dimension_semantics<parallel>, #tpu.dimension_semantics<parallel>], iteration_bounds = array<i64: 2, 1>, scalar_prefetch = 0 : i64, scratch_operands = 0 : i64, tpu.core_type = #tpu.core_type<tc>, window_params = [{transform_indices = @transform_0, window_bounds = array<i64: 1, 1, 12, 128>}, {pipeline_mode = #tpu.pipeline_mode<synchronous>, transform_indices = @transform_1, window_bounds = array<i64: 9, 128, 128>}, {pipeline_mode = #tpu.pipeline_mode<synchronous>, transform_indices = @transform_2, window_bounds = array<i64: 1, 128>}, {pipeline_mode = #tpu.pipeline_mode<synchronous>, transform_indices = @transform_3, window_bounds = array<i64: 128, 128>}, {pipeline_mode = #tpu.pipeline_mode<synchronous>, transform_indices = @transform_4, window_bounds = array<i64: 1, 128>}, {transform_indices = @transform_5, window_bounds = array<i64: 1, 1, 128>}]} {
    %c0 = arith.constant 0 : index
    %c0_0 = arith.constant 0 : index
    %c0_1 = arith.constant 0 : index
    %c0_2 = arith.constant 0 : index
    %0 = vector.load %arg2[%c0, %c0_0, %c0_1, %c0_2] : memref<1x1x12x128xbf16, #tpu.memory_space<vmem>>, vector<1x1x1x128xbf16>
    %1 = vector.shape_cast %0 : vector<1x1x1x128xbf16> to vector<1x128xbf16>
    %c0_3 = arith.constant 0 : index
    %c0_4 = arith.constant 0 : index
    %c0_5 = arith.constant 0 : index
    %2 = vector.load %arg3[%c0_3, %c0_4, %c0_5] : memref<9x128x128xbf16, #tpu.memory_space<vmem>>, vector<1x128x128xbf16>
    %3 = vector.shape_cast %2 : vector<1x128x128xbf16> to vector<128x128xbf16>
    %cst = arith.constant dense<0.000000e+00> : vector<1x128xf32>
    %4 = tpu.matmul %1, %3, %cst {dimension_numbers = #tpu.dot_dimension_numbers<[1], [0], [0], [1], [0, 0, 1, 1], [], []>} : vector<1x128xbf16>, vector<128x128xbf16>, vector<1x128xf32> -> vector<1x128xf32>
    %c0_6 = arith.constant 0 : index
    %c0_7 = arith.constant 0 : index
    %c2 = arith.constant 2 : index
    %c0_8 = arith.constant 0 : index
    %5 = vector.load %arg2[%c0_6, %c0_7, %c2, %c0_8] : memref<1x1x12x128xbf16, #tpu.memory_space<vmem>>, vector<1x1x1x128xbf16>
    %6 = vector.shape_cast %5 : vector<1x1x1x128xbf16> to vector<1x128xbf16>
    %c1 = arith.constant 1 : index
    %c0_9 = arith.constant 0 : index
    %c0_10 = arith.constant 0 : index
    %7 = vector.load %arg3[%c1, %c0_9, %c0_10] : memref<9x128x128xbf16, #tpu.memory_space<vmem>>, vector<1x128x128xbf16>
    %8 = vector.shape_cast %7 : vector<1x128x128xbf16> to vector<128x128xbf16>
    %cst_11 = arith.constant dense<0.000000e+00> : vector<1x128xf32>
    %9 = tpu.matmul %6, %8, %cst_11 {dimension_numbers = #tpu.dot_dimension_numbers<[1], [0], [0], [1], [0, 0, 1, 1], [], []>} : vector<1x128xbf16>, vector<128x128xbf16>, vector<1x128xf32> -> vector<1x128xf32>
    %10 = arith.addf %4, %9 : vector<1x128xf32>
    %c0_12 = arith.constant 0 : index
    %c0_13 = arith.constant 0 : index
    %c4 = arith.constant 4 : index
    %c0_14 = arith.constant 0 : index
    %11 = vector.load %arg2[%c0_12, %c0_13, %c4, %c0_14] : memref<1x1x12x128xbf16, #tpu.memory_space<vmem>>, vector<1x1x1x128xbf16>
    %12 = vector.shape_cast %11 : vector<1x1x1x128xbf16> to vector<1x128xbf16>
    %c2_15 = arith.constant 2 : index
    %c0_16 = arith.constant 0 : index
    %c0_17 = arith.constant 0 : index
    %13 = vector.load %arg3[%c2_15, %c0_16, %c0_17] : memref<9x128x128xbf16, #tpu.memory_space<vmem>>, vector<1x128x128xbf16>
    %14 = vector.shape_cast %13 : vector<1x128x128xbf16> to vector<128x128xbf16>
    %cst_18 = arith.constant dense<0.000000e+00> : vector<1x128xf32>
    %15 = tpu.matmul %12, %14, %cst_18 {dimension_numbers = #tpu.dot_dimension_numbers<[1], [0], [0], [1], [0, 0, 1, 1], [], []>} : vector<1x128xbf16>, vector<128x128xbf16>, vector<1x128xf32> -> vector<1x128xf32>
    %16 = arith.addf %10, %15 : vector<1x128xf32>
    %c0_19 = arith.constant 0 : index
    %c0_20 = arith.constant 0 : index
    %c6 = arith.constant 6 : index
    %c0_21 = arith.constant 0 : index
    %17 = vector.load %arg2[%c0_19, %c0_20, %c6, %c0_21] : memref<1x1x12x128xbf16, #tpu.memory_space<vmem>>, vector<1x1x1x128xbf16>
    %18 = vector.shape_cast %17 : vector<1x1x1x128xbf16> to vector<1x128xbf16>
    %c3 = arith.constant 3 : index
    %c0_22 = arith.constant 0 : index
    %c0_23 = arith.constant 0 : index
    %19 = vector.load %arg3[%c3, %c0_22, %c0_23] : memref<9x128x128xbf16, #tpu.memory_space<vmem>>, vector<1x128x128xbf16>
    %20 = vector.shape_cast %19 : vector<1x128x128xbf16> to vector<128x128xbf16>
    %cst_24 = arith.constant dense<0.000000e+00> : vector<1x128xf32>
    %21 = tpu.matmul %18, %20, %cst_24 {dimension_numbers = #tpu.dot_dimension_numbers<[1], [0], [0], [1], [0, 0, 1, 1], [], []>} : vector<1x128xbf16>, vector<128x128xbf16>, vector<1x128xf32> -> vector<1x128xf32>
    %22 = arith.addf %16, %21 : vector<1x128xf32>
    %c0_25 = arith.constant 0 : index
    %c0_26 = arith.constant 0 : index
    %c8 = arith.constant 8 : index
    %c0_27 = arith.constant 0 : index
    %23 = vector.load %arg2[%c0_25, %c0_26, %c8, %c0_27] : memref<1x1x12x128xbf16, #tpu.memory_space<vmem>>, vector<1x1x1x128xbf16>
    %24 = vector.shape_cast %23 : vector<1x1x1x128xbf16> to vector<1x128xbf16>
    %c4_28 = arith.constant 4 : index
    %c0_29 = arith.constant 0 : index
    %c0_30 = arith.constant 0 : index
    %25 = vector.load %arg3[%c4_28, %c0_29, %c0_30] : memref<9x128x128xbf16, #tpu.memory_space<vmem>>, vector<1x128x128xbf16>
    %26 = vector.shape_cast %25 : vector<1x128x128xbf16> to vector<128x128xbf16>
    %cst_31 = arith.constant dense<0.000000e+00> : vector<1x128xf32>
    %27 = tpu.matmul %24, %26, %cst_31 {dimension_numbers = #tpu.dot_dimension_numbers<[1], [0], [0], [1], [0, 0, 1, 1], [], []>} : vector<1x128xbf16>, vector<128x128xbf16>, vector<1x128xf32> -> vector<1x128xf32>
    %28 = arith.addf %22, %27 : vector<1x128xf32>
    %c0_32 = arith.constant 0 : index
    %c0_33 = arith.constant 0 : index
    %c10 = arith.constant 10 : index
    %c0_34 = arith.constant 0 : index
    %29 = vector.load %arg2[%c0_32, %c0_33, %c10, %c0_34] : memref<1x1x12x128xbf16, #tpu.memory_space<vmem>>, vector<1x1x1x128xbf16>
    %30 = vector.shape_cast %29 : vector<1x1x1x128xbf16> to vector<1x128xbf16>
    %c5 = arith.constant 5 : index
    %c0_35 = arith.constant 0 : index
    %c0_36 = arith.constant 0 : index
    %31 = vector.load %arg3[%c5, %c0_35, %c0_36] : memref<9x128x128xbf16, #tpu.memory_space<vmem>>, vector<1x128x128xbf16>
    %32 = vector.shape_cast %31 : vector<1x128x128xbf16> to vector<128x128xbf16>
    %cst_37 = arith.constant dense<0.000000e+00> : vector<1x128xf32>
    %33 = tpu.matmul %30, %32, %cst_37 {dimension_numbers = #tpu.dot_dimension_numbers<[1], [0], [0], [1], [0, 0, 1, 1], [], []>} : vector<1x128xbf16>, vector<128x128xbf16>, vector<1x128xf32> -> vector<1x128xf32>
    %34 = arith.addf %28, %33 : vector<1x128xf32>
    %c0_38 = arith.constant 0 : index
    %c0_39 = arith.constant 0 : index
    %c1_40 = arith.constant 1 : index
    %c0_41 = arith.constant 0 : index
    %35 = vector.load %arg2[%c0_38, %c0_39, %c1_40, %c0_41] : memref<1x1x12x128xbf16, #tpu.memory_space<vmem>>, vector<1x1x1x128xbf16>
    %36 = vector.shape_cast %35 : vector<1x1x1x128xbf16> to vector<1x128xbf16>
    %c6_42 = arith.constant 6 : index
    %c0_43 = arith.constant 0 : index
    %c0_44 = arith.constant 0 : index
    %37 = vector.load %arg3[%c6_42, %c0_43, %c0_44] : memref<9x128x128xbf16, #tpu.memory_space<vmem>>, vector<1x128x128xbf16>
    %38 = vector.shape_cast %37 : vector<1x128x128xbf16> to vector<128x128xbf16>
    %cst_45 = arith.constant dense<0.000000e+00> : vector<1x128xf32>
    %39 = tpu.matmul %36, %38, %cst_45 {dimension_numbers = #tpu.dot_dimension_numbers<[1], [0], [0], [1], [0, 0, 1, 1], [], []>} : vector<1x128xbf16>, vector<128x128xbf16>, vector<1x128xf32> -> vector<1x128xf32>
    %40 = arith.addf %34, %39 : vector<1x128xf32>
    %c0_46 = arith.constant 0 : index
    %c0_47 = arith.constant 0 : index
    %c3_48 = arith.constant 3 : index
    %c0_49 = arith.constant 0 : index
    %41 = vector.load %arg2[%c0_46, %c0_47, %c3_48, %c0_49] : memref<1x1x12x128xbf16, #tpu.memory_space<vmem>>, vector<1x1x1x128xbf16>
    %42 = vector.shape_cast %41 : vector<1x1x1x128xbf16> to vector<1x128xbf16>
    %c7 = arith.constant 7 : index
    %c0_50 = arith.constant 0 : index
    %c0_51 = arith.constant 0 : index
    %43 = vector.load %arg3[%c7, %c0_50, %c0_51] : memref<9x128x128xbf16, #tpu.memory_space<vmem>>, vector<1x128x128xbf16>
    %44 = vector.shape_cast %43 : vector<1x128x128xbf16> to vector<128x128xbf16>
    %cst_52 = arith.constant dense<0.000000e+00> : vector<1x128xf32>
    %45 = tpu.matmul %42, %44, %cst_52 {dimension_numbers = #tpu.dot_dimension_numbers<[1], [0], [0], [1], [0, 0, 1, 1], [], []>} : vector<1x128xbf16>, vector<128x128xbf16>, vector<1x128xf32> -> vector<1x128xf32>
    %46 = arith.addf %40, %45 : vector<1x128xf32>
    %c0_53 = arith.constant 0 : index
    %c0_54 = arith.constant 0 : index
    %c5_55 = arith.constant 5 : index
    %c0_56 = arith.constant 0 : index
    %47 = vector.load %arg2[%c0_53, %c0_54, %c5_55, %c0_56] : memref<1x1x12x128xbf16, #tpu.memory_space<vmem>>, vector<1x1x1x128xbf16>
    %48 = vector.shape_cast %47 : vector<1x1x1x128xbf16> to vector<1x128xbf16>
    %c8_57 = arith.constant 8 : index
    %c0_58 = arith.constant 0 : index
    %c0_59 = arith.constant 0 : index
    %49 = vector.load %arg3[%c8_57, %c0_58, %c0_59] : memref<9x128x128xbf16, #tpu.memory_space<vmem>>, vector<1x128x128xbf16>
    %50 = vector.shape_cast %49 : vector<1x128x128xbf16> to vector<128x128xbf16>
    %cst_60 = arith.constant dense<0.000000e+00> : vector<1x128xf32>
    %51 = tpu.matmul %48, %50, %cst_60 {dimension_numbers = #tpu.dot_dimension_numbers<[1], [0], [0], [1], [0, 0, 1, 1], [], []>} : vector<1x128xbf16>, vector<128x128xbf16>, vector<1x128xf32> -> vector<1x128xf32>
    %52 = arith.addf %46, %51 : vector<1x128xf32>
    %c0_61 = arith.constant 0 : index
    %c0_62 = arith.constant 0 : index
    %53 = vector.load %arg4[%c0_61, %c0_62] : memref<1x128xf32, #tpu.memory_space<vmem>>, vector<1x128xf32>
    %54 = arith.addf %52, %53 : vector<1x128xf32>
    %cst_63 = arith.constant 0.000000e+00 : f32
    %55 = vector.broadcast %cst_63 : f32 to vector<1x128xf32>
    %56 = arith.cmpf oge, %54, %55 : vector<1x128xf32>
    %cst_64 = arith.constant 0.00999999977 : f32
    %57 = vector.broadcast %cst_64 : f32 to vector<1x128xf32>
    %58 = arith.mulf %57, %54 : vector<1x128xf32>
    %59 = arith.select %56, %54, %58 : vector<1x128xi1>, vector<1x128xf32>
    %60 = arith.truncf %59 : vector<1x128xf32> to vector<1x128xbf16>
    %c0_65 = arith.constant 0 : index
    %c0_66 = arith.constant 0 : index
    %61 = vector.load %arg5[%c0_65, %c0_66] : memref<128x128xbf16, #tpu.memory_space<vmem>>, vector<128x128xbf16>
    %cst_67 = arith.constant dense<0.000000e+00> : vector<1x128xf32>
    %62 = tpu.matmul %60, %61, %cst_67 {dimension_numbers = #tpu.dot_dimension_numbers<[1], [0], [0], [1], [0, 0, 1, 1], [], []>} : vector<1x128xbf16>, vector<128x128xbf16>, vector<1x128xf32> -> vector<1x128xf32>
    %c0_68 = arith.constant 0 : index
    %c0_69 = arith.constant 0 : index
    %63 = vector.load %arg6[%c0_68, %c0_69] : memref<1x128xf32, #tpu.memory_space<vmem>>, vector<1x128xf32>
    %64 = arith.addf %62, %63 : vector<1x128xf32>
    %c0_70 = arith.constant 0 : index
    %c0_71 = arith.constant 0 : index
    %c0_72 = arith.constant 0 : index
    %65 = vector.load %arg7[%c0_70, %c0_71, %c0_72] : memref<1x1x128xf32, #tpu.memory_space<vmem>>, vector<1x1x128xf32>
    %66 = vector.shape_cast %65 : vector<1x1x128xf32> to vector<1x128xf32>
    %67 = vector.shape_cast %64 : vector<1x128xf32> to vector<1x1x128xf32>
    tpu.vector_store %arg7[%c0_70, %c0_71, %c0_72], %67 {strides = array<i32>} : memref<1x1x128xf32, #tpu.memory_space<vmem>>, vector<1x1x128xf32>,
    return
  }
  func.func @transform_0(%arg0: i32, %arg1: i32) -> (i32, i32, i32, i32) {
    %c0_i32 = arith.constant 0 : i32
    %c0_i32_0 = arith.constant 0 : i32
    %c0_i32_1 = arith.constant 0 : i32
    return %arg0, %arg1, %c0_i32, %c0_i32_0 : i32, i32, i32, i32
  }
  func.func @transform_1(%arg0: i32, %arg1: i32) -> (i32, i32, i32) {
    %c0_i32 = arith.constant 0 : i32
    %c0_i32_0 = arith.constant 0 : i32
    %c0_i32_1 = arith.constant 0 : i32
    %c0_i32_2 = arith.constant 0 : i32
    return %c0_i32, %c0_i32_0, %c0_i32_1 : i32, i32, i32
  }
  func.func @transform_2(%arg0: i32, %arg1: i32) -> (i32, i32) {
    %c0_i32 = arith.constant 0 : i32
    %c0_i32_0 = arith.constant 0 : i32
    %c0_i32_1 = arith.constant 0 : i32
    return %c0_i32, %c0_i32_0 : i32, i32
  }
  func.func @transform_3(%arg0: i32, %arg1: i32) -> (i32, i32) {
    %c0_i32 = arith.constant 0 : i32
    %c0_i32_0 = arith.constant 0 : i32
    %c0_i32_1 = arith.constant 0 : i32
    return %c0_i32, %c0_i32_0 : i32, i32
  }
  func.func @transform_4(%arg0: i32, %arg1: i32) -> (i32, i32) {
    %c0_i32 = arith.constant 0 : i32
    %c0_i32_0 = arith.constant 0 : i32
    %c0_i32_1 = arith.constant 0 : i32
    return %c0_i32, %c0_i32_0 : i32, i32
  }
  func.func @transform_5(%arg0: i32, %arg1: i32) -> (i32, i32, i32) {
    %c0_i32 = arith.constant 0 : i32
    %c0_i32_0 = arith.constant 0 : i32
    return %arg0, %arg1, %c0_i32 : i32, i32, i32
  }
}

</mosaic_0001>

<bundles_post_ra>
// kernel: gradual_style_block_forward.4
= control target key start
LH: loop header
LB: loop body
LE: loop exit
PB: predicated region body
PF: predicated region fallthrough
CT: control target
= control target key end

     0   :  { %s2759_s12 = smov 0   ;;  %s2761_s13 = smov 0   ;;  %s3054_s0 = inlined_call_operand.vmem [shape: bf16[2,1,432,128], index: 0, kind: input, shape index: {}]   ;;  %s3055_s1 = inlined_call_operand.vmem [shape: bf16[9,128,128], index: 1, kind: input, shape index: {}]   ;;  %s3056_s2 = inlined_call_operand.vmem [shape: f32[1,128], index: 2, kind: input, shape index: {}]   ;;  %s3057_s3 = inlined_call_operand.vmem [shape: bf16[2,64,128], index: 3, kind: output, shape index: {}]  }
   0x1   :  { %s2763_s14 = smov 0  }
   0x2 LB: > { %s25_s15 = sadd.s32 1, %s2733_s13  ;;  %p1895_p0 = scmp.ge.s32.totalorder %s2737_s14, 1  ;;  %s2737_s14 = sphi %s2763_s14, %s13_s14   ;;  %s2733_s13 = sphi %s2761_s13, %s3059_s13   ;;  %s2729_s12 = sphi %s2759_s12, %s3058_s12  }
   0x3   : > { %p27_p1 = scmp.ge.s32.totalorder %s25_s15, 2  ;;  %p157_p2 = scmp.lt.s32.totalorder %s2737_s14, 3 }
   0x5   : > { %s3061_s15 = smov (%p27_p1, %s25_s15), 0  ;;  %p158_p3 = pnand %p1895_p0, %p157_p2 }
   0x6   : > { %v2607_v0 = vld [vmem:[%s3055_s1 + $0x40] sm:$0xff] (!%p158_p3)   ;;  %p189_p4 = scmp.lt.s32.totalorder (!%p158_p3), %s2729_s12, 1  ;;  %v2609_v2 = vld [vmem:[%s3055_s1 + $0x48] sm:$0xff] (!%p158_p3)   ;;  %v2611_v4 = vld [vmem:[%s3055_s1 + $0x50] sm:$0xff] (!%p158_p3)  }
   0x7   : > { %161 = sbr.rel (%p158_p3) target bundleno = 396 (0x18c), region = 32  ;;  %v2608_v1 = vld [vmem:[%s3055_s1 + $0x100] sm:$0xff] (!%p158_p3)   ;;  %2286 = vmatprep.subr.bf16.mxu1 (!%p158_p3), %v2607_v0  ;;  %v2610_v3 = vld [vmem:[%s3055_s1 + $0x108] sm:$0xff] (!%p158_p3)   ;;  %v2612_v5 = vld [vmem:[%s3055_s1 + $0x110] sm:$0xff] (!%p158_p3)  }
   0x8   : > { %2382 = vmatprep.subr.bf16.mxu0 (!%p158_p3), %v2608_v1  ;;  %2287 = vmatpush3.bf16.msra.mxu1 (!%p158_p3), %v2607_v0  ;;  %v2613_v6 = vld [vmem:[%s3055_s1 + $0x58] sm:$0xff] (!%p158_p3)   ;;  %v2615_v8 = vld [vmem:[%s3055_s1 + $0x60] sm:$0xff] (!%p158_p3)   ;;  %v2617_v10 = vld [vmem:[%s3055_s1 + $0x68] sm:$0xff] (!%p158_p3)  }
   0x9   : > { %2383 = vmatpush3.bf16.msra.mxu0 (!%p158_p3), %v2608_v1  ;;  %2288 = vmatprep.subr.bf16.mxu1 (!%p158_p3), %v2609_v2  ;;  %v2614_v7 = vld [vmem:[%s3055_s1 + $0x118] sm:$0xff] (!%p158_p3)   ;;  %v2616_v9 = vld [vmem:[%s3055_s1 + $0x120] sm:$0xff] (!%p158_p3)   ;;  %v2618_v12 = vld [vmem:[%s3055_s1 + $0x128] sm:$0xff] (!%p158_p3)  }
   0xa   : > { %2384 = vmatprep.subr.bf16.mxu0 (!%p158_p3), %v2610_v3  ;;  %v2619_v14 = vld [vmem:[%s3055_s1 + $0x70] sm:$0xff] (!%p158_p3)   ;;  %v2621_v16 = vld [vmem:[%s3055_s1 + $0x78] sm:$0xff] (!%p158_p3)   ;;  %v2624_v18 = vld [vmem:[%s3055_s1] sm:$0xff] (!%p158_p3)  }
   0xb   : > { %v2620_v15 = vld [vmem:[%s3055_s1 + $0x130] sm:$0xff] (!%p158_p3)   ;;  %v2622_v17 = vld [vmem:[%s3055_s1 + $0x138] sm:$0xff] (!%p158_p3)   ;;  %v2626_v19 = vld [vmem:[%s3055_s1 + $0x140] sm:$0xff] (!%p158_p3)  }
   0xc   : > { %2289 = vmatpush3.bf16.msra.mxu1 (!%p158_p3), %v2609_v2  ;;  %v2629_v22 = vld [vmem:[%s3055_s1 + $0x8] sm:$0xff] (!%p158_p3)   ;;  %v2631_v26 = vld [vmem:[%s3055_s1 + $0x10] sm:$0xff] (!%p158_p3)   ;;  %v2633_v28 = vld [vmem:[%s3055_s1 + $0x18] sm:$0xff] (!%p158_p3)  }
   0xd   : > { %2385 = vmatpush3.bf16.msra.mxu0 (!%p158_p3), %v2610_v3  ;;  %2290 = vmatprep.subr.bf16.mxu1 (!%p158_p3), %v2611_v4  ;;  %v2630_v23 = vld [vmem:[%s3055_s1 + $0x148] sm:$0xff] (!%p158_p3)   ;;  %v2632_v27 = vld [vmem:[%s3055_s1 + $0x150] sm:$0xff] (!%p158_p3)   ;;  %v2634_v31 = vld [vmem:[%s3055_s1 + $0x158] sm:$0xff] (!%p158_p3)  }
   0xe   : > { %s3063_s12 = smov (!%p189_p4, %s2729_s12), 1  ;;  %2386 = vmatprep.subr.bf16.mxu0 %v2612_v5  ;;  %v2635_v34 = vld [vmem:[%s3055_s1 + $0x20] sm:$0xff]   ;;  %v2637_v36 = vld [vmem:[%s3055_s1 + $0x28] sm:$0xff]   ;;  %v2640_v38 = vld [vmem:[%s3055_s1 + $0x30] sm:$0xff]  }
   0xf   : > { %s2582_s5 = smul.u32 216, %s3063_s12  ;;  %v2636_v35 = vld [vmem:[%s3055_s1 + $0x160] sm:$0xff]   ;;  %v2638_v37 = vld [vmem:[%s3055_s1 + $0x168] sm:$0xff]   ;;  %v2642_v39 = vld [vmem:[%s3055_s1 + $0x170] sm:$0xff]  }
  0x10   : > { %2291 = vmatpush3.bf16.msra.mxu1 %v2611_v4  ;;  %v2645_v40 = vld [vmem:[%s3055_s1 + $0x38] sm:$0xff]   ;;  %v2648_v42 = vld [vmem:[%s3055_s1 + $0x80] sm:$0xff]   ;;  %v2653_v46 = vld [vmem:[%s3055_s1 + $0x88] sm:$0xff]  }
  0x11   : > { %2387 = vmatpush3.bf16.msra.mxu0 %v2612_v5  ;;  %2292 = vmatprep.subr.bf16.mxu1 %v2613_v6  ;;  %s2813_s16 = scalar_lea.vmem %s3054_s0, %s2582_s5  ;;  %v2646_v41 = vld [vmem:[%s3055_s1 + $0x178] sm:$0xff]   ;;  %v2650_v43 = vld [vmem:[%s3055_s1 + $0x180] sm:$0xff]   ;;  %v2654_v47 = vld [vmem:[%s3055_s1 + $0x188] sm:$0xff]   ;;  %s2146_s5 = sshll.u32 %s3063_s12, 5 }
  0x12   : > { %2388 = vmatprep.subr.bf16.mxu0 %v2614_v7  ;;  %v2623_v11 = vld [vmem:[%s2813_s16 + $0x24] sm:$0xff]   ;;  %v2625_v13 = vld [vmem:[%s2813_s16 + $0x90] sm:$0xff]   ;;  %v2628_v21 = vld [vmem:[%s2813_s16 + $0x98] sm:$0xff]   ;;  %s206_s8 = scalar_lea.vmem %s3057_s3, %s2146_s5 }
  0x13   : > { %2302 = vmatprep.mubr.bf16.mxu1 %v2623_v11  ;;  %2398 = vmatprep.mubr.bf16.mxu0 %v2625_v13  ;;  %v2627_v20 = vld [vmem:[%s2813_s16 + $0x2c] sm:$0xff]   ;;  %v2639_v24 = vld [vmem:[%s2813_s16 + $0x34] sm:$0xff]   ;;  %v2641_v25 = vld [vmem:[%s2813_s16 + $0xa0] sm:$0xff]  }
  0x14   : > { %2293 = vmatpush3.bf16.msra.mxu1 %v2613_v6  ;;  %v2643_v29 = vld [vmem:[%s2813_s16 + $0x3c] sm:$0xff]   ;;  %v2644_v30 = vld [vmem:[%s2813_s16 + $0xa8] sm:$0xff]   ;;  %v2649_v33 = vld [vmem:[%s2813_s16 + $0xb4] sm:$0xff]  }
  0x15   : > { %2389 = vmatpush3.bf16.msra.mxu0 %v2614_v7  ;;  %2294 = vmatprep.subr.bf16.mxu1 %v2615_v8  ;;  %v2647_v32 = vld [vmem:[%s2813_s16] sm:$0xff]   ;;  %v2651_v44 = vld [vmem:[%s2813_s16 + $0x8] sm:$0xff]   ;;  %v2663_v48 = vld [vmem:[%s2813_s16 + $0x10] sm:$0xff]  }
  0x16   : > { %2390 = vmatprep.subr.bf16.mxu0 %v2616_v9  ;;  %v2652_v45 = vld [vmem:[%s2813_s16 + $0xbc] sm:$0xff]   ;;  %v2665_v49 = vld [vmem:[%s2813_s16 + $0xc4] sm:$0xff]   ;;  %v2655_v50 = vld [vmem:[%s3055_s1 + $0x90] sm:$0xff]  }
  0x17   : > { %v2656_v51 = vld [vmem:[%s3055_s1 + $0x190] sm:$0xff]   ;;  %v2657_v52 = vld [vmem:[%s3055_s1 + $0x98] sm:$0xff]   ;;  %v2671_v56 = vld [vmem:[%s2813_s16 + $0x48] sm:$0xff]  }
  0x18   : > { %2295 = vmatpush3.bf16.msra.mxu1 %v2615_v8  ;;  %v2667_v53 = vld [vmem:[%s2813_s16 + $0x18] sm:$0xff]   ;;  %v2668_v54 = vld [vmem:[%s2813_s16 + $0xcc] sm:$0xff]   ;;  %v2673_v57 = vld [vmem:[%s2813_s16 + $0x4] sm:$0xff]  }
  0x19   : > { %2391 = vmatpush3.bf16.msra.mxu0 %v2616_v9  ;;  %2296 = vmatprep.subr.bf16.mxu1 %v2617_v10  ;;  %v2658_v55 = vld [vmem:[%s3055_s1 + $0x198] sm:$0xff]   ;;  %v2659_v58 = vld [vmem:[%s3055_s1 + $0xa0] sm:$0xff]   ;;  %v2661_v60 = vld [vmem:[%s3055_s1 + $0xa8] sm:$0xff]  }
  0x1a   : > { %2392 = vmatprep.subr.bf16.mxu0 %v2618_v12  ;;  %v2660_v59 = vld [vmem:[%s3055_s1 + $0x1a0] sm:$0xff]   ;;  %v2662_v61 = vld [vmem:[%s3055_s1 + $0x1a8] sm:$0xff]   ;;  %v2664_v62 = vld [vmem:[%s3055_s1 + $0xb0] sm:$0xff]  }
  0x1b   : > { %v2666_v63 = vld [vmem:[%s3055_s1 + $0x1b0] sm:$0xff]   ;;  %v2669_v0 = vld [vmem:[%s3055_s1 + $0xb8] sm:$0xff]   ;;  %v2672_v2 = vld [vmem:[%s3055_s1 + $0xc0] sm:$0xff]  }
  0x1c   : > { %2297 = vmatpush3.bf16.msra.mxu1 %v2617_v10  ;;  %v2670_v1 = vld [vmem:[%s3055_s1 + $0x1b8] sm:$0xff]   ;;  %v2674_v3 = vld [vmem:[%s3055_s1 + $0x1c0] sm:$0xff]   ;;  %v2675_v4 = vld [vmem:[%s2813_s16 + $0x50] sm:$0xff]  }
  0x1d   : > { %2393 = vmatpush3.bf16.msra.mxu0 %v2618_v12  ;;  %2298 = vmatprep.subr.bf16.mxu1 %v2619_v14  ;;  %v2676_v5 = vld [vmem:[%s2813_s16 + $0xc] sm:$0xff]   ;;  %v2687_v8 = vld [vmem:[%s2813_s16 + $0x58] sm:$0xff]   ;;  %v2689_v13 = vld [vmem:[%s2813_s16 + $0x60] sm:$0xff]  }
  0x1e   : > { %2394 = vmatprep.subr.bf16.mxu0 %v2620_v15  ;;  %v2677_v6 = vld [vmem:[%s3055_s1 + $0xc8] sm:$0xff]   ;;  %v2688_v9 = vld [vmem:[%s2813_s16 + $0x14] sm:$0xff]  }
  0x1f   : > { %v2678_v7 = vld [vmem:[%s3055_s1 + $0x1c8] sm:$0xff]   ;;  %v2679_v10 = vld [vmem:[%s3055_s1 + $0xd0] sm:$0xff]   ;;  %v2681_v12 = vld [vmem:[%s3055_s1 + $0xd8] sm:$0xff]  }
  0x20   : > { %2299 = vmatpush3.bf16.msra.mxu1 %v2619_v14  ;;  %v2680_v11 = vld [vmem:[%s3055_s1 + $0x1d0] sm:$0xff]   ;;  %v2691_v14 = vld [vmem:[%s2813_s16 + $0x1c] sm:$0xff]  }
  0x21   : > { %2395 = vmatpush3.bf16.msra.mxu0 %v2620_v15  ;;  %2300 = vmatprep.subr.bf16.mxu1 %v2621_v16  ;;  %v2682_v15 = vld [vmem:[%s3055_s1 + $0x1d8] sm:$0xff]  }
  0x22   : > { %2396 = vmatprep.subr.bf16.mxu0 %v2622_v17 }
  0x24   : > { %2301 = vmatpush3.bf16.msra.mxu1 %v2621_v16  ;;  %v2695_v16 = vld [vmem:[%s2813_s16 + $0x6c] sm:$0xff]  }
  0x25   : > { %2397 = vmatpush3.bf16.msra.mxu0 %v2622_v17  ;;  %2310 = vmatprep.subr.bf16.mxu1 %v2624_v18  ;;  %v2696_v17 = vld [vmem:[%s2813_s16 + $0x28] sm:$0xff]  }
  0x26   : > { %2406 = vmatprep.subr.bf16.mxu0 %v2626_v19 }
  0x27   : > { %2303 = vmatmul.mubr.bf16.vlgmr.msra.gmra.mrb[0].mxu1 %v2627_v20  ;;  %v2685_v20 = vld [vmem:[%s3055_s1 + $0xe8] sm:$0xff]  }
  0x28   : > { %2311 = vmatpush3.bf16.msra.mxu1 %v2624_v18  ;;  %2399 = vmatmul.mubr.bf16.vlgmr.msra.gmra.mrb[0].mxu0 %v2628_v21  ;;  %v2683_v18 = vld [vmem:[%s3055_s1 + $0xe0] sm:$0xff]   ;;  %v2686_v21 = vld [vmem:[%s3055_s1 + $0x1e8] sm:$0xff]  }
  0x29   : > { %2407 = vmatpush3.bf16.msra.mxu0 %v2626_v19  ;;  %2312 = vmatprep.subr.bf16.mxu1 %v2629_v22  ;;  %v2684_v19 = vld [vmem:[%s3055_s1 + $0x1e0] sm:$0xff]  }
  0x2a   : > { %2408 = vmatprep.subr.bf16.mxu0 %v2630_v23  ;;  %2306 = vmatprep.mubr.bf16.mxu1 %v2639_v24  ;;  %v2693_v24 = vld [vmem:[%s3055_s1 + $0xf8] sm:$0xff]  }
  0x2b   : > { %2402 = vmatprep.mubr.bf16.mxu0 %v2641_v25  ;;  %v2694_v25 = vld [vmem:[%s3055_s1 + $0x1f8] sm:$0xff]  }
  0x2c   : > { %2313 = vmatpush3.bf16.msra.mxu1 %v2629_v22  ;;  %v2690_v22 = vld [vmem:[%s3055_s1 + $0xf0] sm:$0xff]  }
  0x2d   : > { %2409 = vmatpush3.bf16.msra.mxu0 %v2630_v23  ;;  %2314 = vmatprep.subr.bf16.mxu1 %v2631_v26  ;;  %v2692_v23 = vld [vmem:[%s3055_s1 + $0x1f0] sm:$0xff]  }
  0x2e   : > { %2410 = vmatprep.subr.bf16.mxu0 %v2632_v27 }
  0x2f   : > { %2307 = vmatmul.mubr.bf16.gmra.mrb[4].mxu1 %v2643_v29  ;;  %v2700_v29 = vld [vmem:[%s3055_s1 + $0x208] sm:$0xff]  }
  0x30   : > { %2315 = vmatpush3.bf16.msra.mxu1 %v2631_v26  ;;  %2403 = vmatmul.mubr.bf16.gmra.mrb[4].mxu0 %v2644_v30  ;;  %v2699_v26 = vld [vmem:[%s3055_s1 + $0x200] sm:$0xff]  }
  0x31   : > { %2411 = vmatpush3.bf16.msra.mxu0 %v2632_v27  ;;  %2316 = vmatprep.subr.bf16.mxu1 %v2633_v28  ;;  %v2697_v27 = vld [vmem:[%s2813_s16 + $0x74] sm:$0xff]   ;;  %v2701_v30 = vld [vmem:[%s2813_s16 + $0x7c] sm:$0xff]  }
  0x32   : > { %2412 = vmatprep.subr.bf16.mxu0 %v2634_v31  ;;  %2326 = vmatprep.mubr.bf16.mxu1 %v2647_v32  ;;  %v2705_v32 = vld [vmem:[%s3055_s1 + $0x210] sm:$0xff]  }
  0x33   : > { %2422 = vmatprep.mubr.bf16.mxu0 %v2649_v33  ;;  %v2703_v33 = vld [vmem:[%s2813_s16 + $0x84] sm:$0xff]  }
  0x34   : > { %2317 = vmatpush3.bf16.msra.mxu1 %v2633_v28  ;;  %v2698_v28 = vld [vmem:[%s2813_s16 + $0x30] sm:$0xff]  }
  0x35   : > { %2413 = vmatpush3.bf16.msra.mxu0 %v2634_v31  ;;  %2318 = vmatprep.subr.bf16.mxu1 %v2635_v34  ;;  %v2702_v31 = vld [vmem:[%s2813_s16 + $0x38] sm:$0xff]  }
  0x36   : > { %2414 = vmatprep.subr.bf16.mxu0 %v2636_v35 }
  0x38   : > { %2319 = vmatpush3.bf16.msra.mxu1 %v2635_v34  ;;  %v2704_v34 = vld [vmem:[%s2813_s16 + $0x40] sm:$0xff]  }
  0x39   : > { %2415 = vmatpush3.bf16.msra.mxu0 %v2636_v35  ;;  %2320 = vmatprep.subr.bf16.mxu1 %v2637_v36  ;;  %v2706_v35 = vld [vmem:[%s3055_s1 + $0x218] sm:$0xff]  }
  0x3a   : > { %2416 = vmatprep.subr.bf16.mxu0 %v2638_v37 }
  0x3c   : > { %2321 = vmatpush3.bf16.msra.mxu1 %v2637_v36  ;;  %v2711_v36 = vld [vmem:[%s2813_s16 + $0x4c] sm:$0xff]  }
  0x3d   : > { %2417 = vmatpush3.bf16.msra.mxu0 %v2638_v37  ;;  %2322 = vmatprep.subr.bf16.mxu1 %v2640_v38  ;;  %v2712_v37 = vld [vmem:[%s2813_s16 + $0x5c] sm:$0xff]  }
  0x3e   : > { %2418 = vmatprep.subr.bf16.mxu0 %v2642_v39 }
  0x40   : > { %2323 = vmatpush3.bf16.msra.mxu1 %v2640_v38  ;;  %v2707_v38 = vld [vmem:[%s3055_s1 + $0x220] sm:$0xff]  }
  0x41   : > { %2419 = vmatpush3.bf16.msra.mxu0 %v2642_v39  ;;  %2324 = vmatprep.subr.bf16.mxu1 %v2645_v40  ;;  %v2708_v39 = vld [vmem:[%s3055_s1 + $0x228] sm:$0xff]  }
  0x42   : > { %2420 = vmatprep.subr.bf16.mxu0 %v2646_v41 }
  0x44   : > { %2325 = vmatpush3.bf16.msra.mxu1 %v2645_v40  ;;  %v2709_v40 = vld [vmem:[%s3055_s1 + $0x230] sm:$0xff]  }
  0x45   : > { %2421 = vmatpush3.bf16.msra.mxu0 %v2646_v41  ;;  %2334 = vmatprep.subr.bf16.mxu1 %v2648_v42  ;;  %v2710_v41 = vld [vmem:[%s3055_s1 + $0x238] sm:$0xff]  }
  0x46   : > { %2430 = vmatprep.subr.bf16.mxu0 %v2650_v43 }
  0x47   : > { %2327 = vmatmul.mubr.bf16.vlgmr.msra.gmra.mrb[0].mxu1 %v2651_v44 }
  0x48   : > { %2335 = vmatpush3.bf16.msra.mxu1 %v2648_v42  ;;  %2423 = vmatmul.mubr.bf16.vlgmr.msra.gmra.mrb[0].mxu0 %v2652_v45  ;;  %v2714_v42 = vld [vmem:[%s2813_s16 + $0x64] sm:$0xff]  }
  0x49   : > { %2431 = vmatpush3.bf16.msra.mxu0 %v2650_v43  ;;  %2336 = vmatprep.subr.bf16.mxu1 %v2653_v46  ;;  %v2713_v43 = vld [vmem:[%s2813_s16 + $0x54] sm:$0xff]  }
  0x4a   : > { %2432 = vmatprep.subr.bf16.mxu0 %v2654_v47  ;;  %2330 = vmatprep.mubr.bf16.mxu1 %v2663_v48 }
  0x4b   : > { %2426 = vmatprep.mubr.bf16.mxu0 %v2665_v49 }
  0x4c   : > { %2337 = vmatpush3.bf16.msra.mxu1 %v2653_v46 }
  0x4d   : > { %2433 = vmatpush3.bf16.msra.mxu0 %v2654_v47  ;;  %2338 = vmatprep.subr.bf16.mxu1 %v2655_v50 }
  0x4e   : > { %2434 = vmatprep.subr.bf16.mxu0 %v2656_v51 }
  0x4f   : > { %2331 = vmatmul.mubr.bf16.gmra.mrb[4].mxu1 %v2667_v53 }
  0x50   : > { %2339 = vmatpush3.bf16.msra.mxu1 %v2655_v50  ;;  %2427 = vmatmul.mubr.bf16.gmra.mrb[4].mxu0 %v2668_v54 }
  0x51   : > { %2435 = vmatpush3.bf16.msra.mxu0 %v2656_v51  ;;  %2340 = vmatprep.subr.bf16.mxu1 %v2657_v52 }
  0x52   : > { %2436 = vmatprep.subr.bf16.mxu0 %v2658_v55  ;;  %2350 = vmatprep.mubr.bf16.mxu1 %v2671_v56 }
  0x53   : > { %2446 = vmatprep.mubr.bf16.mxu0 %v2673_v57 }
  0x54   : > { %2341 = vmatpush3.bf16.msra.mxu1 %v2657_v52 }
  0x55   : > { %2437 = vmatpush3.bf16.msra.mxu0 %v2658_v55  ;;  %2342 = vmatprep.subr.bf16.mxu1 %v2659_v58 }
  0x56   : > { %2438 = vmatprep.subr.bf16.mxu0 %v2660_v59 }
  0x58   : > { %2343 = vmatpush3.bf16.msra.mxu1 %v2659_v58 }
  0x59   : > { %2439 = vmatpush3.bf16.msra.mxu0 %v2660_v59  ;;  %2344 = vmatprep.subr.bf16.mxu1 %v2661_v60 }
  0x5a   : > { %2440 = vmatprep.subr.bf16.mxu0 %v2662_v61 }
  0x5c   : > { %2345 = vmatpush3.bf16.msra.mxu1 %v2661_v60  ;;  %v2135_v60 = vld [vmem:[%s3056_s2] ss:$0 sm:$0xff] }
  0x5d   : > { %2441 = vmatpush3.bf16.msra.mxu0 %v2662_v61  ;;  %2346 = vmatprep.subr.bf16.mxu1 %v2664_v62 }
  0x5e   : > { %2442 = vmatprep.subr.bf16.mxu0 %v2666_v63 }
  0x60   : > { %2347 = vmatpush3.bf16.msra.mxu1 %v2664_v62 }
  0x61   : > { %2443 = vmatpush3.bf16.msra.mxu0 %v2666_v63  ;;  %2348 = vmatprep.subr.bf16.mxu1 %v2669_v0 }
  0x62   : > { %2444 = vmatprep.subr.bf16.mxu0 %v2670_v1 }
  0x64   : > { %2349 = vmatpush3.bf16.msra.mxu1 %v2669_v0 }
  0x65   : > { %2445 = vmatpush3.bf16.msra.mxu0 %v2670_v1  ;;  %2358 = vmatprep.subr.bf16.mxu1 %v2672_v2 }
  0x66   : > { %2454 = vmatprep.subr.bf16.mxu0 %v2674_v3 }
  0x67   : > { %2351 = vmatmul.mubr.bf16.vlgmr.msra.gmra.mrb[0].mxu1 %v2675_v4 }
  0x68   : > { %2359 = vmatpush3.bf16.msra.mxu1 %v2672_v2  ;;  %2447 = vmatmul.mubr.bf16.vlgmr.msra.gmra.mrb[0].mxu0 %v2676_v5 }
  0x69   : > { %2455 = vmatpush3.bf16.msra.mxu0 %v2674_v3  ;;  %2360 = vmatprep.subr.bf16.mxu1 %v2677_v6 }
  0x6a   : > { %2456 = vmatprep.subr.bf16.mxu0 %v2678_v7  ;;  %2354 = vmatprep.mubr.bf16.mxu1 %v2687_v8 }
  0x6b   : > { %2450 = vmatprep.mubr.bf16.mxu0 %v2688_v9 }
  0x6c   : > { %2361 = vmatpush3.bf16.msra.mxu1 %v2677_v6 }
  0x6d   : > { %2457 = vmatpush3.bf16.msra.mxu0 %v2678_v7  ;;  %2362 = vmatprep.subr.bf16.mxu1 %v2679_v10 }
  0x6e   : > { %2458 = vmatprep.subr.bf16.mxu0 %v2680_v11 }
  0x6f   : > { %2355 = vmatmul.mubr.bf16.gmra.mrb[4].mxu1 %v2689_v13 }
  0x70   : > { %2363 = vmatpush3.bf16.msra.mxu1 %v2679_v10  ;;  %2451 = vmatmul.mubr.bf16.gmra.mrb[4].mxu0 %v2691_v14 }
  0x71   : > { %2459 = vmatpush3.bf16.msra.mxu0 %v2680_v11  ;;  %2364 = vmatprep.subr.bf16.mxu1 %v2681_v12 }
  0x72   : > { %2460 = vmatprep.subr.bf16.mxu0 %v2682_v15  ;;  %2374 = vmatprep.mubr.bf16.mxu1 %v2695_v16 }
  0x73   : > { %2470 = vmatprep.mubr.bf16.mxu0 %v2696_v17 }
  0x74   : > { %2365 = vmatpush3.bf16.msra.mxu1 %v2681_v12 }
  0x75   : > { %2461 = vmatpush3.bf16.msra.mxu0 %v2682_v15  ;;  %2366 = vmatprep.subr.bf16.mxu1 %v2683_v18 }
  0x76   : > { %2462 = vmatprep.subr.bf16.mxu0 %v2684_v19 }
  0x78   : > { %2367 = vmatpush3.bf16.msra.mxu1 %v2683_v18 }
  0x79   : > { %2463 = vmatpush3.bf16.msra.mxu0 %v2684_v19  ;;  %2368 = vmatprep.subr.bf16.mxu1 %v2685_v20 }
  0x7a   : > { %2464 = vmatprep.subr.bf16.mxu0 %v2686_v21 }
  0x7c   : > { %2369 = vmatpush3.bf16.msra.mxu1 %v2685_v20 }
  0x7d   : > { %2465 = vmatpush3.bf16.msra.mxu0 %v2686_v21  ;;  %2370 = vmatprep.subr.bf16.mxu1 %v2690_v22 }
  0x7e   : > { %2466 = vmatprep.subr.bf16.mxu0 %v2692_v23 }
  0x80   : > { %2371 = vmatpush3.bf16.msra.mxu1 %v2690_v22 }
  0x81   : > { %2467 = vmatpush3.bf16.msra.mxu0 %v2692_v23  ;;  %2372 = vmatprep.subr.bf16.mxu1 %v2693_v24 }
  0x82   : > { %2468 = vmatprep.subr.bf16.mxu0 %v2694_v25 }
  0x84   : > { %2373 = vmatpush3.bf16.msra.mxu1 %v2693_v24 }
  0x85   : > { %2469 = vmatpush3.bf16.msra.mxu0 %v2694_v25  ;;  %2502 = vmatprep.subr.bf16.mxu1 %v2699_v26 }
  0x86   : > { %2478 = vmatprep.subr.bf16.mxu0 %v2699_v26 }
  0x87   : > { %2375 = vmatmul.mubr.bf16.vlgmr.msra.gmra.mrb[0].mxu1 %v2697_v27 }
  0x88   : > { %2471 = vmatmul.mubr.bf16.vlgmr.msra.gmra.mrb[0].mxu0 %v2698_v28  ;;  %2510 = vmatpush3.bf16.msra.mxu1 %v2699_v26 }
  0x89   : > { %2479 = vmatpush3.bf16.msra.mxu0 %v2699_v26  ;;  %2503 = vmatprep.subr.bf16.mxu1 %v2700_v29 }
  0x8a   : > { %2480 = vmatprep.subr.bf16.mxu0 %v2700_v29  ;;  %2378 = vmatprep.mubr.bf16.mxu1 %v2701_v30 }
  0x8b   : > { %2474 = vmatprep.mubr.bf16.mxu0 %v2702_v31 }
  0x8c   : > { %2511 = vmatpush3.bf16.msra.mxu1 %v2700_v29 }
  0x8d   : > { %2481 = vmatpush3.bf16.msra.mxu0 %v2700_v29  ;;  %2504 = vmatprep.subr.bf16.mxu1 %v2705_v32 }
  0x8e   : > { %2482 = vmatprep.subr.bf16.mxu0 %v2705_v32 }
  0x8f   : > { %2379 = vmatmul.mubr.bf16.gmra.mrb[4].mxu1 %v2703_v33 }
  0x90   : > { %2475 = vmatmul.mubr.bf16.gmra.mrb[4].mxu0 %v2704_v34  ;;  %2512 = vmatpush3.bf16.msra.mxu1 %v2705_v32 }
  0x91   : > { %2483 = vmatpush3.bf16.msra.mxu0 %v2705_v32  ;;  %2505 = vmatprep.subr.bf16.mxu1 %v2706_v35 }
  0x92   : > { %2484 = vmatprep.subr.bf16.mxu0 %v2706_v35  ;;  %2494 = vmatprep.mubr.bf16.mxu0 %v2711_v36 }
  0x93   : > { %2498 = vmatprep.mubr.bf16.mxu1 %v2712_v37 }
  0x94   : > { %2513 = vmatpush3.bf16.msra.mxu1 %v2706_v35 }
  0x95   : > { %2485 = vmatpush3.bf16.msra.mxu0 %v2706_v35  ;;  %2506 = vmatprep.subr.bf16.mxu1 %v2707_v38 }
  0x96   : > { %2486 = vmatprep.subr.bf16.mxu0 %v2707_v38 }
  0x98   : > { %2514 = vmatpush3.bf16.msra.mxu1 %v2707_v38 }
  0x99   : > { %2487 = vmatpush3.bf16.msra.mxu0 %v2707_v38  ;;  %2507 = vmatprep.subr.bf16.mxu1 %v2708_v39 }
  0x9a   : > { %2488 = vmatprep.subr.bf16.mxu0 %v2708_v39 }
  0x9c   : > { %2515 = vmatpush3.bf16.msra.mxu1 %v2708_v39 }
  0x9d   : > { %2489 = vmatpush3.bf16.msra.mxu0 %v2708_v39  ;;  %2508 = vmatprep.subr.bf16.mxu1 %v2709_v40 }
  0x9e   : > { %2490 = vmatprep.subr.bf16.mxu0 %v2709_v40 }
  0xa0   : > { %2516 = vmatpush3.bf16.msra.mxu1 %v2709_v40 }
  0xa1   : > { %2491 = vmatpush3.bf16.msra.mxu0 %v2709_v40  ;;  %2509 = vmatprep.subr.bf16.mxu1 %v2710_v41 }
  0xa2   : > { %2492 = vmatprep.subr.bf16.mxu0 %v2710_v41 }
  0xa4   : > { %2517 = vmatpush3.bf16.msra.mxu1 %v2710_v41 }
  0xa5   : > { %2493 = vmatpush3.bf16.msra.mxu0 %v2710_v41 }
  0xa7   : > { %2499 = vmatmul.mubr.bf16.vlgmr.msra.gmra.mrb[8].mxu1 %v2714_v42 }
  0xa8   : > { %2495 = vmatmul.mubr.bf16.vlgmr.msra.gmra.mrb[0].mxu0 %v2713_v43 }
 0x15a   : > { %v2376_v44 = vpop.f32.mrb[0].mxu1 }
 0x15b   : > { %v833_v45 = vpop.f32.mrb[1].mxu1 }
 0x15c   : > { %v2377_v46 = vpop.f32.mrb[2].mxu1 }
 0x15d   : > { %v836_v47 = vpop.f32.mrb[3].mxu1 }
 0x162   : > { %v2380_v48 = vpop.f32.mrb[4].mxu1 }
 0x163   : > { %v2476_v49 = vpop.f32.mrb[4].mxu0  ;;  %v849_v50 = vpop.f32.mrb[5].mxu1 }
 0x164   : > { %v2522_v51 = vadd.f32 %v2476_v49, %v2380_v48  ;;  %v1529_v52 = vpop.f32.mrb[5].mxu0  ;;  %v2381_v53 = vpop.f32.mrb[6].mxu1 }
 0x165   : > { %v2524_v54 = vadd.f32 %v1529_v52, %v849_v50  ;;  %v2477_v55 = vpop.f32.mrb[6].mxu0  ;;  %v852_v56 = vpop.f32.mrb[7].mxu1 }
 0x166   : > { %v2526_v57 = vadd.f32 %v2477_v55, %v2381_v53  ;;  %v1532_v58 = vpop.f32.mrb[7].mxu0 }
 0x167   : > { %v2528_v59 = vadd.f32 %v1532_v58, %v852_v56 }
 0x17a   : > { %v2500_v61 = vpop.f32.mrb[8].mxu1 }
 0x17b   : > { %v2496_v62 = vpop.f32.mrb[0].mxu0  ;;  %v2523_v63 = vadd.f32 %v2522_v51, %v2500_v61  ;;  %v1699_v0 = vpop.f32.mrb[9].mxu1 }
 0x17c   : > { %v2518_v1 = vadd.f32 %v2496_v62, %v2376_v44  ;;  %v1683_v2 = vpop.f32.mrb[1].mxu0  ;;  %v2525_v3 = vadd.f32 %v2524_v54, %v1699_v0  ;;  %v2501_v4 = vpop.f32.mrb[10].mxu1 }
 0x17d   : > { %v1735_v5 = vadd.f32 %v2523_v63, %v2135_v60  ;;  %v2519_v6 = vadd.f32 %v1683_v2, %v833_v45  ;;  %v2497_v7 = vpop.f32.mrb[2].mxu0  ;;  %v2527_v8 = vadd.f32 %v2526_v57, %v2501_v4  ;;  %v1702_v9 = vpop.f32.mrb[11].mxu1 }
 0x17e   : > { %v1731_v10 = vadd.f32 %v2518_v1, %v2135_v60  ;;  %v1733_v11 = vadd.f32 %v2525_v3, %v2135_v60  ;;  %v2520_v12 = vadd.f32 %v2497_v7, %v2377_v46  ;;  %v1686_v13 = vpop.f32.mrb[3].mxu0  ;;  %v2529_v14 = vadd.f32 %v2528_v59, %v1702_v9 }
 0x17f   : > { %v1736_v15 = vadd.f32 %v2527_v8, %v2135_v60  ;;  %v1751_v16 = vmul.f32 0.01, %v1735_v5  ;;  %v1729_v17 = vadd.f32 %v2519_v6, %v2135_v60  ;;  %vm1743_vm0 = vcmp.ge.f32.partialorder %v1735_v5, 0.0 }
 0x180   : > { %v1747_v18 = vmul.f32 0.01, %v1731_v10  ;;  %v1732_v19 = vadd.f32 %v2520_v12, %v2135_v60  ;;  %vm1739_vm1 = vcmp.ge.f32.partialorder %v1731_v10, 0.0  ;;  %vm1741_vm2 = vcmp.ge.f32.partialorder %v1733_v11, 0.0 }
 0x181   : > { %vm1744_vm3 = vcmp.ge.f32.partialorder %v1736_v15, 0.0  ;;  %v1752_v20 = vmul.f32 0.01, %v1736_v15  ;;  %v1749_v21 = vmul.f32 0.01, %v1733_v11  ;;  %v2521_v23 = vadd.f32 %v1686_v13, %v836_v47 }
 0x182   : > { %vm1740_vm4 = vcmp.ge.f32.partialorder %v1732_v19, 0.0  ;;  %v1748_v22 = vmul.f32 0.01, %v1732_v19  ;;  %v1759_v24 = vsel %vm1743_vm0, %v1735_v5, %v1751_v16  ;;  %v1745_v25 = vmul.f32 0.01, %v1729_v17 }
 0x183   : > { %v1760_v26 = vsel %vm1744_vm3, %v1736_v15, %v1752_v20  ;;  %v1734_v27 = vadd.f32 %v2529_v14, %v2135_v60  ;;  %v1755_v28 = vsel %vm1739_vm1, %v1731_v10, %v1747_v18  ;;  %v1730_v31 = vadd.f32 %v2521_v23, %v2135_v60 }
 0x184   : > { %v1756_v29 = vsel %vm1740_vm4, %v1732_v19, %v1748_v22  ;;  %v2173_v30 = vpack.c.bf16 %v1760_v26, %v1759_v24  ;;  %vm1737_vm5 = vcmp.ge.f32.partialorder %v1729_v17, 0.0  ;;  %v1757_v35 = vsel %vm1741_vm2, %v1733_v11, %v1749_v21 }
 0x185   : > { %v2163_v32 = vpack.c.bf16 %v1756_v29, %v1755_v28  ;;  %vm1742_vm6 = vcmp.ge.f32.partialorder %v1734_v27, 0.0  ;;  %v1750_v33 = vmul.f32 0.01, %v1734_v27  ;;  %vm1738_vm7 = vcmp.ge.f32.partialorder %v1730_v31, 0.0 }
 0x186   : > { %2177 = vst [vmem:[%s206_s8 + $0x18] sm:$0xff] %v2173_v30   ;;  %v1746_v34 = vmul.f32 0.01, %v1730_v31  ;;  %v1753_v37 = vsel %vm1737_vm5, %v1729_v17, %v1745_v25 }
 0x187   : > { %2175 = vst [vmem:[%s206_s8 + $0x8] sm:$0xff] %v2163_v32   ;;  %v1758_v36 = vsel %vm1742_vm6, %v1734_v27, %v1750_v33 }
 0x188   : > { %v1754_v38 = vsel %vm1738_vm7, %v1730_v31, %v1746_v34  ;;  %v2168_v39 = vpack.c.bf16 %v1758_v36, %v1757_v35 }
 0x189   : > { %v2158_v40 = vpack.c.bf16 %v1754_v38, %v1753_v37 }
 0x18a   : > { %2176 = vst [vmem:[%s206_s8 + $0x10] sm:$0xff] %v2168_v39  }
 0x18b   : > { %2159 = vst [vmem:[%s206_s8] sm:$0xff] %v2158_v40  }
 0x18c PF: > { %s13_s14 = sadd.s32 1, %s2737_s14   ;;  %s3058_s12 = smov %s2733_s13 }
 0x18d   : > { %p10_p5 = scmp.ge.s32.totalorder %s13_s14, 4   ;;  %s3059_s13 = smov %s3061_s15 }
 0x18f   :  { %12 = sbr.rel (!%p10_p5) target bundleno = 2 (0x2), region = 70 }

// kernel: gradual_style_block_forward.5
= control target key start
LH: loop header
LB: loop body
LE: loop exit
PB: predicated region body
PF: predicated region fallthrough
CT: control target
= control target key end

     0   :  { %s2051_s12 = smov 0   ;;  %s2053_s13 = smov 0   ;;  %s2427_s0 = inlined_call_operand.vmem [shape: bf16[2,1,120,128], index: 0, kind: input, shape index: {}]   ;;  %s2428_s1 = inlined_call_operand.vmem [shape: bf16[9,128,128], index: 1, kind: input, shape index: {}]   ;;  %s2429_s2 = inlined_call_operand.vmem [shape: f32[1,128], index: 2, kind: input, shape index: {}]   ;;  %s2430_s3 = inlined_call_operand.vmem [shape: bf16[2,16,128], index: 3, kind: output, shape index: {}]  }
   0x1   :  { %s2055_s14 = smov 0  }
   0x2 LB: > { %s25_s15 = sadd.s32 1, %s2023_s13  ;;  %p1400_p0 = scmp.ge.s32.totalorder %s2027_s14, 1  ;;  %s2027_s14 = sphi %s2055_s14, %s13_s14   ;;  %s2023_s13 = sphi %s2053_s13, %s2432_s13   ;;  %s2019_s12 = sphi %s2051_s12, %s2431_s12  }
   0x3   : > { %p27_p1 = scmp.ge.s32.totalorder %s25_s15, 2  ;;  %p157_p2 = scmp.lt.s32.totalorder %s2027_s14, 3 }
   0x5   : > { %s2434_s15 = smov (%p27_p1, %s25_s15), 0  ;;  %p158_p3 = pnand %p1400_p0, %p157_p2 }
   0x6   : > { %v1919_v0 = vld [vmem:[%s2428_s1 + $0x40] sm:$0xff] (!%p158_p3)   ;;  %v2029_v1 = vmov (!%p158_p3), 0.0   ;;  %v1921_v3 = vld [vmem:[%s2428_s1 + $0x48] sm:$0xff] (!%p158_p3)   ;;  %vm2030_vm0 = vmmov (!%p158_p3), 0   ;;  %p189_p4 = scmp.lt.s32.totalorder (!%p158_p3), %s2019_s12, 1  ;;  %v1923_v5 = vld [vmem:[%s2428_s1 + $0x50] sm:$0xff] (!%p158_p3)  }
   0x7   : > { %161 = sbr.rel (%p158_p3) target bundleno = 391 (0x187), region = 32  ;;  %1712 = vmatprep.subr.bf16.mxu0 (!%p158_p3), %v2029_v1  ;;  %1732 = vmatprep.subr.bf16.mxu1 (!%p158_p3), %v2029_v1  ;;  %v1920_v2 = vld [vmem:[%s2428_s1] sm:$0xff] (!%p158_p3)   ;;  %v1922_v4 = vld [vmem:[%s2428_s1 + $0x8] sm:$0xff] (!%p158_p3)   ;;  %v1924_v6 = vld [vmem:[%s2428_s1 + $0x10] sm:$0xff] (!%p158_p3)   ;;  %vm255_vm1 = vcmask (!%p158_p3), 1045504  }
   0x8   : > { %1713 = vmatpush3.bf16.msra.mxu0 (!%p158_p3), %v1919_v0  ;;  %1728 = vmatprep.mubr.msk.bf16.mxu0 (!%p158_p3), %vm2030_vm0, %v2029_v1  ;;  %v1925_v7 = vld [vmem:[%s2428_s1 + $0x58] sm:$0xff] (!%p158_p3)   ;;  %v1927_v9 = vld [vmem:[%s2428_s1 + $0x60] sm:$0xff] (!%p158_p3)   ;;  %v1929_v11 = vld [vmem:[%s2428_s1 + $0x68] sm:$0xff] (!%p158_p3)  }
   0x9   : > { %1733 = vmatpush3.bf16.msra.mxu1 (!%p158_p3), %v1920_v2  ;;  %1714 = vmatprep.subr.bf16.mxu0 (!%p158_p3), %v2029_v1  ;;  %v1926_v8 = vld [vmem:[%s2428_s1 + $0x18] sm:$0xff] (!%p158_p3)   ;;  %v1928_v10 = vld [vmem:[%s2428_s1 + $0x20] sm:$0xff] (!%p158_p3)   ;;  %v1930_v12 = vld [vmem:[%s2428_s1 + $0x28] sm:$0xff] (!%p158_p3)  }
   0xa   : > { %1734 = vmatprep.subr.bf16.mxu1 (!%p158_p3), %v2029_v1  ;;  %1748 = vmatprep.mubr.msk.bf16.mxu1 (!%p158_p3), %vm2030_vm0, %v2029_v1  ;;  %v1931_v16 = vld [vmem:[%s2428_s1 + $0x70] sm:$0xff] (!%p158_p3)   ;;  %v1933_v19 = vld [vmem:[%s2428_s1 + $0x78] sm:$0xff] (!%p158_p3)   ;;  %v1938_v25 = vld [vmem:[%s2428_s1 + $0x80] sm:$0xff] (!%p158_p3)  }
   0xb   : > { %v1932_v18 = vld [vmem:[%s2428_s1 + $0x30] sm:$0xff] (!%p158_p3)   ;;  %v1934_v22 = vld [vmem:[%s2428_s1 + $0x38] sm:$0xff] (!%p158_p3)   ;;  %v1939_v26 = vld [vmem:[%s2428_s1 + $0xc0] sm:$0xff] (!%p158_p3)  }
   0xc   : > { %1715 = vmatpush3.bf16.msra.mxu0 (!%p158_p3), %v1921_v3  ;;  %v1940_v27 = vld [vmem:[%s2428_s1 + $0x88] sm:$0xff] (!%p158_p3)   ;;  %v1942_v29 = vld [vmem:[%s2428_s1 + $0x90] sm:$0xff] (!%p158_p3)   ;;  %v1944_v31 = vld [vmem:[%s2428_s1 + $0x98] sm:$0xff] (!%p158_p3)  }
   0xd   : > { %1735 = vmatpush3.bf16.msra.mxu1 (!%p158_p3), %v1922_v4  ;;  %1716 = vmatprep.subr.bf16.mxu0 (!%p158_p3), %v2029_v1  ;;  %v1941_v28 = vld [vmem:[%s2428_s1 + $0xc8] sm:$0xff] (!%p158_p3)   ;;  %v1943_v30 = vld [vmem:[%s2428_s1 + $0xd0] sm:$0xff] (!%p158_p3)   ;;  %v1945_v32 = vld [vmem:[%s2428_s1 + $0xd8] sm:$0xff] (!%p158_p3)  }
   0xe   : > { %s2436_s12 = smov (!%p189_p4, %s2019_s12), 1  ;;  %1736 = vmatprep.subr.bf16.mxu1 %v2029_v1  ;;  %v1946_v33 = vld [vmem:[%s2428_s1 + $0xa0] sm:$0xff]   ;;  %v1948_v35 = vld [vmem:[%s2428_s1 + $0xa8] sm:$0xff]   ;;  %v1950_v37 = vld [vmem:[%s2428_s1 + $0xb0] sm:$0xff]  }
   0xf   : > { %s1892_s5 = smul.u32 60, %s2436_s12  ;;  %v1947_v34 = vld [vmem:[%s2428_s1 + $0xe0] sm:$0xff]   ;;  %v1949_v36 = vld [vmem:[%s2428_s1 + $0xe8] sm:$0xff]   ;;  %v1951_v39 = vld [vmem:[%s2428_s1 + $0xf0] sm:$0xff]  }
  0x10   : > { %1717 = vmatpush3.bf16.msra.mxu0 %v1923_v5  ;;  %v1952_v41 = vld [vmem:[%s2428_s1 + $0xb8] sm:$0xff]   ;;  %v1955_v46 = vld [vmem:[%s2428_s1 + $0x100] sm:$0xff]   ;;  %v1959_v49 = vld [vmem:[%s2428_s1 + $0x108] sm:$0xff]  }
  0x11   : > { %1737 = vmatpush3.bf16.msra.mxu1 %v1924_v6  ;;  %1718 = vmatprep.subr.bf16.mxu0 %v2029_v1  ;;  %s2122_s16 = scalar_lea.vmem %s2427_s0, %s1892_s5  ;;  %v1953_v42 = vld [vmem:[%s2428_s1 + $0xf8] sm:$0xff]   ;;  %v1958_v48 = vld [vmem:[%s2428_s1 + $0x140] sm:$0xff]   ;;  %v1960_v50 = vld [vmem:[%s2428_s1 + $0x148] sm:$0xff]   ;;  %s1623_s5 = sshll.u32 %s2436_s12, 3 }
  0x12   : > { %1738 = vmatprep.subr.bf16.mxu1 %v2029_v1  ;;  %v227_v13 = vld [vmem:[%s2122_s16 + $0x8] sm:$0xc]  ;;  %v2134_v14 = vld [vmem:[%s2122_s16 + $0xc] sm:$0xf]  ;;  %v1937_v23 = vld [vmem:[%s2122_s16] sm:$0xff]   ;;  %s206_s8 = scalar_lea.vmem %s2430_s3, %s1623_s5 }
  0x13   : > { %v1936_v15 = vld [vmem:[%s2122_s16 + $0x10] ss:$0 sps:$4 sm:$0x33]   ;;  %v1420_v17 = vcombine.low %v227_v13, %v2134_v14  ;;  %v1957_v38 = vld [vmem:[%s2122_s16 + $0x24] ss:$0 sps:$4 sm:$0x33]  }
  0x14   : > { %1719 = vmatpush3.bf16.msra.mxu0 %v1925_v7  ;;  %v257_v21 = vrot.slane %v1936_v15, 2  ;;  %v1956_v40 = vld [vmem:[%s2122_s16 + $0x1c] sm:$0xfc]   ;;  %v589_v44 = vrot.slane %v1957_v38, 2  ;;  %v1954_v45 = vld [vmem:[%s2122_s16 + $0x14] sm:$0xff]   ;;  %v1967_v57 = vld [vmem:[%s2428_s1 + $0x128] sm:$0xff]  }
  0x15   : > { %1739 = vmatpush3.bf16.msra.mxu1 %v1926_v8  ;;  %1720 = vmatprep.subr.bf16.mxu0 %v2029_v1  ;;  %v256_v20 = vrot.slane %v1420_v17, 2  ;;  %v588_v43 = vrot.slane %v1956_v40, 2  ;;  %v1961_v51 = vld [vmem:[%s2428_s1 + $0x110] sm:$0xff]   ;;  %v1963_v53 = vld [vmem:[%s2428_s1 + $0x118] sm:$0xff]   ;;  %v1965_v55 = vld [vmem:[%s2428_s1 + $0x120] sm:$0xff]  }
  0x16   : > { %1740 = vmatprep.subr.bf16.mxu1 %v2029_v1  ;;  %v1962_v52 = vld [vmem:[%s2428_s1 + $0x150] sm:$0xff]   ;;  %v1964_v54 = vld [vmem:[%s2428_s1 + $0x158] sm:$0xff]   ;;  %v1966_v56 = vld [vmem:[%s2428_s1 + $0x160] sm:$0xff]  }
  0x17   : > { %v258_v24 = vsel %vm255_vm1, %v256_v20, %v257_v21  ;;  %v590_v47 = vsel %vm255_vm1, %v588_v43, %v589_v44  ;;  %v1968_v58 = vld [vmem:[%s2428_s1 + $0x168] sm:$0xff]   ;;  %v1969_v59 = vld [vmem:[%s2428_s1 + $0x130] sm:$0xff]   ;;  %v1976_v62 = vld [vmem:[%s2122_s16 + $0x38] ss:$0 sps:$4 sm:$0x33]  }
  0x18   : > { %1721 = vmatpush3.bf16.msra.mxu0 %v1927_v9  ;;  %v1970_v60 = vld [vmem:[%s2428_s1 + $0x170] sm:$0xff]   ;;  %v1971_v63 = vld [vmem:[%s2428_s1 + $0x138] sm:$0xff]   ;;  %v828_v3 = vrot.slane %v1976_v62, 2  ;;  %v1973_v4 = vld [vmem:[%s2122_s16 + $0x28] sm:$0xff]  }
  0x19   : > { %1741 = vmatpush3.bf16.msra.mxu1 %v1928_v10  ;;  %1722 = vmatprep.subr.bf16.mxu0 %v2029_v1  ;;  %v1975_v61 = vld [vmem:[%s2122_s16 + $0x30] sm:$0xfc]   ;;  %v1972_v0 = vld [vmem:[%s2428_s1 + $0x178] sm:$0xff]   ;;  %v1974_v5 = vld [vmem:[%s2428_s1 + $0x180] sm:$0xff]  }
  0x1a   : > { %1742 = vmatprep.subr.bf16.mxu1 %v2029_v1  ;;  %v827_v2 = vrot.slane %v1975_v61, 2  ;;  %v1977_v7 = vld [vmem:[%s2428_s1 + $0x1c0] sm:$0xff]   ;;  %v1978_v8 = vld [vmem:[%s2428_s1 + $0x188] sm:$0xff]   ;;  %v1980_v10 = vld [vmem:[%s2428_s1 + $0x190] sm:$0xff]  }
  0x1b   : > { %v1979_v9 = vld [vmem:[%s2428_s1 + $0x1c8] sm:$0xff]   ;;  %v1983_v13 = vld [vmem:[%s2428_s1 + $0x1d8] sm:$0xff]   ;;  %v1984_v15 = vld [vmem:[%s2428_s1 + $0x1a0] sm:$0xff]  }
  0x1c   : > { %1723 = vmatpush3.bf16.msra.mxu0 %v1929_v11  ;;  %v829_v6 = vsel %vm255_vm1, %v827_v2, %v828_v3  ;;  %v1981_v11 = vld [vmem:[%s2428_s1 + $0x1d0] sm:$0xff]   ;;  %v1986_v17 = vld [vmem:[%s2428_s1 + $0x1a8] sm:$0xff]   ;;  %v1992_v20 = vld [vmem:[%s2122_s16] sm:$0xfc]  }
  0x1d   : > { %1743 = vmatpush3.bf16.msra.mxu1 %v1930_v12  ;;  %1724 = vmatprep.subr.bf16.mxu0 %v2029_v1  ;;  %v1982_v12 = vld [vmem:[%s2428_s1 + $0x198] sm:$0xff]   ;;  %v1993_v21 = vld [vmem:[%s2122_s16 + $0x8] ss:$0 sps:$4 sm:$0x33]  }
  0x1e   : > { %1744 = vmatprep.subr.bf16.mxu1 %v2029_v1  ;;  %v2002_v38 = vld [vmem:[%s2428_s1 + $0x238] sm:$0xff]  }
  0x20   : > { %1725 = vmatpush3.bf16.msra.mxu0 %v1931_v16  ;;  %v1985_v16 = vld [vmem:[%s2428_s1 + $0x1e0] sm:$0xff]  }
  0x21   : > { %1745 = vmatpush3.bf16.msra.mxu1 %v1932_v18  ;;  %1726 = vmatprep.subr.bf16.mxu0 %v2029_v1  ;;  %v1987_v18 = vld [vmem:[%s2428_s1 + $0x1e8] sm:$0xff]  }
  0x22   : > { %1746 = vmatprep.subr.bf16.mxu1 %v2029_v1 }
  0x24   : > { %1727 = vmatpush3.bf16.msra.mxu0 %v1933_v19  ;;  %v1988_v19 = vld [vmem:[%s2428_s1 + $0x1b0] sm:$0xff]  }
  0x25   : > { %1747 = vmatpush3.bf16.msra.mxu1 %v1934_v22  ;;  %1752 = vmatprep.subr.bf16.mxu0 %v2029_v1  ;;  %v1989_v22 = vld [vmem:[%s2428_s1 + $0x1f0] sm:$0xff]  }
  0x26   : > { %1772 = vmatprep.subr.bf16.mxu1 %v2029_v1 }
  0x27   : > { %1729 = vmatmul.mubr.bf16.vlgmr.msra.gmra.mrb[0].mxu0 %v258_v24  ;;  %v950_v24 = vrot.slane %v1992_v20, 2 }
  0x28   : > { %1749 = vmatmul.mubr.bf16.vlgmr.msra.gmra.mrb[0].mxu1 %v1937_v23  ;;  %1753 = vmatpush3.bf16.msra.mxu0 %v1938_v25  ;;  %v1990_v23 = vld [vmem:[%s2428_s1 + $0x1b8] sm:$0xff]   ;;  %v951_v25 = vrot.slane %v1993_v21, 2 }
  0x29   : > { %1773 = vmatpush3.bf16.msra.mxu1 %v1939_v26  ;;  %1754 = vmatprep.subr.bf16.mxu0 %v2029_v1  ;;  %v1991_v26 = vld [vmem:[%s2428_s1 + $0x1f8] sm:$0xff]  }
  0x2a   : > { %1774 = vmatprep.subr.bf16.mxu1 %v2029_v1  ;;  %1768 = vmatprep.mubr.msk.bf16.mxu0 %vm2030_vm0, %v2029_v1 }
  0x2b   : > { %1788 = vmatprep.mubr.msk.bf16.mxu1 %vm2030_vm0, %v2029_v1 }
  0x2c   : > { %1755 = vmatpush3.bf16.msra.mxu0 %v1940_v27  ;;  %v1045_v27 = vld [vmem:[%s2122_s16 + $0x10] sm:$0xf] }
  0x2d   : > { %1775 = vmatpush3.bf16.msra.mxu1 %v1941_v28  ;;  %1756 = vmatprep.subr.bf16.mxu0 %v2029_v1  ;;  %v952_v28 = vsel %vm255_vm1, %v950_v24, %v951_v25 }
  0x2e   : > { %1776 = vmatprep.subr.bf16.mxu1 %v2029_v1 }
  0x30   : > { %1757 = vmatpush3.bf16.msra.mxu0 %v1942_v29  ;;  %v1994_v29 = vld [vmem:[%s2428_s1 + $0x200] sm:$0xff]  }
  0x31   : > { %1777 = vmatpush3.bf16.msra.mxu1 %v1943_v30  ;;  %1758 = vmatprep.subr.bf16.mxu0 %v2029_v1  ;;  %v1583_v30 = vcombine.low %v2134_v14, %v1045_v27  ;;  %v1997_v14 = vld [vmem:[%s2428_s1 + $0x210] sm:$0xff]  }
  0x32   : > { %1778 = vmatprep.subr.bf16.mxu1 %v2029_v1 }
  0x34   : > { %1759 = vmatpush3.bf16.msra.mxu0 %v1944_v31  ;;  %v1996_v31 = vld [vmem:[%s2428_s1 + $0x208] sm:$0xff]  }
  0x35   : > { %1779 = vmatpush3.bf16.msra.mxu1 %v1945_v32  ;;  %1760 = vmatprep.subr.bf16.mxu0 %v2029_v1  ;;  %v1998_v32 = vld [vmem:[%s2428_s1 + $0x218] sm:$0xff]  }
  0x36   : > { %1780 = vmatprep.subr.bf16.mxu1 %v2029_v1 }
  0x38   : > { %1761 = vmatpush3.bf16.msra.mxu0 %v1946_v33  ;;  %v1999_v33 = vld [vmem:[%s2428_s1 + $0x220] sm:$0xff]  }
  0x39   : > { %1781 = vmatpush3.bf16.msra.mxu1 %v1947_v34  ;;  %1762 = vmatprep.subr.bf16.mxu0 %v2029_v1  ;;  %v2000_v34 = vld [vmem:[%s2428_s1 + $0x228] sm:$0xff]  }
  0x3a   : > { %1782 = vmatprep.subr.bf16.mxu1 %v2029_v1 }
  0x3c   : > { %1763 = vmatpush3.bf16.msra.mxu0 %v1948_v35  ;;  %v2001_v35 = vld [vmem:[%s2428_s1 + $0x230] sm:$0xff]  }
  0x3d   : > { %1783 = vmatpush3.bf16.msra.mxu1 %v1949_v36  ;;  %1764 = vmatprep.subr.bf16.mxu0 %v2029_v1  ;;  %v2003_v36 = vld [vmem:[%s2122_s16 + $0x14] sm:$0xfc]  }
  0x3e   : > { %1784 = vmatprep.subr.bf16.mxu1 %v2029_v1 }
  0x40   : > { %1765 = vmatpush3.bf16.msra.mxu0 %v1950_v37  ;;  %v2004_v37 = vld [vmem:[%s2122_s16 + $0x1c] ss:$0 sps:$4 sm:$0x33]  }
  0x41   : > { %1785 = vmatpush3.bf16.msra.mxu1 %v1951_v39  ;;  %1766 = vmatprep.subr.bf16.mxu0 %v2029_v1  ;;  %v1186_v39 = vrot.slane %v2003_v36, 2  ;;  %v1187_v40 = vrot.slane %v2004_v37, 2 }
  0x42   : > { %1786 = vmatprep.subr.bf16.mxu1 %v2029_v1 }
  0x44   : > { %1767 = vmatpush3.bf16.msra.mxu0 %v1952_v41  ;;  %v1188_v41 = vsel %vm255_vm1, %v1186_v39, %v1187_v40 }
  0x45   : > { %1787 = vmatpush3.bf16.msra.mxu1 %v1953_v42  ;;  %1792 = vmatprep.subr.bf16.mxu0 %v2029_v1 }
  0x46   : > { %1812 = vmatprep.subr.bf16.mxu1 %v2029_v1 }
  0x47   : > { %1769 = vmatmul.mubr.bf16.vlgmr.msra.gmra.mrb[4].mxu0 %v1954_v45 }
  0x48   : > { %1793 = vmatpush3.bf16.msra.mxu0 %v1955_v46  ;;  %1789 = vmatmul.mubr.bf16.vlgmr.msra.gmra.mrb[4].mxu1 %v590_v47 }
  0x49   : > { %1813 = vmatpush3.bf16.msra.mxu1 %v1958_v48  ;;  %1794 = vmatprep.subr.bf16.mxu0 %v2029_v1 }
  0x4a   : > { %1814 = vmatprep.subr.bf16.mxu1 %v2029_v1  ;;  %1808 = vmatprep.mubr.msk.bf16.mxu0 %vm2030_vm0, %v2029_v1 }
  0x4b   : > { %1828 = vmatprep.mubr.msk.bf16.mxu1 %vm2030_vm0, %v2029_v1 }
  0x4c   : > { %1795 = vmatpush3.bf16.msra.mxu0 %v1959_v49 }
  0x4d   : > { %1815 = vmatpush3.bf16.msra.mxu1 %v1960_v50  ;;  %1796 = vmatprep.subr.bf16.mxu0 %v2029_v1 }
  0x4e   : > { %1816 = vmatprep.subr.bf16.mxu1 %v2029_v1 }
  0x50   : > { %1797 = vmatpush3.bf16.msra.mxu0 %v1961_v51 }
  0x51   : > { %1817 = vmatpush3.bf16.msra.mxu1 %v1962_v52  ;;  %1798 = vmatprep.subr.bf16.mxu0 %v2029_v1 }
  0x52   : > { %1818 = vmatprep.subr.bf16.mxu1 %v2029_v1 }
  0x54   : > { %1799 = vmatpush3.bf16.msra.mxu0 %v1963_v53 }
  0x55   : > { %1819 = vmatpush3.bf16.msra.mxu1 %v1964_v54  ;;  %1800 = vmatprep.subr.bf16.mxu0 %v2029_v1 }
  0x56   : > { %1820 = vmatprep.subr.bf16.mxu1 %v2029_v1 }
  0x58   : > { %1801 = vmatpush3.bf16.msra.mxu0 %v1965_v55 }
  0x59   : > { %1821 = vmatpush3.bf16.msra.mxu1 %v1966_v56  ;;  %1802 = vmatprep.subr.bf16.mxu0 %v2029_v1 }
  0x5a   : > { %1822 = vmatprep.subr.bf16.mxu1 %v2029_v1 }
  0x5c   : > { %1803 = vmatpush3.bf16.msra.mxu0 %v1967_v57 }
  0x5d   : > { %1823 = vmatpush3.bf16.msra.mxu1 %v1968_v58  ;;  %1804 = vmatprep.subr.bf16.mxu0 %v2029_v1 }
  0x5e   : > { %1824 = vmatprep.subr.bf16.mxu1 %v2029_v1 }
  0x60   : > { %1805 = vmatpush3.bf16.msra.mxu0 %v1969_v59 }
  0x61   : > { %1825 = vmatpush3.bf16.msra.mxu1 %v1970_v60  ;;  %1806 = vmatprep.subr.bf16.mxu0 %v2029_v1 }
  0x62   : > { %1826 = vmatprep.subr.bf16.mxu1 %v2029_v1 }
  0x64   : > { %1807 = vmatpush3.bf16.msra.mxu0 %v1971_v63 }
  0x65   : > { %1827 = vmatpush3.bf16.msra.mxu1 %v1972_v0  ;;  %1832 = vmatprep.subr.bf16.mxu0 %v2029_v1 }
  0x66   : > { %1852 = vmatprep.subr.bf16.mxu1 %v2029_v1 }
  0x67   : > { %1809 = vmatmul.mubr.bf16.vlgmr.msra.gmra.mrb[8].mxu0 %v1973_v4 }
  0x68   : > { %1833 = vmatpush3.bf16.msra.mxu0 %v1974_v5  ;;  %1829 = vmatmul.mubr.bf16.vlgmr.msra.gmra.mrb[8].mxu1 %v829_v6 }
  0x69   : > { %1853 = vmatpush3.bf16.msra.mxu1 %v1977_v7  ;;  %1834 = vmatprep.subr.bf16.mxu0 %v2029_v1 }
  0x6a   : > { %1854 = vmatprep.subr.bf16.mxu1 %v2029_v1  ;;  %1848 = vmatprep.mubr.msk.bf16.mxu0 %vm2030_vm0, %v2029_v1 }
  0x6b   : > { %1868 = vmatprep.mubr.msk.bf16.mxu1 %vm2030_vm0, %v2029_v1 }
  0x6c   : > { %1835 = vmatpush3.bf16.msra.mxu0 %v1978_v8 }
  0x6d   : > { %1855 = vmatpush3.bf16.msra.mxu1 %v1979_v9  ;;  %1836 = vmatprep.subr.bf16.mxu0 %v2029_v1 }
  0x6e   : > { %1856 = vmatprep.subr.bf16.mxu1 %v2029_v1 }
  0x70   : > { %1837 = vmatpush3.bf16.msra.mxu0 %v1980_v10 }
  0x71   : > { %1857 = vmatpush3.bf16.msra.mxu1 %v1981_v11  ;;  %1838 = vmatprep.subr.bf16.mxu0 %v2029_v1 }
  0x72   : > { %1858 = vmatprep.subr.bf16.mxu1 %v2029_v1 }
  0x74   : > { %1839 = vmatpush3.bf16.msra.mxu0 %v1982_v12 }
  0x75   : > { %1859 = vmatpush3.bf16.msra.mxu1 %v1983_v13  ;;  %1840 = vmatprep.subr.bf16.mxu0 %v2029_v1 }
  0x76   : > { %1860 = vmatprep.subr.bf16.mxu1 %v2029_v1 }
  0x78   : > { %1841 = vmatpush3.bf16.msra.mxu0 %v1984_v15 }
  0x79   : > { %1861 = vmatpush3.bf16.msra.mxu1 %v1985_v16  ;;  %1842 = vmatprep.subr.bf16.mxu0 %v2029_v1 }
  0x7a   : > { %1862 = vmatprep.subr.bf16.mxu1 %v2029_v1 }
  0x7c   : > { %1843 = vmatpush3.bf16.msra.mxu0 %v1986_v17 }
  0x7d   : > { %1863 = vmatpush3.bf16.msra.mxu1 %v1987_v18  ;;  %1844 = vmatprep.subr.bf16.mxu0 %v2029_v1 }
  0x7e   : > { %1864 = vmatprep.subr.bf16.mxu1 %v2029_v1 }
  0x80   : > { %1845 = vmatpush3.bf16.msra.mxu0 %v1988_v19 }
  0x81   : > { %1865 = vmatpush3.bf16.msra.mxu1 %v1989_v22  ;;  %1846 = vmatprep.subr.bf16.mxu0 %v2029_v1 }
  0x82   : > { %1866 = vmatprep.subr.bf16.mxu1 %v2029_v1 }
  0x84   : > { %1847 = vmatpush3.bf16.msra.mxu0 %v1990_v23 }
  0x85   : > { %1867 = vmatpush3.bf16.msra.mxu1 %v1991_v26  ;;  %1872 = vmatprep.subr.bf16.mxu0 %v2029_v1  ;;  %v1618_v26 = vld [vmem:[%s2429_s2] ss:$0 sm:$0xff] }
  0x87   : > { %1849 = vmatmul.mubr.bf16.vlgmr.msra.gmra.mrb[12].mxu0 %v952_v28 }
  0x88   : > { %1873 = vmatpush3.bf16.msra.mxu0 %v1994_v29  ;;  %1869 = vmatmul.mubr.bf16.vlgmr.msra.gmra.mrb[12].mxu1 %v1583_v30 }
  0x89   : > { %1874 = vmatprep.subr.bf16.mxu0 %v2029_v1  ;;  %1888 = vmatprep.mubr.msk.bf16.mxu0 %vm2030_vm0, %v2029_v1 }
  0x8c   : > { %1875 = vmatpush3.bf16.msra.mxu0 %v1996_v31 }
  0x8d   : > { %1876 = vmatprep.subr.bf16.mxu0 %v2029_v1 }
  0x90   : > { %1877 = vmatpush3.bf16.msra.mxu0 %v1997_v14 }
  0x91   : > { %1878 = vmatprep.subr.bf16.mxu0 %v2029_v1 }
  0x94   : > { %1879 = vmatpush3.bf16.msra.mxu0 %v1998_v32 }
  0x95   : > { %1880 = vmatprep.subr.bf16.mxu0 %v2029_v1 }
  0x98   : > { %1881 = vmatpush3.bf16.msra.mxu0 %v1999_v33 }
  0x99   : > { %1882 = vmatprep.subr.bf16.mxu0 %v2029_v1 }
  0x9c   : > { %1883 = vmatpush3.bf16.msra.mxu0 %v2000_v34 }
  0x9d   : > { %1884 = vmatprep.subr.bf16.mxu0 %v2029_v1 }
  0xa0   : > { %1885 = vmatpush3.bf16.msra.mxu0 %v2001_v35 }
  0xa1   : > { %1886 = vmatprep.subr.bf16.mxu0 %v2029_v1 }
  0xa4   : > { %1887 = vmatpush3.bf16.msra.mxu0 %v2002_v38 }
  0xa7   : > { %1889 = vmatmul.mubr.bf16.vlgmr.msra.gmra.mrb[16].mxu0 %v1188_v41 }
  0xfa   : > { %v342_v42 = vpop.f32.mrb[0].mxu0 }
  0xfb   : > { %v437_v43 = vpop.f32.mrb[0].mxu1  ;;  %v1730_v44 = vpop.f32.mrb[1].mxu0 }
  0xfc   : > { %v438_v45 = vadd.f32 %v437_v43, %v342_v42  ;;  %v1750_v46 = vpop.f32.mrb[1].mxu1  ;;  %v345_v47 = vpop.f32.mrb[2].mxu0 }
  0xfd   : > { %v440_v48 = vpop.f32.mrb[2].mxu1  ;;  %v1731_v49 = vpop.f32.mrb[3].mxu0 }
  0xfe   : > { %v441_v50 = vadd.f32 %v440_v48, %v345_v47  ;;  %v1751_v51 = vpop.f32.mrb[3].mxu1 }
 0x11a   : > { %v551_v52 = vpop.f32.mrb[4].mxu0 }
 0x11b   : > { %v558_v53 = vadd.f32 %v551_v52, %v438_v45  ;;  %v1770_v54 = vpop.f32.mrb[5].mxu0  ;;  %v674_v55 = vpop.f32.mrb[4].mxu1 }
 0x11c   : > { %v554_v56 = vpop.f32.mrb[6].mxu0  ;;  %v1790_v1 = vpop.f32.mrb[5].mxu1 }
 0x11d   : > { %v559_v57 = vadd.f32 %v554_v56, %v441_v50  ;;  %v681_v58 = vadd.f32 %v674_v55, %v558_v53  ;;  %v1771_v59 = vpop.f32.mrb[7].mxu0  ;;  %v677_v60 = vpop.f32.mrb[6].mxu1 }
 0x11e   : > { %v1791_v61 = vpop.f32.mrb[7].mxu1 }
 0x11f   : > { %v682_v62 = vadd.f32 %v677_v60, %v559_v57 }
 0x13a   : > { %v790_v63 = vpop.f32.mrb[8].mxu0 }
 0x13b   : > { %v797_v0 = vadd.f32 %v790_v63, %v681_v58  ;;  %v1810_v2 = vpop.f32.mrb[9].mxu0  ;;  %v913_v3 = vpop.f32.mrb[8].mxu1 }
 0x13c   : > { %v793_v4 = vpop.f32.mrb[10].mxu0  ;;  %v1830_v5 = vpop.f32.mrb[9].mxu1 }
 0x13d   : > { %v798_v6 = vadd.f32 %v793_v4, %v682_v62  ;;  %v920_v7 = vadd.f32 %v913_v3, %v797_v0  ;;  %v1811_v8 = vpop.f32.mrb[11].mxu0  ;;  %v916_v9 = vpop.f32.mrb[10].mxu1 }
 0x13e   : > { %v1831_v10 = vpop.f32.mrb[11].mxu1 }
 0x13f   : > { %v921_v11 = vadd.f32 %v916_v9, %v798_v6 }
 0x15a   : > { %v1036_v12 = vpop.f32.mrb[12].mxu0 }
 0x15b   : > { %v1043_v13 = vadd.f32 %v1036_v12, %v920_v7  ;;  %v1850_v15 = vpop.f32.mrb[13].mxu0  ;;  %v1149_v16 = vpop.f32.mrb[12].mxu1 }
 0x15c   : > { %v1039_v17 = vpop.f32.mrb[14].mxu0  ;;  %v1870_v18 = vpop.f32.mrb[13].mxu1 }
 0x15d   : > { %v1044_v19 = vadd.f32 %v1039_v17, %v921_v11  ;;  %v1156_v20 = vadd.f32 %v1149_v16, %v1043_v13  ;;  %v1851_v21 = vpop.f32.mrb[15].mxu0  ;;  %v1152_v22 = vpop.f32.mrb[14].mxu1 }
 0x15e   : > { %v1871_v23 = vpop.f32.mrb[15].mxu1 }
 0x15f   : > { %v1157_v24 = vadd.f32 %v1152_v22, %v1044_v19 }
 0x17a   : > { %v1272_v25 = vpop.f32.mrb[16].mxu0 }
 0x17b   : > { %v1279_v27 = vadd.f32 %v1272_v25, %v1156_v20  ;;  %v1890_v28 = vpop.f32.mrb[17].mxu0 }
 0x17c   : > { %v1275_v29 = vpop.f32.mrb[18].mxu0 }
 0x17d   : > { %v1288_v30 = vadd.f32 %v1618_v26, %v1279_v27  ;;  %v1280_v31 = vadd.f32 %v1275_v29, %v1157_v24  ;;  %v1891_v14 = vpop.f32.mrb[19].mxu0 }
 0x17f   : > { %v1292_v32 = vmul.f32 0.01, %v1288_v30  ;;  %v1289_v33 = vadd.f32 %v1618_v26, %v1280_v31  ;;  %vm1290_vm2 = vcmp.ge.f32.partialorder %v1288_v30, 0.0 }
 0x181   : > { %vm1291_vm3 = vcmp.ge.f32.partialorder %v1289_v33, 0.0  ;;  %v1293_v34 = vmul.f32 0.01, %v1289_v33  ;;  %v1294_v35 = vsel %vm1290_vm2, %v1288_v30, %v1292_v32 }
 0x183   : > { %v1295_v36 = vsel %vm1291_vm3, %v1289_v33, %v1293_v34 }
 0x184   : > { %v1629_v37 = vpack.c.bf16 %v1295_v36, %v1294_v35 }
 0x186   : > { %1630 = vst [vmem:[%s206_s8] sm:$0xff] %v1629_v37  }
 0x187 PF: > { %s13_s14 = sadd.s32 1, %s2027_s14   ;;  %s2431_s12 = smov %s2023_s13 }
 0x188   : > { %p10_p5 = scmp.ge.s32.totalorder %s13_s14, 4   ;;  %s2432_s13 = smov %s2434_s15 }
 0x18a   :  { %12 = sbr.rel (!%p10_p5) target bundleno = 2 (0x2), region = 70 }

// kernel: gradual_style_block_forward.6
= control target key start
LH: loop header
LB: loop body
LE: loop exit
PB: predicated region body
PF: predicated region fallthrough
CT: control target
= control target key end

     0   :  { %s1924_s12 = smov 0   ;;  %s1926_s13 = smov 0   ;;  %s2285_s0 = inlined_call_operand.vmem [shape: bf16[2,1,36,128], index: 0, kind: input, shape index: {}]   ;;  %s2286_s1 = inlined_call_operand.vmem [shape: bf16[9,128,128], index: 1, kind: input, shape index: {}]   ;;  %s2287_s2 = inlined_call_operand.vmem [shape: f32[1,128], index: 2, kind: input, shape index: {}]   ;;  %s2288_s3 = inlined_call_operand.vmem [shape: bf16[2,4,128], index: 3, kind: output, shape index: {}]  }
   0x1   :  { %s1928_s14 = smov 0  }
   0x2 LB: > { %s25_s15 = sadd.s32 1, %s1896_s13  ;;  %p1300_p0 = scmp.ge.s32.totalorder %s1900_s14, 1  ;;  %s1900_s14 = sphi %s1928_s14, %s13_s14   ;;  %s1896_s13 = sphi %s1926_s13, %s2290_s13   ;;  %s1892_s12 = sphi %s1924_s12, %s2289_s12  }
   0x3   : > { %p27_p1 = scmp.ge.s32.totalorder %s25_s15, 2  ;;  %p157_p2 = scmp.lt.s32.totalorder %s1900_s14, 3 }
   0x5   : > { %s2292_s15 = smov (%p27_p1, %s25_s15), 0  ;;  %p158_p3 = pnand %p1300_p0, %p157_p2 }
   0x6   : > { %v1800_v0 = vld [vmem:[%s2286_s1 + $0x40] sm:$0xff] (!%p158_p3)   ;;  %v1902_v1 = vmov (!%p158_p3), 0.0   ;;  %v1802_v3 = vld [vmem:[%s2286_s1 + $0x48] sm:$0xff] (!%p158_p3)   ;;  %vm1903_vm0 = vmmov (!%p158_p3), 0   ;;  %p187_p4 = scmp.lt.s32.totalorder (!%p158_p3), %s1892_s12, 1  ;;  %v1804_v5 = vld [vmem:[%s2286_s1 + $0x50] sm:$0xff] (!%p158_p3)  }
   0x7   : > { %161 = sbr.rel (%p158_p3) target bundleno = 389 (0x185), region = 32  ;;  %1593 = vmatprep.subr.bf16.mxu0 (!%p158_p3), %v1902_v1  ;;  %1613 = vmatprep.subr.bf16.mxu1 (!%p158_p3), %v1902_v1  ;;  %v1801_v2 = vld [vmem:[%s2286_s1] sm:$0xff] (!%p158_p3)   ;;  %v1803_v4 = vld [vmem:[%s2286_s1 + $0x8] sm:$0xff] (!%p158_p3)   ;;  %v1805_v6 = vld [vmem:[%s2286_s1 + $0x10] sm:$0xff] (!%p158_p3)  }
   0x8   : > { %1594 = vmatpush3.bf16.msra.mxu0 (!%p158_p3), %v1800_v0  ;;  %1609 = vmatprep.mubr.msk.bf16.mxu0 (!%p158_p3), %vm1903_vm0, %v1902_v1  ;;  %v1806_v7 = vld [vmem:[%s2286_s1 + $0x58] sm:$0xff] (!%p158_p3)   ;;  %v1808_v9 = vld [vmem:[%s2286_s1 + $0x60] sm:$0xff] (!%p158_p3)   ;;  %v1810_v11 = vld [vmem:[%s2286_s1 + $0x68] sm:$0xff] (!%p158_p3)  }
   0x9   : > { %1614 = vmatpush3.bf16.msra.mxu1 (!%p158_p3), %v1801_v2  ;;  %1595 = vmatprep.subr.bf16.mxu0 (!%p158_p3), %v1902_v1  ;;  %v1807_v8 = vld [vmem:[%s2286_s1 + $0x18] sm:$0xff] (!%p158_p3)   ;;  %v1809_v10 = vld [vmem:[%s2286_s1 + $0x20] sm:$0xff] (!%p158_p3)   ;;  %v1811_v12 = vld [vmem:[%s2286_s1 + $0x28] sm:$0xff] (!%p158_p3)  }
   0xa   : > { %1615 = vmatprep.subr.bf16.mxu1 (!%p158_p3), %v1902_v1  ;;  %1629 = vmatprep.mubr.msk.bf16.mxu1 (!%p158_p3), %vm1903_vm0, %v1902_v1  ;;  %v1812_v13 = vld [vmem:[%s2286_s1 + $0x70] sm:$0xff] (!%p158_p3)   ;;  %v1814_v16 = vld [vmem:[%s2286_s1 + $0x78] sm:$0xff] (!%p158_p3)   ;;  %v1817_v20 = vld [vmem:[%s2286_s1 + $0x80] sm:$0xff] (!%p158_p3)  }
   0xb   : > { %v1813_v14 = vld [vmem:[%s2286_s1 + $0x30] sm:$0xff] (!%p158_p3)   ;;  %v1815_v17 = vld [vmem:[%s2286_s1 + $0x38] sm:$0xff] (!%p158_p3)   ;;  %v1818_v21 = vld [vmem:[%s2286_s1 + $0xc0] sm:$0xff] (!%p158_p3)  }
   0xc   : > { %1596 = vmatpush3.bf16.msra.mxu0 (!%p158_p3), %v1802_v3  ;;  %v1819_v22 = vld [vmem:[%s2286_s1 + $0x88] sm:$0xff] (!%p158_p3)   ;;  %v1821_v24 = vld [vmem:[%s2286_s1 + $0x90] sm:$0xff] (!%p158_p3)   ;;  %v1823_v26 = vld [vmem:[%s2286_s1 + $0x98] sm:$0xff] (!%p158_p3)  }
   0xd   : > { %1616 = vmatpush3.bf16.msra.mxu1 (!%p158_p3), %v1803_v4  ;;  %1597 = vmatprep.subr.bf16.mxu0 (!%p158_p3), %v1902_v1  ;;  %v1820_v23 = vld [vmem:[%s2286_s1 + $0xc8] sm:$0xff] (!%p158_p3)   ;;  %v1822_v25 = vld [vmem:[%s2286_s1 + $0xd0] sm:$0xff] (!%p158_p3)   ;;  %v1824_v27 = vld [vmem:[%s2286_s1 + $0xd8] sm:$0xff] (!%p158_p3)  }
   0xe   : > { %s2294_s12 = smov (!%p187_p4, %s1892_s12), 1  ;;  %1617 = vmatprep.subr.bf16.mxu1 %v1902_v1  ;;  %v1825_v28 = vld [vmem:[%s2286_s1 + $0xa0] sm:$0xff]   ;;  %v1827_v30 = vld [vmem:[%s2286_s1 + $0xa8] sm:$0xff]   ;;  %v1829_v32 = vld [vmem:[%s2286_s1 + $0xb0] sm:$0xff]  }
   0xf   : > { %s1773_s5 = smul.u32 20, %s2294_s12  ;;  %v1826_v29 = vld [vmem:[%s2286_s1 + $0xe0] sm:$0xff]   ;;  %v1828_v31 = vld [vmem:[%s2286_s1 + $0xe8] sm:$0xff]   ;;  %v1830_v33 = vld [vmem:[%s2286_s1 + $0xf0] sm:$0xff]  }
  0x10   : > { %1598 = vmatpush3.bf16.msra.mxu0 %v1804_v5  ;;  %v1831_v36 = vld [vmem:[%s2286_s1 + $0xb8] sm:$0xff]   ;;  %v1834_v39 = vld [vmem:[%s2286_s1 + $0x100] sm:$0xff]   ;;  %v1837_v42 = vld [vmem:[%s2286_s1 + $0x108] sm:$0xff]  }
  0x11   : > { %1618 = vmatpush3.bf16.msra.mxu1 %v1805_v6  ;;  %1599 = vmatprep.subr.bf16.mxu0 %v1902_v1  ;;  %s1995_s16 = scalar_lea.vmem %s2285_s0, %s1773_s5  ;;  %v1832_v37 = vld [vmem:[%s2286_s1 + $0xf8] sm:$0xff]   ;;  %v1836_v41 = vld [vmem:[%s2286_s1 + $0x140] sm:$0xff]   ;;  %v1838_v43 = vld [vmem:[%s2286_s1 + $0x148] sm:$0xff]   ;;  %s1302_s5 = sshll.u32 %s2294_s12, 1 }
  0x12   : > { %1619 = vmatprep.subr.bf16.mxu1 %v1902_v1  ;;  %v1816_v15 = vld [vmem:[%s1995_s16] sm:$0x18]   ;;  %v204_v19 = vld [vmem:[%s1995_s16] sm:$0x3]  ;;  %v1839_v44 = vld [vmem:[%s2286_s1 + $0x110] sm:$0xff]   ;;  %s202_s8 = scalar_lea.vmem %s2288_s3, %s1302_s5 }
  0x13   : > { %v245_v18 = vrot.slane %v1816_v15, 3  ;;  %v1833_v34 = vld [vmem:[%s1995_s16 + $0x4] ss:$0 sps:$4 sm:$0xcc]   ;;  %v1840_v45 = vld [vmem:[%s2286_s1 + $0x150] sm:$0xff]   ;;  %v1841_v46 = vld [vmem:[%s2286_s1 + $0x118] sm:$0xff]  }
  0x14   : > { %1600 = vmatpush3.bf16.msra.mxu0 %v1806_v7  ;;  %v1835_v35 = vld [vmem:[%s1995_s16 + $0x8] ss:$0 sps:$4 sm:$0x66]   ;;  %v444_v38 = vrot.slane %v1833_v34, 2  ;;  %v1842_v47 = vld [vmem:[%s2286_s1 + $0x158] sm:$0xff]   ;;  %v1843_v48 = vld [vmem:[%s2286_s1 + $0x120] sm:$0xff]  }
  0x15   : > { %1620 = vmatpush3.bf16.msra.mxu1 %v1807_v8  ;;  %1601 = vmatprep.subr.bf16.mxu0 %v1902_v1  ;;  %v556_v40 = vrot.slane %v1835_v35, 1  ;;  %v1844_v49 = vld [vmem:[%s2286_s1 + $0x160] sm:$0xff]   ;;  %v1845_v50 = vld [vmem:[%s2286_s1 + $0x128] sm:$0xff]   ;;  %v1847_v52 = vld [vmem:[%s2286_s1 + $0x130] sm:$0xff]  }
  0x16   : > { %1621 = vmatprep.subr.bf16.mxu1 %v1902_v1  ;;  %v1846_v51 = vld [vmem:[%s2286_s1 + $0x168] sm:$0xff]   ;;  %v1848_v53 = vld [vmem:[%s2286_s1 + $0x170] sm:$0xff]   ;;  %v1849_v54 = vld [vmem:[%s2286_s1 + $0x138] sm:$0xff]  }
  0x17   : > { %v1852_v55 = vld [vmem:[%s1995_s16 + $0xc] sm:$0x18]   ;;  %v1850_v56 = vld [vmem:[%s2286_s1 + $0x178] sm:$0xff]   ;;  %v647_v57 = vld [vmem:[%s1995_s16 + $0xc] sm:$0x3] }
  0x18   : > { %1602 = vmatpush3.bf16.msra.mxu0 %v1808_v9  ;;  %v1851_v58 = vld [vmem:[%s2286_s1 + $0x180] sm:$0xff]   ;;  %v778_v59 = vrot.slane %v1852_v55, 3  ;;  %v1854_v61 = vld [vmem:[%s2286_s1 + $0x188] sm:$0xff]   ;;  %v1856_v63 = vld [vmem:[%s2286_s1 + $0x190] sm:$0xff]  }
  0x19   : > { %1622 = vmatpush3.bf16.msra.mxu1 %v1809_v10  ;;  %1603 = vmatprep.subr.bf16.mxu0 %v1902_v1  ;;  %v1853_v60 = vld [vmem:[%s2286_s1 + $0x1c0] sm:$0xff]   ;;  %v1855_v62 = vld [vmem:[%s2286_s1 + $0x1c8] sm:$0xff]   ;;  %v1857_v0 = vld [vmem:[%s2286_s1 + $0x1d0] sm:$0xff]  }
  0x1a   : > { %1623 = vmatprep.subr.bf16.mxu1 %v1902_v1  ;;  %v1858_v2 = vld [vmem:[%s2286_s1 + $0x198] sm:$0xff]   ;;  %v1860_v4 = vld [vmem:[%s2286_s1 + $0x1a0] sm:$0xff]   ;;  %v1862_v6 = vld [vmem:[%s2286_s1 + $0x1a8] sm:$0xff]  }
  0x1b   : > { %v1859_v3 = vld [vmem:[%s2286_s1 + $0x1d8] sm:$0xff]   ;;  %v1861_v5 = vld [vmem:[%s2286_s1 + $0x1e0] sm:$0xff]   ;;  %v1863_v7 = vld [vmem:[%s2286_s1 + $0x1e8] sm:$0xff]  }
  0x1c   : > { %1604 = vmatpush3.bf16.msra.mxu0 %v1810_v11  ;;  %v1864_v8 = vld [vmem:[%s2286_s1 + $0x1b0] sm:$0xff]   ;;  %v1868_v10 = vld [vmem:[%s1995_s16] ss:$0 sps:$4 sm:$0x66]   ;;  %v1866_v11 = vld [vmem:[%s2286_s1 + $0x1b8] sm:$0xff]  }
  0x1d   : > { %1624 = vmatpush3.bf16.msra.mxu1 %v1811_v12  ;;  %1605 = vmatprep.subr.bf16.mxu0 %v1902_v1  ;;  %v1865_v9 = vld [vmem:[%s2286_s1 + $0x1f0] sm:$0xff]   ;;  %v1867_v12 = vld [vmem:[%s2286_s1 + $0x1f8] sm:$0xff]   ;;  %v981_v15 = vld [vmem:[%s1995_s16 + $0x4] sm:$0x3] }
  0x1e   : > { %1625 = vmatprep.subr.bf16.mxu1 %v1902_v1 }
  0x20   : > { %1606 = vmatpush3.bf16.msra.mxu0 %v1812_v13  ;;  %v890_v13 = vrot.slane %v1868_v10, 1 }
  0x21   : > { %1626 = vmatpush3.bf16.msra.mxu1 %v1813_v14  ;;  %1607 = vmatprep.subr.bf16.mxu0 %v1902_v1  ;;  %v1869_v14 = vld [vmem:[%s2286_s1 + $0x200] sm:$0xff]  }
  0x22   : > { %1627 = vmatprep.subr.bf16.mxu1 %v1902_v1 }
  0x24   : > { %1608 = vmatpush3.bf16.msra.mxu0 %v1814_v16  ;;  %v1870_v16 = vld [vmem:[%s2286_s1 + $0x208] sm:$0xff]  }
  0x25   : > { %1628 = vmatpush3.bf16.msra.mxu1 %v1815_v17  ;;  %1633 = vmatprep.subr.bf16.mxu0 %v1902_v1  ;;  %v1871_v17 = vld [vmem:[%s2286_s1 + $0x210] sm:$0xff]  }
  0x26   : > { %1653 = vmatprep.subr.bf16.mxu1 %v1902_v1 }
  0x27   : > { %1610 = vmatmul.mubr.bf16.vlgmr.msra.gmra.mrb[0].mxu0 %v245_v18  ;;  %v1872_v18 = vld [vmem:[%s2286_s1 + $0x218] sm:$0xff]  }
  0x28   : > { %1630 = vmatmul.mubr.bf16.vlgmr.msra.gmra.mrb[0].mxu1 %v204_v19  ;;  %1634 = vmatpush3.bf16.msra.mxu0 %v1817_v20  ;;  %v1873_v19 = vld [vmem:[%s2286_s1 + $0x220] sm:$0xff]   ;;  %v1874_v20 = vld [vmem:[%s2286_s1 + $0x228] sm:$0xff]  }
  0x29   : > { %1654 = vmatpush3.bf16.msra.mxu1 %v1818_v21  ;;  %1635 = vmatprep.subr.bf16.mxu0 %v1902_v1  ;;  %v1875_v21 = vld [vmem:[%s2286_s1 + $0x230] sm:$0xff]  }
  0x2a   : > { %1655 = vmatprep.subr.bf16.mxu1 %v1902_v1  ;;  %1649 = vmatprep.mubr.msk.bf16.mxu0 %vm1903_vm0, %v1902_v1 }
  0x2b   : > { %1669 = vmatprep.mubr.msk.bf16.mxu1 %vm1903_vm0, %v1902_v1 }
  0x2c   : > { %1636 = vmatpush3.bf16.msra.mxu0 %v1819_v22  ;;  %v1877_v22 = vld [vmem:[%s1995_s16 + $0x4] sm:$0x18]  }
  0x2d   : > { %1656 = vmatpush3.bf16.msra.mxu1 %v1820_v23  ;;  %1637 = vmatprep.subr.bf16.mxu0 %v1902_v1  ;;  %v1876_v23 = vld [vmem:[%s2286_s1 + $0x238] sm:$0xff]  }
  0x2e   : > { %1657 = vmatprep.subr.bf16.mxu1 %v1902_v1 }
  0x30   : > { %1638 = vmatpush3.bf16.msra.mxu0 %v1821_v24  ;;  %v1112_v24 = vrot.slane %v1877_v22, 3 }
  0x31   : > { %1658 = vmatpush3.bf16.msra.mxu1 %v1822_v25  ;;  %1639 = vmatprep.subr.bf16.mxu0 %v1902_v1 }
  0x32   : > { %1659 = vmatprep.subr.bf16.mxu1 %v1902_v1 }
  0x34   : > { %1640 = vmatpush3.bf16.msra.mxu0 %v1823_v26 }
  0x35   : > { %1660 = vmatpush3.bf16.msra.mxu1 %v1824_v27  ;;  %1641 = vmatprep.subr.bf16.mxu0 %v1902_v1 }
  0x36   : > { %1661 = vmatprep.subr.bf16.mxu1 %v1902_v1 }
  0x38   : > { %1642 = vmatpush3.bf16.msra.mxu0 %v1825_v28 }
  0x39   : > { %1662 = vmatpush3.bf16.msra.mxu1 %v1826_v29  ;;  %1643 = vmatprep.subr.bf16.mxu0 %v1902_v1 }
  0x3a   : > { %1663 = vmatprep.subr.bf16.mxu1 %v1902_v1 }
  0x3c   : > { %1644 = vmatpush3.bf16.msra.mxu0 %v1827_v30 }
  0x3d   : > { %1664 = vmatpush3.bf16.msra.mxu1 %v1828_v31  ;;  %1645 = vmatprep.subr.bf16.mxu0 %v1902_v1 }
  0x3e   : > { %1665 = vmatprep.subr.bf16.mxu1 %v1902_v1 }
  0x40   : > { %1646 = vmatpush3.bf16.msra.mxu0 %v1829_v32 }
  0x41   : > { %1666 = vmatpush3.bf16.msra.mxu1 %v1830_v33  ;;  %1647 = vmatprep.subr.bf16.mxu0 %v1902_v1 }
  0x42   : > { %1667 = vmatprep.subr.bf16.mxu1 %v1902_v1 }
  0x44   : > { %1648 = vmatpush3.bf16.msra.mxu0 %v1831_v36 }
  0x45   : > { %1668 = vmatpush3.bf16.msra.mxu1 %v1832_v37  ;;  %1673 = vmatprep.subr.bf16.mxu0 %v1902_v1 }
  0x46   : > { %1693 = vmatprep.subr.bf16.mxu1 %v1902_v1 }
  0x47   : > { %1650 = vmatmul.mubr.bf16.vlgmr.msra.gmra.mrb[4].mxu0 %v444_v38 }
  0x48   : > { %1674 = vmatpush3.bf16.msra.mxu0 %v1834_v39  ;;  %1670 = vmatmul.mubr.bf16.vlgmr.msra.gmra.mrb[4].mxu1 %v556_v40 }
  0x49   : > { %1694 = vmatpush3.bf16.msra.mxu1 %v1836_v41  ;;  %1675 = vmatprep.subr.bf16.mxu0 %v1902_v1 }
  0x4a   : > { %1695 = vmatprep.subr.bf16.mxu1 %v1902_v1  ;;  %1689 = vmatprep.mubr.msk.bf16.mxu0 %vm1903_vm0, %v1902_v1 }
  0x4b   : > { %1709 = vmatprep.mubr.msk.bf16.mxu1 %vm1903_vm0, %v1902_v1 }
  0x4c   : > { %1676 = vmatpush3.bf16.msra.mxu0 %v1837_v42 }
  0x4d   : > { %1696 = vmatpush3.bf16.msra.mxu1 %v1838_v43  ;;  %1677 = vmatprep.subr.bf16.mxu0 %v1902_v1 }
  0x4e   : > { %1697 = vmatprep.subr.bf16.mxu1 %v1902_v1 }
  0x50   : > { %1678 = vmatpush3.bf16.msra.mxu0 %v1839_v44 }
  0x51   : > { %1698 = vmatpush3.bf16.msra.mxu1 %v1840_v45  ;;  %1679 = vmatprep.subr.bf16.mxu0 %v1902_v1 }
  0x52   : > { %1699 = vmatprep.subr.bf16.mxu1 %v1902_v1 }
  0x54   : > { %1680 = vmatpush3.bf16.msra.mxu0 %v1841_v46 }
  0x55   : > { %1700 = vmatpush3.bf16.msra.mxu1 %v1842_v47  ;;  %1681 = vmatprep.subr.bf16.mxu0 %v1902_v1 }
  0x56   : > { %1701 = vmatprep.subr.bf16.mxu1 %v1902_v1 }
  0x58   : > { %1682 = vmatpush3.bf16.msra.mxu0 %v1843_v48 }
  0x59   : > { %1702 = vmatpush3.bf16.msra.mxu1 %v1844_v49  ;;  %1683 = vmatprep.subr.bf16.mxu0 %v1902_v1 }
  0x5a   : > { %1703 = vmatprep.subr.bf16.mxu1 %v1902_v1 }
  0x5c   : > { %1684 = vmatpush3.bf16.msra.mxu0 %v1845_v50 }
  0x5d   : > { %1704 = vmatpush3.bf16.msra.mxu1 %v1846_v51  ;;  %1685 = vmatprep.subr.bf16.mxu0 %v1902_v1 }
  0x5e   : > { %1705 = vmatprep.subr.bf16.mxu1 %v1902_v1 }
  0x60   : > { %1686 = vmatpush3.bf16.msra.mxu0 %v1847_v52 }
  0x61   : > { %1706 = vmatpush3.bf16.msra.mxu1 %v1848_v53  ;;  %1687 = vmatprep.subr.bf16.mxu0 %v1902_v1 }
  0x62   : > { %1707 = vmatprep.subr.bf16.mxu1 %v1902_v1 }
  0x64   : > { %1688 = vmatpush3.bf16.msra.mxu0 %v1849_v54 }
  0x65   : > { %1708 = vmatpush3.bf16.msra.mxu1 %v1850_v56  ;;  %1713 = vmatprep.subr.bf16.mxu0 %v1902_v1 }
  0x66   : > { %1733 = vmatprep.subr.bf16.mxu1 %v1902_v1 }
  0x67   : > { %1690 = vmatmul.mubr.bf16.vlgmr.msra.gmra.mrb[8].mxu0 %v647_v57 }
  0x68   : > { %1714 = vmatpush3.bf16.msra.mxu0 %v1851_v58  ;;  %1710 = vmatmul.mubr.bf16.vlgmr.msra.gmra.mrb[8].mxu1 %v778_v59 }
  0x69   : > { %1734 = vmatpush3.bf16.msra.mxu1 %v1853_v60  ;;  %1715 = vmatprep.subr.bf16.mxu0 %v1902_v1 }
  0x6a   : > { %1735 = vmatprep.subr.bf16.mxu1 %v1902_v1  ;;  %1729 = vmatprep.mubr.msk.bf16.mxu0 %vm1903_vm0, %v1902_v1 }
  0x6b   : > { %1749 = vmatprep.mubr.msk.bf16.mxu1 %vm1903_vm0, %v1902_v1 }
  0x6c   : > { %1716 = vmatpush3.bf16.msra.mxu0 %v1854_v61 }
  0x6d   : > { %1736 = vmatpush3.bf16.msra.mxu1 %v1855_v62  ;;  %1717 = vmatprep.subr.bf16.mxu0 %v1902_v1 }
  0x6e   : > { %1737 = vmatprep.subr.bf16.mxu1 %v1902_v1 }
  0x70   : > { %1718 = vmatpush3.bf16.msra.mxu0 %v1856_v63 }
  0x71   : > { %1738 = vmatpush3.bf16.msra.mxu1 %v1857_v0  ;;  %1719 = vmatprep.subr.bf16.mxu0 %v1902_v1  ;;  %v1509_v0 = vld [vmem:[%s2287_s2] ss:$0 sm:$0xff] }
  0x72   : > { %1739 = vmatprep.subr.bf16.mxu1 %v1902_v1 }
  0x74   : > { %1720 = vmatpush3.bf16.msra.mxu0 %v1858_v2 }
  0x75   : > { %1740 = vmatpush3.bf16.msra.mxu1 %v1859_v3  ;;  %1721 = vmatprep.subr.bf16.mxu0 %v1902_v1 }
  0x76   : > { %1741 = vmatprep.subr.bf16.mxu1 %v1902_v1 }
  0x78   : > { %1722 = vmatpush3.bf16.msra.mxu0 %v1860_v4 }
  0x79   : > { %1742 = vmatpush3.bf16.msra.mxu1 %v1861_v5  ;;  %1723 = vmatprep.subr.bf16.mxu0 %v1902_v1 }
  0x7a   : > { %1743 = vmatprep.subr.bf16.mxu1 %v1902_v1 }
  0x7c   : > { %1724 = vmatpush3.bf16.msra.mxu0 %v1862_v6 }
  0x7d   : > { %1744 = vmatpush3.bf16.msra.mxu1 %v1863_v7  ;;  %1725 = vmatprep.subr.bf16.mxu0 %v1902_v1 }
  0x7e   : > { %1745 = vmatprep.subr.bf16.mxu1 %v1902_v1 }
  0x80   : > { %1726 = vmatpush3.bf16.msra.mxu0 %v1864_v8 }
  0x81   : > { %1746 = vmatpush3.bf16.msra.mxu1 %v1865_v9  ;;  %1727 = vmatprep.subr.bf16.mxu0 %v1902_v1 }
  0x82   : > { %1747 = vmatprep.subr.bf16.mxu1 %v1902_v1 }
  0x84   : > { %1728 = vmatpush3.bf16.msra.mxu0 %v1866_v11 }
  0x85   : > { %1748 = vmatpush3.bf16.msra.mxu1 %v1867_v12  ;;  %1753 = vmatprep.subr.bf16.mxu0 %v1902_v1 }
  0x87   : > { %1730 = vmatmul.mubr.bf16.vlgmr.msra.gmra.mrb[12].mxu0 %v890_v13 }
  0x88   : > { %1754 = vmatpush3.bf16.msra.mxu0 %v1869_v14  ;;  %1750 = vmatmul.mubr.bf16.vlgmr.msra.gmra.mrb[12].mxu1 %v981_v15 }
  0x89   : > { %1755 = vmatprep.subr.bf16.mxu0 %v1902_v1  ;;  %1769 = vmatprep.mubr.msk.bf16.mxu0 %vm1903_vm0, %v1902_v1 }
  0x8c   : > { %1756 = vmatpush3.bf16.msra.mxu0 %v1870_v16 }
  0x8d   : > { %1757 = vmatprep.subr.bf16.mxu0 %v1902_v1 }
  0x90   : > { %1758 = vmatpush3.bf16.msra.mxu0 %v1871_v17 }
  0x91   : > { %1759 = vmatprep.subr.bf16.mxu0 %v1902_v1 }
  0x94   : > { %1760 = vmatpush3.bf16.msra.mxu0 %v1872_v18 }
  0x95   : > { %1761 = vmatprep.subr.bf16.mxu0 %v1902_v1 }
  0x98   : > { %1762 = vmatpush3.bf16.msra.mxu0 %v1873_v19 }
  0x99   : > { %1763 = vmatprep.subr.bf16.mxu0 %v1902_v1 }
  0x9c   : > { %1764 = vmatpush3.bf16.msra.mxu0 %v1874_v20 }
  0x9d   : > { %1765 = vmatprep.subr.bf16.mxu0 %v1902_v1 }
  0xa0   : > { %1766 = vmatpush3.bf16.msra.mxu0 %v1875_v21 }
  0xa1   : > { %1767 = vmatprep.subr.bf16.mxu0 %v1902_v1 }
  0xa4   : > { %1768 = vmatpush3.bf16.msra.mxu0 %v1876_v23 }
  0xa7   : > { %1770 = vmatmul.mubr.bf16.vlgmr.msra.gmra.mrb[16].mxu0 %v1112_v24 }
  0xfa   : > { %v329_v25 = vpop.f32.mrb[0].mxu0 }
  0xfb   : > { %v1611_v26 = vpop.f32.mrb[1].mxu0  ;;  %v417_v27 = vpop.f32.mrb[0].mxu1 }
  0xfc   : > { %v418_v28 = vadd.f32 %v417_v27, %v329_v25  ;;  %v332_v29 = vpop.f32.mrb[2].mxu0  ;;  %v1631_v30 = vpop.f32.mrb[1].mxu1 }
  0xfd   : > { %v1612_v31 = vpop.f32.mrb[3].mxu0  ;;  %v420_v32 = vpop.f32.mrb[2].mxu1 }
  0xfe   : > { %v1632_v33 = vpop.f32.mrb[3].mxu1 }
 0x11a   : > { %v528_v34 = vpop.f32.mrb[4].mxu0 }
 0x11b   : > { %v534_v35 = vadd.f32 %v528_v34, %v418_v28  ;;  %v1651_v36 = vpop.f32.mrb[5].mxu0  ;;  %v640_v37 = vpop.f32.mrb[4].mxu1 }
 0x11c   : > { %v531_v38 = vpop.f32.mrb[6].mxu0  ;;  %v1671_v39 = vpop.f32.mrb[5].mxu1 }
 0x11d   : > { %v646_v40 = vadd.f32 %v640_v37, %v534_v35  ;;  %v1652_v1 = vpop.f32.mrb[7].mxu0  ;;  %v643_v41 = vpop.f32.mrb[6].mxu1 }
 0x11e   : > { %v1672_v42 = vpop.f32.mrb[7].mxu1 }
 0x13a   : > { %v747_v43 = vpop.f32.mrb[8].mxu0 }
 0x13b   : > { %v753_v44 = vadd.f32 %v747_v43, %v646_v40  ;;  %v1691_v45 = vpop.f32.mrb[9].mxu0  ;;  %v862_v46 = vpop.f32.mrb[8].mxu1 }
 0x13c   : > { %v750_v47 = vpop.f32.mrb[10].mxu0  ;;  %v1711_v48 = vpop.f32.mrb[9].mxu1 }
 0x13d   : > { %v868_v49 = vadd.f32 %v862_v46, %v753_v44  ;;  %v1692_v50 = vpop.f32.mrb[11].mxu0  ;;  %v865_v51 = vpop.f32.mrb[10].mxu1 }
 0x13e   : > { %v1712_v52 = vpop.f32.mrb[11].mxu1 }
 0x15a   : > { %v974_v53 = vpop.f32.mrb[12].mxu0 }
 0x15b   : > { %v980_v54 = vadd.f32 %v974_v53, %v868_v49  ;;  %v1731_v55 = vpop.f32.mrb[13].mxu0  ;;  %v1081_v56 = vpop.f32.mrb[12].mxu1 }
 0x15c   : > { %v977_v57 = vpop.f32.mrb[14].mxu0  ;;  %v1751_v58 = vpop.f32.mrb[13].mxu1 }
 0x15d   : > { %v1087_v59 = vadd.f32 %v1081_v56, %v980_v54  ;;  %v1732_v60 = vpop.f32.mrb[15].mxu0  ;;  %v1084_v61 = vpop.f32.mrb[14].mxu1 }
 0x15e   : > { %v1752_v62 = vpop.f32.mrb[15].mxu1 }
 0x17a   : > { %v1196_v63 = vpop.f32.mrb[16].mxu0 }
 0x17b   : > { %v1202_v2 = vadd.f32 %v1196_v63, %v1087_v59  ;;  %v1771_v3 = vpop.f32.mrb[17].mxu0 }
 0x17c   : > { %v1199_v4 = vpop.f32.mrb[18].mxu0 }
 0x17d   : > { %v1210_v5 = vadd.f32 %v1509_v0, %v1202_v2  ;;  %v1772_v6 = vpop.f32.mrb[19].mxu0 }
 0x17f   : > { %vm1211_vm1 = vcmp.ge.f32.partialorder %v1210_v5, 0.0  ;;  %v1212_v7 = vmul.f32 0.01, %v1210_v5 }
 0x181   : > { %v1213_v8 = vsel %vm1211_vm1, %v1210_v5, %v1212_v7 }
 0x182   : > { %v1214_v9 = vpack.c.bf16 %v1213_v8, %v1213_v8 }
 0x184   : > { %1215 = vst [vmem:[%s202_s8] sm:$0x3] %v1214_v9 }
 0x185 PF: > { %s13_s14 = sadd.s32 1, %s1900_s14   ;;  %s2289_s12 = smov %s1896_s13 }
 0x186   : > { %p10_p5 = scmp.ge.s32.totalorder %s13_s14, 4   ;;  %s2290_s13 = smov %s2292_s15 }
 0x188   :  { %12 = sbr.rel (!%p10_p5) target bundleno = 2 (0x2), region = 70 }

// kernel: gradual_style_block_forward.7
= control target key start
LH: loop header
LB: loop body
LE: loop exit
PB: predicated region body
PF: predicated region fallthrough
CT: control target
= control target key end

     0   :  { %10 = vsyncpa [#allocation3], 0  ;;  %s2692_s0 = inlined_call_operand.vmem [shape: bf16[2,1,12,128], index: 0, kind: input, shape index: {}]   ;;  %s2693_s1 = inlined_call_operand.vmem [shape: bf16[9,128,128], index: 1, kind: input, shape index: {}]   ;;  %s2694_s2 = inlined_call_operand.vmem [shape: f32[1,128], index: 2, kind: input, shape index: {}]   ;;  %s2695_s3 = inlined_call_operand.vmem [shape: bf16[128,128], index: 3, kind: input, shape index: {}]   ;;  %s2696_s4 = inlined_call_operand.vmem [shape: f32[1,128], index: 4, kind: input, shape index: {}]   ;;  %s2697_s5 = inlined_call_operand.hbm [shape: f32[2,1,128], index: 5, kind: output, shape index: {}]  }
   0x1   :  { %12 = vsyncpa [#allocation3 + $0x1], 0  ;;  %s2213_s18 = smov 0   ;;  %s2215_s19 = smov 0  }
   0x2   :  { %s2217_s20 = smov 0   ;;  %s2219_s21 = smov 0  }
   0x3   :  { %s2221_s22 = smov 0   ;;  %s2223_s23 = smov 0  }
   0x4 LB: > { %s1444_s24 = sadd.s32 4294967295, %s2178_s23   ;;  %s1445_s25 = sadd.s32 4294967294, %s2178_s23   ;;  %s2178_s23 = sphi %s2223_s23, %s18_s23   ;;  %s2174_s22 = sphi %s2221_s22, %s2704_s22   ;;  %s2170_s21 = sphi %s2219_s21, %s2703_s21   ;;  %s2166_s20 = sphi %s2217_s20, %s2702_s20   ;;  %s2162_s19 = sphi %s2215_s19, %s2701_s19   ;;  %s2158_s18 = sphi %s2213_s18, %s2700_s18  }
   0x5   : > { %s30_s26 = sadd.s32 1, %s2174_s22  ;;  %s151_s27 = sadd.s32 1, %s2166_s20 }
   0x6   : > { %p32_p0 = scmp.ge.s32.totalorder %s30_s26, 2  ;;  %p161_p1 = scmp.ne.s32.totalorder %s2166_s20, %s2162_s19 }
   0x7   : > { %p162_p2 = scmp.eq.s32.totalorder %s1444_s24, 1  ;;  %p167_p3 = scmp.ne.s32.totalorder %s2162_s19, %s2158_s18 }
   0x8   : > { %s2706_s26 = smov (%p32_p0, %s30_s26), 0  ;;  %p168_p5 = scmp.eq.s32.totalorder %s1445_s25, 1 }
   0x9   : > { %p2253_p4 = por %p162_p2, %p161_p1  ;;  %s146_s29 = ssub.s32 %s2174_s22, %s2706_s26 }
   0xa   : > { %p1448_p6 = scmp.ge.s32.totalorder %s2178_s23, 1  ;;  %p149_p7 = scmp.eq.s32.totalorder %s146_s29, 0 }
   0xb   : > { %p2260_p8 = por %p168_p5, %p167_p3  ;;  %p210_p9 = scmp.lt.s32.totalorder %s2178_s23, 3 }
   0xc   : > { %s2266_s6 = scalar_select %p149_p7, %s2166_s20, %s151_s27  }
   0xd   : > { %p211_p10 = pnand %p1448_p6, %p210_p9 }
   0xe   : > { %v2015_v0 = vld [vmem:[%s2693_s1 + $0x40] sm:$0xff] (!%p211_p10)   ;;  %v2180_v1 = vmov (!%p211_p10), 0.0   ;;  %v2017_v3 = vld [vmem:[%s2693_s1 + $0x48] sm:$0xff] (!%p211_p10)   ;;  %vm2181_vm0 = vmmov (!%p211_p10), 0   ;;  %p241_p11 = scmp.lt.s32.totalorder (!%p211_p10), %s2170_s21, 1  ;;  %v2019_v5 = vld [vmem:[%s2693_s1 + $0x50] sm:$0xff] (!%p211_p10)  }
   0xf   : > { %214 = sbr.rel (%p211_p10) target bundleno = 624 (0x270), region = 40  ;;  %1758 = vmatprep.subr.bf16.mxu0 (!%p211_p10), %v2180_v1  ;;  %1778 = vmatprep.subr.bf16.mxu1 (!%p211_p10), %v2180_v1  ;;  %v2016_v2 = vld [vmem:[%s2693_s1] sm:$0xff] (!%p211_p10)   ;;  %v2018_v4 = vld [vmem:[%s2693_s1 + $0x8] sm:$0xff] (!%p211_p10)   ;;  %v2020_v6 = vld [vmem:[%s2693_s1 + $0x10] sm:$0xff] (!%p211_p10)   ;;  %s1664_s17 = sshll.u32 (!%p211_p10), %s2170_s21, 4 }
  0x10   : > { %1759 = vmatpush3.bf16.msra.mxu0 (!%p211_p10), %v2015_v0  ;;  %1774 = vmatprep.mubr.msk.bf16.mxu0 (!%p211_p10), %vm2181_vm0, %v2180_v1  ;;  %v2021_v7 = vld [vmem:[%s2693_s1 + $0x58] sm:$0xff] (!%p211_p10)   ;;  %v2023_v9 = vld [vmem:[%s2693_s1 + $0x60] sm:$0xff] (!%p211_p10)   ;;  %v2025_v11 = vld [vmem:[%s2693_s1 + $0x68] sm:$0xff] (!%p211_p10)   ;;  %s2645_s7 = scalar_lea.hbm (!%p211_p10), %s2697_s5, %s1664_s17 }
  0x11   : > { %1779 = vmatpush3.bf16.msra.mxu1 (!%p211_p10), %v2016_v2  ;;  %1760 = vmatprep.subr.bf16.mxu0 (!%p211_p10), %v2180_v1  ;;  %v2022_v8 = vld [vmem:[%s2693_s1 + $0x18] sm:$0xff] (!%p211_p10)   ;;  %v2024_v10 = vld [vmem:[%s2693_s1 + $0x20] sm:$0xff] (!%p211_p10)   ;;  %v2026_v12 = vld [vmem:[%s2693_s1 + $0x28] sm:$0xff] (!%p211_p10)  }
  0x12   : > { %1780 = vmatprep.subr.bf16.mxu1 (!%p211_p10), %v2180_v1  ;;  %1794 = vmatprep.mubr.msk.bf16.mxu1 (!%p211_p10), %vm2181_vm0, %v2180_v1  ;;  %v2027_v13 = vld [vmem:[%s2693_s1 + $0x70] sm:$0xff] (!%p211_p10)   ;;  %v2029_v16 = vld [vmem:[%s2693_s1 + $0x78] sm:$0xff] (!%p211_p10)   ;;  %v2033_v19 = vld [vmem:[%s2693_s1 + $0x80] sm:$0xff] (!%p211_p10)  }
  0x13   : > { %v2028_v14 = vld [vmem:[%s2693_s1 + $0x30] sm:$0xff] (!%p211_p10)   ;;  %v2030_v17 = vld [vmem:[%s2693_s1 + $0x38] sm:$0xff] (!%p211_p10)   ;;  %v2034_v21 = vld [vmem:[%s2693_s1 + $0xc0] sm:$0xff] (!%p211_p10)  }
  0x14   : > { %1761 = vmatpush3.bf16.msra.mxu0 (!%p211_p10), %v2017_v3  ;;  %v2035_v22 = vld [vmem:[%s2693_s1 + $0x88] sm:$0xff] (!%p211_p10)   ;;  %v2037_v24 = vld [vmem:[%s2693_s1 + $0x90] sm:$0xff] (!%p211_p10)   ;;  %v2039_v26 = vld [vmem:[%s2693_s1 + $0x98] sm:$0xff] (!%p211_p10)  }
  0x15   : > { %1781 = vmatpush3.bf16.msra.mxu1 (!%p211_p10), %v2018_v4  ;;  %1762 = vmatprep.subr.bf16.mxu0 (!%p211_p10), %v2180_v1  ;;  %v2036_v23 = vld [vmem:[%s2693_s1 + $0xc8] sm:$0xff] (!%p211_p10)   ;;  %v2038_v25 = vld [vmem:[%s2693_s1 + $0xd0] sm:$0xff] (!%p211_p10)   ;;  %v2040_v27 = vld [vmem:[%s2693_s1 + $0xd8] sm:$0xff] (!%p211_p10)  }
  0x16   : > { %1782 = vmatprep.subr.bf16.mxu1 %v2180_v1  ;;  %s242_s25 = scalar_select %p241_p11, %s2170_s21, 1  ;;  %v2041_v28 = vld [vmem:[%s2693_s1 + $0xa0] sm:$0xff]   ;;  %v2043_v30 = vld [vmem:[%s2693_s1 + $0xa8] sm:$0xff]   ;;  %v2045_v32 = vld [vmem:[%s2693_s1 + $0xb0] sm:$0xff]  }
  0x17   : > { %v2042_v29 = vld [vmem:[%s2693_s1 + $0xe0] sm:$0xff]   ;;  %v2044_v31 = vld [vmem:[%s2693_s1 + $0xe8] sm:$0xff]   ;;  %v2046_v33 = vld [vmem:[%s2693_s1 + $0xf0] sm:$0xff]  }
  0x18   : > { %1763 = vmatpush3.bf16.msra.mxu0 %v2019_v5  ;;  %s1667_s9 = sshll.u32 %s242_s25, 3  ;;  %v2047_v36 = vld [vmem:[%s2693_s1 + $0xb8] sm:$0xff]   ;;  %v2050_v39 = vld [vmem:[%s2693_s1 + $0x100] sm:$0xff]   ;;  %v2053_v42 = vld [vmem:[%s2693_s1 + $0x108] sm:$0xff]  }
  0x19   : > { %1783 = vmatpush3.bf16.msra.mxu1 %v2020_v6  ;;  %1764 = vmatprep.subr.bf16.mxu0 %v2180_v1  ;;  %s2316_s16 = scalar_lea.vmem %s2692_s0, %s1667_s9  ;;  %v2048_v37 = vld [vmem:[%s2693_s1 + $0xf8] sm:$0xff]   ;;  %v2052_v41 = vld [vmem:[%s2693_s1 + $0x140] sm:$0xff]   ;;  %v2054_v43 = vld [vmem:[%s2693_s1 + $0x148] sm:$0xff]   ;;  %s2182_s9 = smov [#allocation2]  }
  0x1a   : > { %1784 = vmatprep.subr.bf16.mxu1 %v2180_v1  ;;  %v2335_v15 = vld [vmem:[%s2316_s16] ss:$0 sps:$4 sm:$0x22]   ;;  %v2055_v44 = vld [vmem:[%s2693_s1 + $0x110] sm:$0xff]   ;;  %v2057_v46 = vld [vmem:[%s2693_s1 + $0x118] sm:$0xff]   ;;  %s2104_s10 = sshll.u32 %s2182_s9, 4  ;;  %s2105_s10 = int_to_ptr.vmem [resolvable:$false] %s2104_s10 }
  0x1b   : > { %v289_v18 = vrot.slane %v2335_v15, 1  ;;  %v2351_v20 = vld [vmem:[%s2316_s16] sm:$0x1]  ;;  %v2056_v45 = vld [vmem:[%s2693_s1 + $0x150] sm:$0xff]   ;;  %v2058_v47 = vld [vmem:[%s2693_s1 + $0x158] sm:$0xff]   ;;  %s2106_s11 = scalar_lea.vmem %s2105_s10, 32 }
  0x1c   : > { %1765 = vmatpush3.bf16.msra.mxu0 %v2021_v7  ;;  %v2411_v34 = vld [vmem:[%s2316_s16] ss:$0 sps:$4 sm:$0x44]   ;;  %v2061_v50 = vld [vmem:[%s2693_s1 + $0x128] sm:$0xff]   ;;  %v2063_v52 = vld [vmem:[%s2693_s1 + $0x130] sm:$0xff]  }
  0x1d   : > { %1785 = vmatpush3.bf16.msra.mxu1 %v2022_v8  ;;  %1766 = vmatprep.subr.bf16.mxu0 %v2180_v1  ;;  %v2051_v35 = vld [vmem:[%s2316_s16] ss:$0 sps:$4 sm:$0x88]   ;;  %v488_v38 = vrot.slane %v2411_v34, 2  ;;  %v2062_v51 = vld [vmem:[%s2693_s1 + $0x168] sm:$0xff]   ;;  %v2064_v53 = vld [vmem:[%s2693_s1 + $0x170] sm:$0xff]  }
  0x1e   : > { %1786 = vmatprep.subr.bf16.mxu1 %v2180_v1  ;;  %v600_v40 = vrot.slane %v2051_v35, 3  ;;  %v2059_v48 = vld [vmem:[%s2693_s1 + $0x120] sm:$0xff]   ;;  %v2065_v54 = vld [vmem:[%s2693_s1 + $0x138] sm:$0xff]   ;;  %v2070_v61 = vld [vmem:[%s2693_s1 + $0x188] sm:$0xff]  }
  0x1f   : > { %v2060_v49 = vld [vmem:[%s2693_s1 + $0x160] sm:$0xff]   ;;  %v2066_v56 = vld [vmem:[%s2693_s1 + $0x178] sm:$0xff]   ;;  %v2071_v62 = vld [vmem:[%s2693_s1 + $0x1c8] sm:$0xff]  }
  0x20   : > { %1767 = vmatpush3.bf16.msra.mxu0 %v2023_v9  ;;  %v2068_v55 = vld [vmem:[%s2316_s16 + $0x4] ss:$0 sps:$4 sm:$0x22]   ;;  %v2072_v63 = vld [vmem:[%s2693_s1 + $0x190] sm:$0xff]   ;;  %v2074_v2 = vld [vmem:[%s2693_s1 + $0x198] sm:$0xff]  }
  0x21   : > { %1787 = vmatpush3.bf16.msra.mxu1 %v2024_v10  ;;  %1768 = vmatprep.subr.bf16.mxu0 %v2180_v1  ;;  %v691_v57 = vld [vmem:[%s2316_s16 + $0x4] sm:$0x1]  ;;  %v819_v59 = vrot.slane %v2068_v55, 1  ;;  %v2073_v0 = vld [vmem:[%s2693_s1 + $0x1d0] sm:$0xff]   ;;  %v2075_v3 = vld [vmem:[%s2693_s1 + $0x1d8] sm:$0xff]   ;;  %v1599_v10 = vcombine.low %v2351_v20, %v2351_v20  ;;  %s239_s16 = sand.u32 1, %s2162_s19  }
  0x22   : > { %1788 = vmatprep.subr.bf16.mxu1 %v2180_v1  ;;  %v2067_v58 = vld [vmem:[%s2693_s1 + $0x180] sm:$0xff]   ;;  %v2078_v6 = vld [vmem:[%s2693_s1 + $0x1a8] sm:$0xff]   ;;  %v2080_v8 = vld [vmem:[%s2693_s1 + $0x1b0] sm:$0xff]   ;;  %s240_s24 = scalar_lea.vmem [#allocation2], %s239_s16  ;;  %s1358_s8 = scalar_lea.sflag [#allocation3], %s239_s16 }
  0x23   : > { %v2069_v60 = vld [vmem:[%s2693_s1 + $0x1c0] sm:$0xff]   ;;  %v2079_v7 = vld [vmem:[%s2693_s1 + $0x1e8] sm:$0xff]   ;;  %v2081_v9 = vld [vmem:[%s2693_s1 + $0x1f0] sm:$0xff]   ;;  %s1371_s25 = sshll.u32 %s240_s24, 4  ;;  %s2647_s25 = int_to_ptr.vmem [resolvable:$true] %s1371_s25 }
  0x24   : > { %1769 = vmatpush3.bf16.msra.mxu0 %v2025_v11  ;;  %v2076_v4 = vld [vmem:[%s2693_s1 + $0x1a0] sm:$0xff]   ;;  %v2082_v11 = vld [vmem:[%s2693_s1 + $0x1b8] sm:$0xff]   ;;  %v2098_v35 = vld [vmem:[%s2695_s3 + $0x30] sm:$0xff]   ;;  %s2100_s21 = scalar_lea.vmem %s2647_s25, 16  ;;  %p2107_p1 = scmp.lt.s32.totalorder %s2647_s25, %s2105_s10 }
  0x25   : > { %1789 = vmatpush3.bf16.msra.mxu1 %v2026_v12  ;;  %1770 = vmatprep.subr.bf16.mxu0 %v2180_v1  ;;  %v2077_v5 = vld [vmem:[%s2693_s1 + $0x1e0] sm:$0xff]   ;;  %v1041_v12 = vshrl.u32 %v2335_v15, 16  ;;  %v2085_v15 = vld [vmem:[%s2693_s1 + $0x208] sm:$0xff]   ;;  %p2101_p12 = scmp.ne.s32.totalorder %s2647_s25, %s2100_s21  ;;  %p2108_p2 = scmp.lt.s32.totalorder %s2106_s11, %s2100_s21 }
  0x26   : > { %1790 = vmatprep.subr.bf16.mxu1 %v2180_v1 }
  0x27   : > { %p2102_p13 = pnand %p2101_p12, %p2253_p4  ;;  %p2109_p3 = por %p2108_p2, %p2107_p1 }
  0x28   : > { %1771 = vmatpush3.bf16.msra.mxu0 %v2027_v13  ;;  %v2083_v13 = vld [vmem:[%s2693_s1 + $0x1f8] sm:$0xff]  }
  0x29   : > { %1791 = vmatpush3.bf16.msra.mxu1 %v2028_v14  ;;  %1772 = vmatprep.subr.bf16.mxu0 %v2180_v1  ;;  %v931_v14 = vshrl.u32 %v1599_v10, 16  ;;  %v1245_v10 = vld [vmem:[%s2694_s2] sm:$0x1]  ;;  %p2103_p0 = pneg %p2102_p13 }
  0x2a   : > { %1792 = vmatprep.subr.bf16.mxu1 %v2180_v1 }
  0x2b   : > { %p2110_p5 = pnand %p2109_p3, %p2103_p0 }
  0x2c   : > { %1773 = vmatpush3.bf16.msra.mxu0 %v2029_v16  ;;  %v2084_v16 = vld [vmem:[%s2693_s1 + $0x200] sm:$0xff]  }
  0x2d   : > { %1793 = vmatpush3.bf16.msra.mxu1 %v2030_v17  ;;  %1798 = vmatprep.subr.bf16.mxu0 %v2180_v1  ;;  %v1043_v17 = vrot.slane %v1041_v12, 1 }
  0x2e   : > { %1818 = vmatprep.subr.bf16.mxu1 %v2180_v1 }
  0x2f   : > { %1775 = vmatmul.mubr.bf16.vlgmr.msra.gmra.mrb[0].mxu0 %v289_v18  ;;  %v2086_v18 = vld [vmem:[%s2693_s1 + $0x210] sm:$0xff]  }
  0x30   : > { %1795 = vmatmul.mubr.bf16.vlgmr.msra.gmra.mrb[0].mxu1 %v2351_v20  ;;  %1799 = vmatpush3.bf16.msra.mxu0 %v2033_v19  ;;  %v2087_v19 = vld [vmem:[%s2693_s1 + $0x218] sm:$0xff]   ;;  %v2088_v20 = vld [vmem:[%s2693_s1 + $0x220] sm:$0xff]  }
  0x31   : > { %1819 = vmatpush3.bf16.msra.mxu1 %v2034_v21  ;;  %1800 = vmatprep.subr.bf16.mxu0 %v2180_v1  ;;  %v2089_v21 = vld [vmem:[%s2693_s1 + $0x228] sm:$0xff]  }
  0x32   : > { %1820 = vmatprep.subr.bf16.mxu1 %v2180_v1  ;;  %1814 = vmatprep.mubr.msk.bf16.mxu0 %vm2181_vm0, %v2180_v1 }
  0x33   : > { %1834 = vmatprep.mubr.msk.bf16.mxu1 %vm2181_vm0, %v2180_v1 }
  0x34   : > { %1801 = vmatpush3.bf16.msra.mxu0 %v2035_v22  ;;  %v2090_v22 = vld [vmem:[%s2693_s1 + $0x230] sm:$0xff]  }
  0x35   : > { %1821 = vmatpush3.bf16.msra.mxu1 %v2036_v23  ;;  %1802 = vmatprep.subr.bf16.mxu0 %v2180_v1  ;;  %v1152_v23 = vshrl.u32 %v2411_v34, 16 }
  0x36   : > { %1822 = vmatprep.subr.bf16.mxu1 %v2180_v1 }
  0x38   : > { %1803 = vmatpush3.bf16.msra.mxu0 %v2037_v24  ;;  %v2091_v24 = vld [vmem:[%s2693_s1 + $0x238] sm:$0xff]  }
  0x39   : > { %1823 = vmatpush3.bf16.msra.mxu1 %v2038_v25  ;;  %1804 = vmatprep.subr.bf16.mxu0 %v2180_v1  ;;  %v1154_v25 = vrot.slane %v1152_v23, 2 }
  0x3a   : > { %1824 = vmatprep.subr.bf16.mxu1 %v2180_v1 }
  0x3c   : > { %1805 = vmatpush3.bf16.msra.mxu0 %v2039_v26  ;;  %v2092_v26 = vld [vmem:[%s2695_s3] sm:$0xff]  }
  0x3d   : > { %1825 = vmatpush3.bf16.msra.mxu1 %v2040_v27  ;;  %1806 = vmatprep.subr.bf16.mxu0 %v2180_v1  ;;  %v2093_v27 = vld [vmem:[%s2695_s3 + $0x8] sm:$0xff]  }
  0x3e   : > { %1826 = vmatprep.subr.bf16.mxu1 %v2180_v1 }
  0x40   : > { %1807 = vmatpush3.bf16.msra.mxu0 %v2041_v28  ;;  %v2094_v28 = vld [vmem:[%s2695_s3 + $0x10] sm:$0xff]  }
  0x41   : > { %1827 = vmatpush3.bf16.msra.mxu1 %v2042_v29  ;;  %1808 = vmatprep.subr.bf16.mxu0 %v2180_v1  ;;  %v2095_v29 = vld [vmem:[%s2695_s3 + $0x18] sm:$0xff]  }
  0x42   : > { %1828 = vmatprep.subr.bf16.mxu1 %v2180_v1 }
  0x44   : > { %1809 = vmatpush3.bf16.msra.mxu0 %v2043_v30  ;;  %v2096_v30 = vld [vmem:[%s2695_s3 + $0x20] sm:$0xff]  }
  0x45   : > { %1829 = vmatpush3.bf16.msra.mxu1 %v2044_v31  ;;  %1810 = vmatprep.subr.bf16.mxu0 %v2180_v1  ;;  %v2097_v31 = vld [vmem:[%s2695_s3 + $0x28] sm:$0xff]  }
  0x46   : > { %1830 = vmatprep.subr.bf16.mxu1 %v2180_v1 }
  0x48   : > { %1811 = vmatpush3.bf16.msra.mxu0 %v2045_v32 }
  0x49   : > { %1831 = vmatpush3.bf16.msra.mxu1 %v2046_v33  ;;  %1812 = vmatprep.subr.bf16.mxu0 %v2180_v1 }
  0x4a   : > { %1832 = vmatprep.subr.bf16.mxu1 %v2180_v1 }
  0x4c   : > { %1813 = vmatpush3.bf16.msra.mxu0 %v2047_v36 }
  0x4d   : > { %1833 = vmatpush3.bf16.msra.mxu1 %v2048_v37  ;;  %1838 = vmatprep.subr.bf16.mxu0 %v2180_v1 }
  0x4e   : > { %1858 = vmatprep.subr.bf16.mxu1 %v2180_v1 }
  0x4f   : > { %1815 = vmatmul.mubr.bf16.vlgmr.msra.gmra.mrb[4].mxu0 %v488_v38 }
  0x50   : > { %1839 = vmatpush3.bf16.msra.mxu0 %v2050_v39  ;;  %1835 = vmatmul.mubr.bf16.vlgmr.msra.gmra.mrb[4].mxu1 %v600_v40 }
  0x51   : > { %1859 = vmatpush3.bf16.msra.mxu1 %v2052_v41  ;;  %1840 = vmatprep.subr.bf16.mxu0 %v2180_v1 }
  0x52   : > { %1860 = vmatprep.subr.bf16.mxu1 %v2180_v1  ;;  %1854 = vmatprep.mubr.msk.bf16.mxu0 %vm2181_vm0, %v2180_v1 }
  0x53   : > { %1874 = vmatprep.mubr.msk.bf16.mxu1 %vm2181_vm0, %v2180_v1 }
  0x54   : > { %1841 = vmatpush3.bf16.msra.mxu0 %v2053_v42  ;;  %v2099_v42 = vld [vmem:[%s2695_s3 + $0x38] sm:$0xff]  }
  0x55   : > { %1861 = vmatpush3.bf16.msra.mxu1 %v2054_v43  ;;  %1842 = vmatprep.subr.bf16.mxu0 %v2180_v1 }
  0x56   : > { %1862 = vmatprep.subr.bf16.mxu1 %v2180_v1 }
  0x58   : > { %1843 = vmatpush3.bf16.msra.mxu0 %v2055_v44 }
  0x59   : > { %1863 = vmatpush3.bf16.msra.mxu1 %v2056_v45  ;;  %1844 = vmatprep.subr.bf16.mxu0 %v2180_v1 }
  0x5a   : > { %1864 = vmatprep.subr.bf16.mxu1 %v2180_v1 }
  0x5c   : > { %1845 = vmatpush3.bf16.msra.mxu0 %v2057_v46 }
  0x5d   : > { %1865 = vmatpush3.bf16.msra.mxu1 %v2058_v47  ;;  %1846 = vmatprep.subr.bf16.mxu0 %v2180_v1 }
  0x5e   : > { %1866 = vmatprep.subr.bf16.mxu1 %v2180_v1 }
  0x60   : > { %1847 = vmatpush3.bf16.msra.mxu0 %v2059_v48 }
  0x61   : > { %1867 = vmatpush3.bf16.msra.mxu1 %v2060_v49  ;;  %1848 = vmatprep.subr.bf16.mxu0 %v2180_v1 }
  0x62   : > { %1868 = vmatprep.subr.bf16.mxu1 %v2180_v1 }
  0x64   : > { %1849 = vmatpush3.bf16.msra.mxu0 %v2061_v50 }
  0x65   : > { %1869 = vmatpush3.bf16.msra.mxu1 %v2062_v51  ;;  %1850 = vmatprep.subr.bf16.mxu0 %v2180_v1 }
  0x66   : > { %1870 = vmatprep.subr.bf16.mxu1 %v2180_v1 }
  0x68   : > { %1851 = vmatpush3.bf16.msra.mxu0 %v2063_v52 }
  0x69   : > { %1871 = vmatpush3.bf16.msra.mxu1 %v2064_v53  ;;  %1852 = vmatprep.subr.bf16.mxu0 %v2180_v1 }
  0x6a   : > { %1872 = vmatprep.subr.bf16.mxu1 %v2180_v1 }
  0x6c   : > { %1853 = vmatpush3.bf16.msra.mxu0 %v2065_v54 }
  0x6d   : > { %1873 = vmatpush3.bf16.msra.mxu1 %v2066_v56  ;;  %1878 = vmatprep.subr.bf16.mxu0 %v2180_v1 }
  0x6e   : > { %1898 = vmatprep.subr.bf16.mxu1 %v2180_v1 }
  0x6f   : > { %1855 = vmatmul.mubr.bf16.vlgmr.msra.gmra.mrb[8].mxu0 %v691_v57 }
  0x70   : > { %1879 = vmatpush3.bf16.msra.mxu0 %v2067_v58  ;;  %1875 = vmatmul.mubr.bf16.vlgmr.msra.gmra.mrb[8].mxu1 %v819_v59 }
  0x71   : > { %1899 = vmatpush3.bf16.msra.mxu1 %v2069_v60  ;;  %1880 = vmatprep.subr.bf16.mxu0 %v2180_v1 }
  0x72   : > { %1900 = vmatprep.subr.bf16.mxu1 %v2180_v1  ;;  %1894 = vmatprep.mubr.msk.bf16.mxu0 %vm2181_vm0, %v2180_v1 }
  0x73   : > { %1914 = vmatprep.mubr.msk.bf16.mxu1 %vm2181_vm0, %v2180_v1 }
  0x74   : > { %1881 = vmatpush3.bf16.msra.mxu0 %v2070_v61 }
  0x75   : > { %1901 = vmatpush3.bf16.msra.mxu1 %v2071_v62  ;;  %1882 = vmatprep.subr.bf16.mxu0 %v2180_v1 }
  0x76   : > { %1902 = vmatprep.subr.bf16.mxu1 %v2180_v1 }
  0x78   : > { %1883 = vmatpush3.bf16.msra.mxu0 %v2072_v63 }
  0x79   : > { %1903 = vmatpush3.bf16.msra.mxu1 %v2073_v0  ;;  %1884 = vmatprep.subr.bf16.mxu0 %v2180_v1 }
  0x7a   : > { %1904 = vmatprep.subr.bf16.mxu1 %v2180_v1 }
  0x7c   : > { %1885 = vmatpush3.bf16.msra.mxu0 %v2074_v2 }
  0x7d   : > { %1905 = vmatpush3.bf16.msra.mxu1 %v2075_v3  ;;  %1886 = vmatprep.subr.bf16.mxu0 %v2180_v1 }
  0x7e   : > { %1906 = vmatprep.subr.bf16.mxu1 %v2180_v1 }
  0x80   : > { %1887 = vmatpush3.bf16.msra.mxu0 %v2076_v4 }
  0x81   : > { %1907 = vmatpush3.bf16.msra.mxu1 %v2077_v5  ;;  %1888 = vmatprep.subr.bf16.mxu0 %v2180_v1 }
  0x82   : > { %1908 = vmatprep.subr.bf16.mxu1 %v2180_v1 }
  0x84   : > { %1889 = vmatpush3.bf16.msra.mxu0 %v2078_v6 }
  0x85   : > { %1909 = vmatpush3.bf16.msra.mxu1 %v2079_v7  ;;  %1890 = vmatprep.subr.bf16.mxu0 %v2180_v1 }
  0x86   : > { %1910 = vmatprep.subr.bf16.mxu1 %v2180_v1 }
  0x88   : > { %1891 = vmatpush3.bf16.msra.mxu0 %v2080_v8 }
  0x89   : > { %1911 = vmatpush3.bf16.msra.mxu1 %v2081_v9  ;;  %1892 = vmatprep.subr.bf16.mxu0 %v2180_v1 }
  0x8a   : > { %1912 = vmatprep.subr.bf16.mxu1 %v2180_v1 }
  0x8c   : > { %1893 = vmatpush3.bf16.msra.mxu0 %v2082_v11 }
  0x8d   : > { %1913 = vmatpush3.bf16.msra.mxu1 %v2083_v13  ;;  %1918 = vmatprep.subr.bf16.mxu0 %v2180_v1 }
  0x8e   : > { %1938 = vmatprep.subr.bf16.mxu1 %v2180_v1 }
  0x8f   : > { %1895 = vmatmul.mubr.bf16.vlgmr.msra.gmra.mrb[12].mxu0 %v931_v14 }
  0x90   : > { %1919 = vmatpush3.bf16.msra.mxu0 %v2084_v16  ;;  %1915 = vmatmul.mubr.bf16.vlgmr.msra.gmra.mrb[12].mxu1 %v1043_v17 }
  0x91   : > { %1920 = vmatprep.subr.bf16.mxu0 %v2180_v1  ;;  %1934 = vmatprep.mubr.msk.bf16.mxu0 %vm2181_vm0, %v2180_v1 }
  0x92   : > { %1954 = vmatprep.mubr.msk.bf16.mxu1 %vm2181_vm0, %v2180_v1  ;;  %1939 = vmatpush3.bf16.msra.mxu1 %v2092_v26 }
  0x93   : > { %1940 = vmatprep.subr.bf16.mxu1 %v2180_v1 }
  0x94   : > { %1921 = vmatpush3.bf16.msra.mxu0 %v2085_v15 }
  0x95   : > { %1922 = vmatprep.subr.bf16.mxu0 %v2180_v1 }
  0x96   : > { %1941 = vmatpush3.bf16.msra.mxu1 %v2093_v27 }
  0x97   : > { %1942 = vmatprep.subr.bf16.mxu1 %v2180_v1 }
  0x98   : > { %1923 = vmatpush3.bf16.msra.mxu0 %v2086_v18 }
  0x99   : > { %1924 = vmatprep.subr.bf16.mxu0 %v2180_v1 }
  0x9a   : > { %1943 = vmatpush3.bf16.msra.mxu1 %v2094_v28 }
  0x9b   : > { %1944 = vmatprep.subr.bf16.mxu1 %v2180_v1 }
  0x9c   : > { %1925 = vmatpush3.bf16.msra.mxu0 %v2087_v19  ;;  %v1267_v19 = vld [vmem:[%s2696_s4] sm:$0x1] }
  0x9d   : > { %1926 = vmatprep.subr.bf16.mxu0 %v2180_v1 }
  0x9e   : > { %1945 = vmatpush3.bf16.msra.mxu1 %v2095_v29 }
  0x9f   : > { %1946 = vmatprep.subr.bf16.mxu1 %v2180_v1 }
  0xa0   : > { %1927 = vmatpush3.bf16.msra.mxu0 %v2088_v20 }
  0xa1   : > { %1928 = vmatprep.subr.bf16.mxu0 %v2180_v1 }
  0xa2   : > { %1947 = vmatpush3.bf16.msra.mxu1 %v2096_v30 }
  0xa3   : > { %1948 = vmatprep.subr.bf16.mxu1 %v2180_v1 }
  0xa4   : > { %1929 = vmatpush3.bf16.msra.mxu0 %v2089_v21 }
  0xa5   : > { %1930 = vmatprep.subr.bf16.mxu0 %v2180_v1 }
  0xa6   : > { %1949 = vmatpush3.bf16.msra.mxu1 %v2097_v31 }
  0xa7   : > { %1950 = vmatprep.subr.bf16.mxu1 %v2180_v1 }
  0xa8   : > { %1931 = vmatpush3.bf16.msra.mxu0 %v2090_v22 }
  0xa9   : > { %1932 = vmatprep.subr.bf16.mxu0 %v2180_v1 }
  0xaa   : > { %1951 = vmatpush3.bf16.msra.mxu1 %v2098_v35 }
  0xab   : > { %1952 = vmatprep.subr.bf16.mxu1 %v2180_v1 }
  0xac   : > { %1933 = vmatpush3.bf16.msra.mxu0 %v2091_v24 }
  0xae   : > { %1953 = vmatpush3.bf16.msra.mxu1 %v2099_v42 }
  0xaf   : > { %1935 = vmatmul.mubr.bf16.vlgmr.msra.gmra.mrb[16].mxu0 %v1154_v25 }
 0x102   : > { %v373_v32 = vpop.f32.mrb[0].mxu0 }
 0x103   : > { %v1776_v33 = vpop.f32.mrb[1].mxu0  ;;  %v461_v34 = vpop.f32.mrb[0].mxu1 }
 0x104   : > { %v462_v36 = vadd.f32 %v461_v34, %v373_v32  ;;  %v376_v37 = vpop.f32.mrb[2].mxu0  ;;  %v1796_v38 = vpop.f32.mrb[1].mxu1 }
 0x105   : > { %v1777_v39 = vpop.f32.mrb[3].mxu0  ;;  %v464_v40 = vpop.f32.mrb[2].mxu1 }
 0x106   : > { %v1797_v41 = vpop.f32.mrb[3].mxu1 }
 0x122   : > { %v572_v43 = vpop.f32.mrb[4].mxu0 }
 0x123   : > { %v578_v44 = vadd.f32 %v572_v43, %v462_v36  ;;  %v1816_v45 = vpop.f32.mrb[5].mxu0  ;;  %v684_v46 = vpop.f32.mrb[4].mxu1 }
 0x124   : > { %v575_v47 = vpop.f32.mrb[6].mxu0  ;;  %v1836_v48 = vpop.f32.mrb[5].mxu1 }
 0x125   : > { %v690_v49 = vadd.f32 %v684_v46, %v578_v44  ;;  %v1817_v50 = vpop.f32.mrb[7].mxu0  ;;  %v687_v51 = vpop.f32.mrb[6].mxu1 }
 0x126   : > { %v1837_v52 = vpop.f32.mrb[7].mxu1 }
 0x142   : > { %v791_v53 = vpop.f32.mrb[8].mxu0 }
 0x143   : > { %v797_v54 = vadd.f32 %v791_v53, %v690_v49  ;;  %v1856_v55 = vpop.f32.mrb[9].mxu0  ;;  %v903_v56 = vpop.f32.mrb[8].mxu1 }
 0x144   : > { %v794_v1 = vpop.f32.mrb[10].mxu0  ;;  %v1876_v57 = vpop.f32.mrb[9].mxu1 }
 0x145   : > { %v909_v58 = vadd.f32 %v903_v56, %v797_v54  ;;  %v1857_v59 = vpop.f32.mrb[11].mxu0  ;;  %v906_v60 = vpop.f32.mrb[10].mxu1 }
 0x146   : > { %v1877_v61 = vpop.f32.mrb[11].mxu1 }
 0x162   : > { %v1016_v62 = vpop.f32.mrb[12].mxu0 }
 0x163   : > { %v1022_v63 = vadd.f32 %v1016_v62, %v909_v58  ;;  %v1896_v0 = vpop.f32.mrb[13].mxu0  ;;  %v1127_v2 = vpop.f32.mrb[12].mxu1 }
 0x164   : > { %v1019_v3 = vpop.f32.mrb[14].mxu0  ;;  %v1916_v4 = vpop.f32.mrb[13].mxu1 }
 0x165   : > { %v1133_v5 = vadd.f32 %v1127_v2, %v1022_v63  ;;  %v1897_v6 = vpop.f32.mrb[15].mxu0  ;;  %v1130_v7 = vpop.f32.mrb[14].mxu1 }
 0x166   : > { %v1917_v8 = vpop.f32.mrb[15].mxu1 }
 0x182   : > { %v1238_v9 = vpop.f32.mrb[16].mxu0 }
 0x183   : > { %v1244_v11 = vadd.f32 %v1238_v9, %v1133_v5  ;;  %v1936_v12 = vpop.f32.mrb[17].mxu0 }
 0x184   : > { %v1241_v13 = vpop.f32.mrb[18].mxu0 }
 0x185   : > { %v1246_v14 = vadd.f32 %v1245_v10, %v1244_v11  ;;  %v1937_v16 = vpop.f32.mrb[19].mxu0 }
 0x187   : > { %vm1247_vm1 = vcmp.ge.f32.partialorder %v1246_v14, 0.0  ;;  %v1248_v17 = vmul.f32 0.01, %v1246_v14 }
 0x189   : > { %v1249_v15 = vsel %vm1247_vm1, %v1246_v14, %v1248_v17 }
 0x18a   : > { %v1250_v18 = vpack.c.bf16 %v1249_v15, %v1249_v15 }
 0x18c   : > { %1955 = vmatmul.mubr.bf16.vlgmr.msra.gmra.mrb[16].mxu1 %v1250_v18 }
 0x25f   : > { %v1350_v20 = vpop.f32.mrb[16].mxu1 }
 0x260   : > { %v1351_v21 = vadd.f32 %v1350_v20, %v1267_v19  ;;  %v1956_v22 = vpop.f32.mrb[17].mxu1 }
 0x261   : > { %v1353_v23 = vpop.f32.mrb[18].mxu1 }
 0x262   : > { %1356 = vst [vmem:[%s240_s24] sm:$0x1] %v1351_v21  ;;  %v1957_v24 = vpop.f32.mrb[19].mxu1 }
 0x263   : > { %2113 = shalt.err (!%p2110_p5)
}
 0x264   : > { %s2114_s12 = scalar_lea.hbm %s2645_s7, 16  ;;  %s2118_s14 = scalar_lea.hbm %s2697_s5, 32 }
 0x265   : > { %p2115_p6 = scmp.ne.s32.totalorder %s2645_s7, %s2114_s12  ;;  %p2119_p10 = scmp.lt.u32.totalorder %s2645_s7, %s2697_s5 }
 0x266   : > { %p2120_p11 = scmp.lt.u32.totalorder %s2118_s14, %s2114_s12  ;;  %p2122_p13 = scmp.lt.u32.totalorder %s2114_s12, %s2645_s7 }
 0x267   : > { %p2116_p7 = pnand %p2115_p6, %p2253_p4 }
 0x268   : > { %p2121_p12 = por %p2120_p11, %p2119_p10 }
 0x269   : > { %p2117_p9 = pneg %p2116_p7 }
 0x26a   : > { %p2123_p0 = por %p2122_p13, %p2121_p12 }
 0x26c   : > { %p2124_p1 = pnand %p2123_p0, %p2117_p9 }
 0x26e   : > { %2127 = shalt.err (!%p2124_p1)
}
 0x26f   : > { %1958 = dma.vmem_to_hbm [thread:$0]  (%p2253_p4), %s2647_s25, 16, %s2645_s7, %s1358_s8  }
 0x270 PF: > { %p1964_p2 = scmp.ge.s32.totalorder %s2178_s23, 2  ;;  %s1383_s24 = sand.u32 1, %s2158_s18  }
 0x271   : > { %s1384_s27 = scalar_lea.sflag [#allocation3], %s1383_s24 }
 0x272   : > { %p1961_p3 = pnand %p1964_p2, %p2260_p8 }
 0x274   : > { %2153 = dma.done.wait (!%p1961_p3), %s1384_s27, 16  }
 0x275   : > { %2155 = vsyncadd (!%p1961_p3), %s1384_s27, 4294967280  ;;  %s18_s23 = sadd.s32 1, %s2178_s23   ;;  %s2700_s18 = smov %s2162_s19 }
 0x276   : > { %p15_p5 = scmp.ge.s32.totalorder %s18_s23, 4   ;;  %s2701_s19 = smov %s2166_s20 }
 0x277   : > { %s2702_s20 = smov %s2266_s6  ;;  %s2703_s21 = smov %s2174_s22 }
 0x278   : > { %s2704_s22 = smov %s2706_s26  ;;  %17 = sbr.rel (!%p15_p5) target bundleno = 4 (0x4), region = 83 }
 0x27f   :  { %1388 = vsyncpa [#allocation3], 1 }
 0x280   :  { %1390 = vsyncpa [#allocation3 + $0x1], 1 }

</bundles_post_ra>
